<compile_context>
chip_gen: v6e
topology: v6e:2x2x1
jax: 0.10.0
libtpu: 0.0.40
codegen_flags: <defaults>
</compile_context>

<pallas_src>
import jax
import jax.numpy as jnp
from jax.experimental import pallas as pl
from jax.experimental.pallas import tpu as pltpu


def _elu(v):
    # ELU(alpha=1): x if x > 0 else exp(x) - 1
    return jnp.where(v > 0.0, v, jnp.exp(jnp.minimum(v, 0.0)) - 1.0)


# ------------------------------ fused kernel ------------------------------

def _make_eegnet_kernel(H):
    CW2 = H + 2                   # conv2 output width (padded width = H + 33)
    OW2 = (CW2 - 2) // 4 + 1      # MaxPool2d(2, 4) output width
    CW3 = OW2                     # conv3 output width (padded width = OW2 + 3)
    OW3 = (CW3 - 4) // 4 + 1      # MaxPool2d((2, 4)) output width

    def kernel(x_ref, w1_ref, p1_ref, a2_ref, p2_ref, cs2_ref, rs2_ref,
               a3_ref, p3_ref, rs3_ref, cs3_ref, wf_ref, fcb_ref,
               o_ref, pad2_ref, pad3_ref):
        f32 = jnp.float32

        # ---- conv1: Conv2d(1, 16, (1, 272)) == (16,272) @ (272,H), lane-dense
        y1 = jnp.dot(w1_ref[...], x_ref[0], preferred_element_type=f32)
        y1 = _elu(y1 + p1_ref[:, 0:1]) * p1_ref[:, 1:2] + p1_ref[:, 2:3]
        # TODO(synk): F.dropout(0.25) uses torch RNG (training=True default);
        # treated as identity (inference) here and below.

        # ---- permute(0,3,1,2) is free; ZeroPad2d((16,17,1,1)): height-padding
        # rows are folded into the band matrices, only width padding is stored.
        pad2_ref[...] = jnp.zeros_like(pad2_ref)            # (16, H+33)
        pad2_ref[:, 16:16 + H] = y1

        # ---- conv2: Conv2d(1, 4, (2, 32)) as 32 banded matmuls, restricted to
        # the 32 rows (co*8 + j, heights {0,1,4,5,8,9,12,13}) read by pooling.
        v2 = jnp.dot(a2_ref[0], pad2_ref[:, 0:CW2], preferred_element_type=f32)
        for kw in range(1, 32):
            v2 = v2 + jnp.dot(a2_ref[kw], pad2_ref[:, kw:kw + CW2],
                              preferred_element_type=f32)

        # ---- MaxPool2d(2, 4): column-select (pre-activation) -> ELU+BN2 ->
        # row-select, all via precomputed 0/1 selection matmuls (MXU work).
        cands = []
        for d2 in range(2):
            c = jnp.dot(v2, cs2_ref[d2], preferred_element_type=f32)  # (32, OW2)
            c = _elu(c + p2_ref[:, 0:1]) * p2_ref[:, 1:2] + p2_ref[:, 2:3]
            for d1 in range(2):
                cands.append(jnp.dot(rs2_ref[d1], c,
                                     preferred_element_type=f32))     # (16, OW2)
        p2v = cands[0]
        for t in cands[1:]:
            p2v = jnp.maximum(p2v, t)                       # rows cin*4 + oh

        # ---- ZeroPad2d((2, 1, 4, 3)): height padding rows are always zero and
        # folded into the conv3 band matrices; only width padding is stored.
        pad3_ref[...] = jnp.zeros_like(pad3_ref)            # (16, OW2 + 3)
        pad3_ref[:, 2:2 + OW2] = p2v

        # ---- conv3: Conv2d(4, 4, (8, 4)) as 4 banded matmuls (16,16)@(16,CW3)
        v3 = jnp.dot(a3_ref[0], pad3_ref[:, 0:CW3], preferred_element_type=f32)
        for kw in range(1, 4):
            v3 = v3 + jnp.dot(a3_ref[kw], pad3_ref[:, kw:kw + CW3],
                              preferred_element_type=f32)
        v3 = _elu(v3 + p3_ref[:, 0:1]) * p3_ref[:, 1:2] + p3_ref[:, 2:3]

        # ---- MaxPool2d((2, 4)) via precomputed selection matmuls
        rprod = [jnp.dot(rs3_ref[d1], v3, preferred_element_type=f32)
                 for d1 in range(2)]                        # (8, CW3)
        cand3 = [jnp.dot(r, cs3_ref[d2], preferred_element_type=f32)
                 for r in rprod for d2 in range(4)]         # (8, OW3)
        p3v = cand3[0]
        for t in cand3[1:]:
            p3v = jnp.maximum(p3v, t)                       # rows co*2 + oh

        # ---- Linear(96, 1) + sigmoid.
        # TODO(synk): the reference does x.view(-1, 32) then Linear(96, 1), which
        # is shape-inconsistent for any input; the Linear(96,1)-consistent
        # per-sample flatten (co, oh, ow order) is used instead.
        z = jnp.sum(wf_ref[...] * p3v, axis=1, keepdims=True)    # (8, 1)
        z = jnp.sum(z, axis=0, keepdims=True) + fcb_ref[...]     # (1, 1)
        o_ref[0] = 1.0 / (1.0 + jnp.exp(-z))

    return kernel


# -------------------------------- wrapper ---------------------------------

def eegnet_forward(x, p):
    B, C, H, W = x.shape
    if C != 1 or W != 272:
        raise ValueError("EEGNet expects input of shape (B, 1, H, 272)")
    CW2 = H + 2
    OW2 = (CW2 - 2) // 4 + 1
    CW3 = OW2
    OW3 = (CW3 - 4) // 4 + 1
    if 8 * OW3 != p["wf"].shape[1]:
        raise ValueError("flattened feature count does not match fc1.in_features")

    f32 = jnp.float32
    rsqrt = jax.lax.rsqrt

    # Fold BatchNorm (eps = 0, matching BatchNorm2d(C, False); running stats).
    s1 = p["g1"] * rsqrt(p["v1"]); t1 = p["beta1"] - p["m1"] * s1
    s2 = p["g2"] * rsqrt(p["v2"]); t2 = p["beta2"] - p["m2"] * s2
    s3 = p["g3"] * rsqrt(p["v3"]); t3 = p["beta3"] - p["m3"] * s3

    p1 = jnp.stack([p["b1"], s1, t1], axis=1).astype(f32)                 # (16, 3)
    p2 = jnp.stack([jnp.repeat(p["b2"], 8), jnp.repeat(s2, 8),
                    jnp.repeat(t2, 8)], axis=1).astype(f32)               # (32, 3)
    p3 = jnp.stack([jnp.repeat(p["b3"], 4), jnp.repeat(s3, 4),
                    jnp.repeat(t3, 4)], axis=1).astype(f32)               # (16, 3)

    w1m = p["w1"].reshape(16, W).astype(f32)                              # (16, 272)

    # conv2 band matrices restricted to the 32 pooling rows q = co*8 + j with
    # conv-output heights OHS[j]; columns are the 16 conv1 channels (the two
    # height-padding rows of ZeroPad2d((16,17,1,1)) are always zero -> dropped).
    # a2[kw, co*8+j, c] = w2[co, 0, c+1-OHS[j], kw] if that tap is in [0, 2).
    ohs = jnp.array([0, 1, 4, 5, 8, 9, 12, 13], jnp.int32)
    w2r = p["w2"].reshape(4, 2, 32)                                       # (co,kh,kw)
    cidx = jnp.arange(16)
    kh2 = cidx[None, :] + 1 - ohs[:, None]                                # (j, c)
    band2 = ((kh2 >= 0) & (kh2 < 2)).astype(f32)
    a2 = w2r[:, jnp.clip(kh2, 0, 1), :] * band2[None, :, :, None]         # (4,8,16,32)
    a2 = jnp.transpose(a2, (3, 0, 1, 2)).reshape(32, 32, 16).astype(f32)  # (kw,q,c)

    # conv3 band matrices over the 16 non-padding rows of padding2's output:
    # a3[kw, co*4+oh, cin*4+j] = w3[co, cin, j+4-oh, kw]  (tap always valid).
    w3r = p["w3"]                                                         # (4,4,8,4)
    oh3 = jnp.arange(4); j3 = jnp.arange(4)
    kh3 = j3[None, :] + 4 - oh3[:, None]                                  # (oh, j)
    a3 = w3r[:, :, kh3, :]                                                # (co,cin,oh,j,kw)
    a3 = jnp.transpose(a3, (4, 0, 2, 1, 3)).reshape(4, 16, 16).astype(f32)

    # Precomputed 0/1 selection matrices for the two max-pools.
    wcol = jnp.arange(CW2)
    csel2 = jnp.stack([(wcol[:, None] == 4 * jnp.arange(OW2)[None, :] + d)
                       for d in range(2)]).astype(f32)                    # (2,CW2,OW2)
    i16 = jnp.arange(16)
    rsel2 = jnp.stack(
        [(jnp.arange(32)[None, :] ==
          (i16[:, None] // 4) * 8 + (i16[:, None] % 4) * 2 + d)
         for d in range(2)]).astype(f32)                                  # (2,16,32)
    i8 = jnp.arange(8)
    rsel3 = jnp.stack(
        [(jnp.arange(16)[None, :] ==
          (i8[:, None] // 2) * 4 + (i8[:, None] % 2) * 2 + d)
         for d in range(2)]).astype(f32)                                  # (2,8,16)
    wcol3 = jnp.arange(CW3)
    csel3 = jnp.stack([(wcol3[:, None] == 4 * jnp.arange(OW3)[None, :] + d)
                       for d in range(4)]).astype(f32)                    # (4,CW3,OW3)

    wf2 = p["wf"].reshape(8, OW3).astype(f32)                             # (8, OW3)
    fcb = p["bf"].reshape(1, 1).astype(f32)

    # Lane-dense conv1 input layout: (B, 272, H).
    xt = jnp.transpose(x[:, 0, :, :], (0, 2, 1)).astype(f32)

    kernel = _make_eegnet_kernel(H)
    out = pl.pallas_call(
        kernel,
        out_shape=jax.ShapeDtypeStruct((B, 1, 1), f32),
        grid=(B,),
        in_specs=[
            pl.BlockSpec((1, W, H), lambda b: (b, 0, 0)),       # xt
            pl.BlockSpec((16, W), lambda b: (0, 0)),            # w1m
            pl.BlockSpec((16, 3), lambda b: (0, 0)),            # p1
            pl.BlockSpec((32, 32, 16), lambda b: (0, 0, 0)),    # a2
            pl.BlockSpec((32, 3), lambda b: (0, 0)),            # p2
            pl.BlockSpec((2, CW2, OW2), lambda b: (0, 0, 0)),   # csel2
            pl.BlockSpec((2, 16, 32), lambda b: (0, 0, 0)),     # rsel2
            pl.BlockSpec((4, 16, 16), lambda b: (0, 0, 0)),     # a3
            pl.BlockSpec((16, 3), lambda b: (0, 0)),            # p3
            pl.BlockSpec((2, 8, 16), lambda b: (0, 0, 0)),      # rsel3
            pl.BlockSpec((4, CW3, OW3), lambda b: (0, 0, 0)),   # csel3
            pl.BlockSpec((8, OW3), lambda b: (0, 0)),           # wf2
            pl.BlockSpec((1, 1), lambda b: (0, 0)),             # fcb
        ],
        out_specs=pl.BlockSpec((1, 1, 1), lambda b: (b, 0, 0)),
        scratch_shapes=[pltpu.VMEM((16, H + 33), f32),          # padded conv2 input
                        pltpu.VMEM((16, OW2 + 3), f32)],        # padded conv3 input
        compiler_params=pltpu.CompilerParams(
            dimension_semantics=("parallel",)),
    )(xt, w1m, p1, a2, p2, csel2, rsel2, a3, p3, rsel3, csel3, wf2, fcb)
    return out.reshape(B, 1)


# ----------------------------- parameter init -----------------------------

def init_params(key):
    ks = jax.random.split(key, 11)

    def n(k, shape, s=0.1):
        return jax.random.normal(k, shape, jnp.float32) * s

    def bn(k, c):
        k1, k2, k3, k4 = jax.random.split(k, 4)
        return (jax.random.uniform(k1, (c,), jnp.float32, 0.8, 1.2),   # gamma
                n(k2, (c,)),                                           # beta
                n(k3, (c,)),                                           # running mean
                jax.random.uniform(k4, (c,), jnp.float32, 0.5, 1.5))   # running var

    p = {}
    p["w1"], p["b1"] = n(ks[0], (16, 1, 1, 272)), n(ks[1], (16,))
    p["g1"], p["beta1"], p["m1"], p["v1"] = bn(ks[2], 16)
    p["w2"], p["b2"] = n(ks[3], (4, 1, 2, 32)), n(ks[4], (4,))
    p["g2"], p["beta2"], p["m2"], p["v2"] = bn(ks[5], 4)
    p["w3"], p["b3"] = n(ks[6], (4, 4, 8, 4)), n(ks[7], (4,))
    p["g3"], p["beta3"], p["m3"], p["v3"] = bn(ks[8], 4)
    p["wf"], p["bf"] = n(ks[9], (1, 96)), n(ks[10], (1,))
    return p


if __name__ == "__main__":
    key = jax.random.PRNGKey(0)
    kp, kx = jax.random.split(key)
    params = init_params(kp)
    # Width must be exactly 272 (conv1 kernel (1,272), and conv2 expects 1 input
    # channel after the permute); H = 188 makes the flattened features equal
    # fc1's in_features = 96.
    x = jax.random.normal(kx, (2, 1, 188, 272), jnp.float32)
    out = jax.jit(eegnet_forward)(x, params)
    jax.block_until_ready(out)
    assert out.shape == (2, 1)
    print("KERNEL_OK")
</pallas_src>

<mosaic_0001>
module attributes {stable_mosaic.version = 11 : i64} {
  func.func @kernel(%arg0: i32, %arg1: memref<1x272x188xf32, #tpu.memory_space<vmem>>, %arg2: memref<16x272xf32, #tpu.memory_space<vmem>>, %arg3: memref<16x3xf32, #tpu.memory_space<vmem>>, %arg4: memref<32x32x16xf32, #tpu.memory_space<vmem>>, %arg5: memref<32x3xf32, #tpu.memory_space<vmem>>, %arg6: memref<2x190x48xf32, #tpu.memory_space<vmem>>, %arg7: memref<2x16x32xf32, #tpu.memory_space<vmem>>, %arg8: memref<4x16x16xf32, #tpu.memory_space<vmem>>, %arg9: memref<16x3xf32, #tpu.memory_space<vmem>>, %arg10: memref<2x8x16xf32, #tpu.memory_space<vmem>>, %arg11: memref<4x48x12xf32, #tpu.memory_space<vmem>>, %arg12: memref<8x12xf32, #tpu.memory_space<vmem>>, %arg13: memref<1x1xf32, #tpu.memory_space<vmem>>, %arg14: memref<1x1x1xf32, #tpu.memory_space<vmem>>, %arg15: memref<16x221xf32, #tpu.memory_space<vmem>>, %arg16: memref<16x51xf32, #tpu.memory_space<vmem>>) attributes {dimension_semantics = [#tpu.dimension_semantics<parallel>], iteration_bounds = array<i64: 2>, scalar_prefetch = 0 : i64, scratch_operands = 2 : i64, tpu.core_type = #tpu.core_type<tc>, window_params = [{transform_indices = @transform_0, window_bounds = array<i64: 1, 272, 188>}, {pipeline_mode = #tpu.pipeline_mode<synchronous>, transform_indices = @transform_1, window_bounds = array<i64: 16, 272>}, {pipeline_mode = #tpu.pipeline_mode<synchronous>, transform_indices = @transform_2, window_bounds = array<i64: 16, 3>}, {pipeline_mode = #tpu.pipeline_mode<synchronous>, transform_indices = @transform_3, window_bounds = array<i64: 32, 32, 16>}, {pipeline_mode = #tpu.pipeline_mode<synchronous>, transform_indices = @transform_4, window_bounds = array<i64: 32, 3>}, {pipeline_mode = #tpu.pipeline_mode<synchronous>, transform_indices = @transform_5, window_bounds = array<i64: 2, 190, 48>}, {pipeline_mode = #tpu.pipeline_mode<synchronous>, transform_indices = @transform_6, window_bounds = array<i64: 2, 16, 32>}, {pipeline_mode = #tpu.pipeline_mode<synchronous>, transform_indices = @transform_7, window_bounds = array<i64: 4, 16, 16>}, {pipeline_mode = #tpu.pipeline_mode<synchronous>, transform_indices = @transform_8, window_bounds = array<i64: 16, 3>}, {pipeline_mode = #tpu.pipeline_mode<synchronous>, transform_indices = @transform_9, window_bounds = array<i64: 2, 8, 16>}, {pipeline_mode = #tpu.pipeline_mode<synchronous>, transform_indices = @transform_10, window_bounds = array<i64: 4, 48, 12>}, {pipeline_mode = #tpu.pipeline_mode<synchronous>, transform_indices = @transform_11, window_bounds = array<i64: 8, 12>}, {pipeline_mode = #tpu.pipeline_mode<synchronous>, transform_indices = @transform_12, window_bounds = array<i64: 1, 1>}, {transform_indices = @transform_13, window_bounds = array<i64: 1, 1, 1>}]} {
    %c0 = arith.constant 0 : index
    %c0_0 = arith.constant 0 : index
    %0 = vector.load %arg2[%c0, %c0_0] : memref<16x272xf32, #tpu.memory_space<vmem>>, vector<16x272xf32>
    %c0_1 = arith.constant 0 : index
    %c0_2 = arith.constant 0 : index
    %c0_3 = arith.constant 0 : index
    %1 = vector.load %arg1[%c0_1, %c0_2, %c0_3] : memref<1x272x188xf32, #tpu.memory_space<vmem>>, vector<1x272x188xf32>
    %2 = vector.shape_cast %1 : vector<1x272x188xf32> to vector<272x188xf32>
    %cst = arith.constant dense<0.000000e+00> : vector<16x188xf32>
    %3 = tpu.matmul %0, %2, %cst {dimension_numbers = #tpu.dot_dimension_numbers<[1], [0], [0], [1], [0, 0, 1, 1], [], []>} : vector<16x272xf32>, vector<272x188xf32>, vector<16x188xf32> -> vector<16x188xf32>
    %c0_4 = arith.constant 0 : index
    %c0_5 = arith.constant 0 : index
    %4 = vector.load %arg3[%c0_4, %c0_5] : memref<16x3xf32, #tpu.memory_space<vmem>>, vector<16x1xf32>
    %5 = vector.broadcast %4 : vector<16x1xf32> to vector<16x188xf32>
    %6 = arith.addf %3, %5 : vector<16x188xf32>
    %cst_6 = arith.constant 0.000000e+00 : f32
    %7 = vector.broadcast %cst_6 : f32 to vector<16x188xf32>
    %8 = arith.cmpf ogt, %6, %7 : vector<16x188xf32>
    %cst_7 = arith.constant 0.000000e+00 : f32
    %9 = vector.broadcast %cst_7 : f32 to vector<16x188xf32>
    %10 = arith.minimumf %6, %9 : vector<16x188xf32>
    %11 = math.exp %10 : vector<16x188xf32>
    %cst_8 = arith.constant 1.000000e+00 : f32
    %12 = vector.broadcast %cst_8 : f32 to vector<16x188xf32>
    %13 = arith.subf %11, %12 : vector<16x188xf32>
    %14 = arith.select %8, %6, %13 : vector<16x188xi1>, vector<16x188xf32>
    %c0_9 = arith.constant 0 : index
    %c1 = arith.constant 1 : index
    %15 = vector.load %arg3[%c0_9, %c1] : memref<16x3xf32, #tpu.memory_space<vmem>>, vector<16x1xf32>
    %16 = vector.broadcast %15 : vector<16x1xf32> to vector<16x188xf32>
    %17 = arith.mulf %14, %16 : vector<16x188xf32>
    %c0_10 = arith.constant 0 : index
    %c2 = arith.constant 2 : index
    %18 = vector.load %arg3[%c0_10, %c2] : memref<16x3xf32, #tpu.memory_space<vmem>>, vector<16x1xf32>
    %19 = vector.broadcast %18 : vector<16x1xf32> to vector<16x188xf32>
    %20 = arith.addf %17, %19 : vector<16x188xf32>
    %cst_11 = arith.constant 0.000000e+00 : f32
    %21 = vector.broadcast %cst_11 : f32 to vector<16x221xf32>
    %c0_12 = arith.constant 0 : index
    %c0_13 = arith.constant 0 : index
    %22 = vector.load %arg15[%c0_12, %c0_13] : memref<16x221xf32, #tpu.memory_space<vmem>>, vector<16x221xf32>
    tpu.vector_store %arg15[%c0_12, %c0_13], %21 {strides = array<i32>} : memref<16x221xf32, #tpu.memory_space<vmem>>, vector<16x221xf32>,
    %c0_14 = arith.constant 0 : index
    %c16 = arith.constant 16 : index
    %23 = vector.load %arg15[%c0_14, %c16] : memref<16x221xf32, #tpu.memory_space<vmem>>, vector<16x188xf32>
    tpu.vector_store %arg15[%c0_14, %c16], %20 {strides = array<i32>} : memref<16x221xf32, #tpu.memory_space<vmem>>, vector<16x188xf32>,
    %c0_15 = arith.constant 0 : index
    %c0_16 = arith.constant 0 : index
    %c0_17 = arith.constant 0 : index
    %24 = vector.load %arg4[%c0_15, %c0_16, %c0_17] : memref<32x32x16xf32, #tpu.memory_space<vmem>>, vector<1x32x16xf32>
    %25 = vector.shape_cast %24 : vector<1x32x16xf32> to vector<32x16xf32>
    %c0_18 = arith.constant 0 : index
    %c0_19 = arith.constant 0 : index
    %26 = vector.load %arg15[%c0_18, %c0_19] : memref<16x221xf32, #tpu.memory_space<vmem>>, vector<16x190xf32>
    %cst_20 = arith.constant dense<0.000000e+00> : vector<32x190xf32>
    %27 = tpu.matmul %25, %26, %cst_20 {dimension_numbers = #tpu.dot_dimension_numbers<[1], [0], [0], [1], [0, 0, 1, 1], [], []>} : vector<32x16xf32>, vector<16x190xf32>, vector<32x190xf32> -> vector<32x190xf32>
    %c1_21 = arith.constant 1 : index
    %c0_22 = arith.constant 0 : index
    %c0_23 = arith.constant 0 : index
    %28 = vector.load %arg4[%c1_21, %c0_22, %c0_23] : memref<32x32x16xf32, #tpu.memory_space<vmem>>, vector<1x32x16xf32>
    %29 = vector.shape_cast %28 : vector<1x32x16xf32> to vector<32x16xf32>
    %c0_24 = arith.constant 0 : index
    %c1_25 = arith.constant 1 : index
    %30 = vector.load %arg15[%c0_24, %c1_25] : memref<16x221xf32, #tpu.memory_space<vmem>>, vector<16x190xf32>
    %cst_26 = arith.constant dense<0.000000e+00> : vector<32x190xf32>
    %31 = tpu.matmul %29, %30, %cst_26 {dimension_numbers = #tpu.dot_dimension_numbers<[1], [0], [0], [1], [0, 0, 1, 1], [], []>} : vector<32x16xf32>, vector<16x190xf32>, vector<32x190xf32> -> vector<32x190xf32>
    %32 = arith.addf %27, %31 : vector<32x190xf32>
    %c2_27 = arith.constant 2 : index
    %c0_28 = arith.constant 0 : index
    %c0_29 = arith.constant 0 : index
    %33 = vector.load %arg4[%c2_27, %c0_28, %c0_29] : memref<32x32x16xf32, #tpu.memory_space<vmem>>, vector<1x32x16xf32>
    %34 = vector.shape_cast %33 : vector<1x32x16xf32> to vector<32x16xf32>
    %c0_30 = arith.constant 0 : index
    %c2_31 = arith.constant 2 : index
    %35 = vector.load %arg15[%c0_30, %c2_31] : memref<16x221xf32, #tpu.memory_space<vmem>>, vector<16x190xf32>
    %cst_32 = arith.constant dense<0.000000e+00> : vector<32x190xf32>
    %36 = tpu.matmul %34, %35, %cst_32 {dimension_numbers = #tpu.dot_dimension_numbers<[1], [0], [0], [1], [0, 0, 1, 1], [], []>} : vector<32x16xf32>, vector<16x190xf32>, vector<32x190xf32> -> vector<32x190xf32>
    %37 = arith.addf %32, %36 : vector<32x190xf32>
    %c3 = arith.constant 3 : index
    %c0_33 = arith.constant 0 : index
    %c0_34 = arith.constant 0 : index
    %38 = vector.load %arg4[%c3, %c0_33, %c0_34] : memref<32x32x16xf32, #tpu.memory_space<vmem>>, vector<1x32x16xf32>
    %39 = vector.shape_cast %38 : vector<1x32x16xf32> to vector<32x16xf32>
    %c0_35 = arith.constant 0 : index
    %c3_36 = arith.constant 3 : index
    %40 = vector.load %arg15[%c0_35, %c3_36] : memref<16x221xf32, #tpu.memory_space<vmem>>, vector<16x190xf32>
    %cst_37 = arith.constant dense<0.000000e+00> : vector<32x190xf32>
    %41 = tpu.matmul %39, %40, %cst_37 {dimension_numbers = #tpu.dot_dimension_numbers<[1], [0], [0], [1], [0, 0, 1, 1], [], []>} : vector<32x16xf32>, vector<16x190xf32>, vector<32x190xf32> -> vector<32x190xf32>
    %42 = arith.addf %37, %41 : vector<32x190xf32>
    %c4 = arith.constant 4 : index
    %c0_38 = arith.constant 0 : index
    %c0_39 = arith.constant 0 : index
    %43 = vector.load %arg4[%c4, %c0_38, %c0_39] : memref<32x32x16xf32, #tpu.memory_space<vmem>>, vector<1x32x16xf32>
    %44 = vector.shape_cast %43 : vector<1x32x16xf32> to vector<32x16xf32>
    %c0_40 = arith.constant 0 : index
    %c4_41 = arith.constant 4 : index
    %45 = vector.load %arg15[%c0_40, %c4_41] : memref<16x221xf32, #tpu.memory_space<vmem>>, vector<16x190xf32>
    %cst_42 = arith.constant dense<0.000000e+00> : vector<32x190xf32>
    %46 = tpu.matmul %44, %45, %cst_42 {dimension_numbers = #tpu.dot_dimension_numbers<[1], [0], [0], [1], [0, 0, 1, 1], [], []>} : vector<32x16xf32>, vector<16x190xf32>, vector<32x190xf32> -> vector<32x190xf32>
    %47 = arith.addf %42, %46 : vector<32x190xf32>
    %c5 = arith.constant 5 : index
    %c0_43 = arith.constant 0 : index
    %c0_44 = arith.constant 0 : index
    %48 = vector.load %arg4[%c5, %c0_43, %c0_44] : memref<32x32x16xf32, #tpu.memory_space<vmem>>, vector<1x32x16xf32>
    %49 = vector.shape_cast %48 : vector<1x32x16xf32> to vector<32x16xf32>
    %c0_45 = arith.constant 0 : index
    %c5_46 = arith.constant 5 : index
    %50 = vector.load %arg15[%c0_45, %c5_46] : memref<16x221xf32, #tpu.memory_space<vmem>>, vector<16x190xf32>
    %cst_47 = arith.constant dense<0.000000e+00> : vector<32x190xf32>
    %51 = tpu.matmul %49, %50, %cst_47 {dimension_numbers = #tpu.dot_dimension_numbers<[1], [0], [0], [1], [0, 0, 1, 1], [], []>} : vector<32x16xf32>, vector<16x190xf32>, vector<32x190xf32> -> vector<32x190xf32>
    %52 = arith.addf %47, %51 : vector<32x190xf32>
    %c6 = arith.constant 6 : index
    %c0_48 = arith.constant 0 : index
    %c0_49 = arith.constant 0 : index
    %53 = vector.load %arg4[%c6, %c0_48, %c0_49] : memref<32x32x16xf32, #tpu.memory_space<vmem>>, vector<1x32x16xf32>
    %54 = vector.shape_cast %53 : vector<1x32x16xf32> to vector<32x16xf32>
    %c0_50 = arith.constant 0 : index
    %c6_51 = arith.constant 6 : index
    %55 = vector.load %arg15[%c0_50, %c6_51] : memref<16x221xf32, #tpu.memory_space<vmem>>, vector<16x190xf32>
    %cst_52 = arith.constant dense<0.000000e+00> : vector<32x190xf32>
    %56 = tpu.matmul %54, %55, %cst_52 {dimension_numbers = #tpu.dot_dimension_numbers<[1], [0], [0], [1], [0, 0, 1, 1], [], []>} : vector<32x16xf32>, vector<16x190xf32>, vector<32x190xf32> -> vector<32x190xf32>
    %57 = arith.addf %52, %56 : vector<32x190xf32>
    %c7 = arith.constant 7 : index
    %c0_53 = arith.constant 0 : index
    %c0_54 = arith.constant 0 : index
    %58 = vector.load %arg4[%c7, %c0_53, %c0_54] : memref<32x32x16xf32, #tpu.memory_space<vmem>>, vector<1x32x16xf32>
    %59 = vector.shape_cast %58 : vector<1x32x16xf32> to vector<32x16xf32>
    %c0_55 = arith.constant 0 : index
    %c7_56 = arith.constant 7 : index
    %60 = vector.load %arg15[%c0_55, %c7_56] : memref<16x221xf32, #tpu.memory_space<vmem>>, vector<16x190xf32>
    %cst_57 = arith.constant dense<0.000000e+00> : vector<32x190xf32>
    %61 = tpu.matmul %59, %60, %cst_57 {dimension_numbers = #tpu.dot_dimension_numbers<[1], [0], [0], [1], [0, 0, 1, 1], [], []>} : vector<32x16xf32>, vector<16x190xf32>, vector<32x190xf32> -> vector<32x190xf32>
    %62 = arith.addf %57, %61 : vector<32x190xf32>
    %c8 = arith.constant 8 : index
    %c0_58 = arith.constant 0 : index
    %c0_59 = arith.constant 0 : index
    %63 = vector.load %arg4[%c8, %c0_58, %c0_59] : memref<32x32x16xf32, #tpu.memory_space<vmem>>, vector<1x32x16xf32>
    %64 = vector.shape_cast %63 : vector<1x32x16xf32> to vector<32x16xf32>
    %c0_60 = arith.constant 0 : index
    %c8_61 = arith.constant 8 : index
    %65 = vector.load %arg15[%c0_60, %c8_61] : memref<16x221xf32, #tpu.memory_space<vmem>>, vector<16x190xf32>
    %cst_62 = arith.constant dense<0.000000e+00> : vector<32x190xf32>
    %66 = tpu.matmul %64, %65, %cst_62 {dimension_numbers = #tpu.dot_dimension_numbers<[1], [0], [0], [1], [0, 0, 1, 1], [], []>} : vector<32x16xf32>, vector<16x190xf32>, vector<32x190xf32> -> vector<32x190xf32>
    %67 = arith.addf %62, %66 : vector<32x190xf32>
    %c9 = arith.constant 9 : index
    %c0_63 = arith.constant 0 : index
    %c0_64 = arith.constant 0 : index
    %68 = vector.load %arg4[%c9, %c0_63, %c0_64] : memref<32x32x16xf32, #tpu.memory_space<vmem>>, vector<1x32x16xf32>
    %69 = vector.shape_cast %68 : vector<1x32x16xf32> to vector<32x16xf32>
    %c0_65 = arith.constant 0 : index
    %c9_66 = arith.constant 9 : index
    %70 = vector.load %arg15[%c0_65, %c9_66] : memref<16x221xf32, #tpu.memory_space<vmem>>, vector<16x190xf32>
    %cst_67 = arith.constant dense<0.000000e+00> : vector<32x190xf32>
    %71 = tpu.matmul %69, %70, %cst_67 {dimension_numbers = #tpu.dot_dimension_numbers<[1], [0], [0], [1], [0, 0, 1, 1], [], []>} : vector<32x16xf32>, vector<16x190xf32>, vector<32x190xf32> -> vector<32x190xf32>
    %72 = arith.addf %67, %71 : vector<32x190xf32>
    %c10 = arith.constant 10 : index
    %c0_68 = arith.constant 0 : index
    %c0_69 = arith.constant 0 : index
    %73 = vector.load %arg4[%c10, %c0_68, %c0_69] : memref<32x32x16xf32, #tpu.memory_space<vmem>>, vector<1x32x16xf32>
    %74 = vector.shape_cast %73 : vector<1x32x16xf32> to vector<32x16xf32>
    %c0_70 = arith.constant 0 : index
    %c10_71 = arith.constant 10 : index
    %75 = vector.load %arg15[%c0_70, %c10_71] : memref<16x221xf32, #tpu.memory_space<vmem>>, vector<16x190xf32>
    %cst_72 = arith.constant dense<0.000000e+00> : vector<32x190xf32>
    %76 = tpu.matmul %74, %75, %cst_72 {dimension_numbers = #tpu.dot_dimension_numbers<[1], [0], [0], [1], [0, 0, 1, 1], [], []>} : vector<32x16xf32>, vector<16x190xf32>, vector<32x190xf32> -> vector<32x190xf32>
    %77 = arith.addf %72, %76 : vector<32x190xf32>
    %c11 = arith.constant 11 : index
    %c0_73 = arith.constant 0 : index
    %c0_74 = arith.constant 0 : index
    %78 = vector.load %arg4[%c11, %c0_73, %c0_74] : memref<32x32x16xf32, #tpu.memory_space<vmem>>, vector<1x32x16xf32>
    %79 = vector.shape_cast %78 : vector<1x32x16xf32> to vector<32x16xf32>
    %c0_75 = arith.constant 0 : index
    %c11_76 = arith.constant 11 : index
    %80 = vector.load %arg15[%c0_75, %c11_76] : memref<16x221xf32, #tpu.memory_space<vmem>>, vector<16x190xf32>
    %cst_77 = arith.constant dense<0.000000e+00> : vector<32x190xf32>
    %81 = tpu.matmul %79, %80, %cst_77 {dimension_numbers = #tpu.dot_dimension_numbers<[1], [0], [0], [1], [0, 0, 1, 1], [], []>} : vector<32x16xf32>, vector<16x190xf32>, vector<32x190xf32> -> vector<32x190xf32>
    %82 = arith.addf %77, %81 : vector<32x190xf32>
    %c12 = arith.constant 12 : index
    %c0_78 = arith.constant 0 : index
    %c0_79 = arith.constant 0 : index
    %83 = vector.load %arg4[%c12, %c0_78, %c0_79] : memref<32x32x16xf32, #tpu.memory_space<vmem>>, vector<1x32x16xf32>
    %84 = vector.shape_cast %83 : vector<1x32x16xf32> to vector<32x16xf32>
    %c0_80 = arith.constant 0 : index
    %c12_81 = arith.constant 12 : index
    %85 = vector.load %arg15[%c0_80, %c12_81] : memref<16x221xf32, #tpu.memory_space<vmem>>, vector<16x190xf32>
    %cst_82 = arith.constant dense<0.000000e+00> : vector<32x190xf32>
    %86 = tpu.matmul %84, %85, %cst_82 {dimension_numbers = #tpu.dot_dimension_numbers<[1], [0], [0], [1], [0, 0, 1, 1], [], []>} : vector<32x16xf32>, vector<16x190xf32>, vector<32x190xf32> -> vector<32x190xf32>
    %87 = arith.addf %82, %86 : vector<32x190xf32>
    %c13 = arith.constant 13 : index
    %c0_83 = arith.constant 0 : index
    %c0_84 = arith.constant 0 : index
    %88 = vector.load %arg4[%c13, %c0_83, %c0_84] : memref<32x32x16xf32, #tpu.memory_space<vmem>>, vector<1x32x16xf32>
    %89 = vector.shape_cast %88 : vector<1x32x16xf32> to vector<32x16xf32>
    %c0_85 = arith.constant 0 : index
    %c13_86 = arith.constant 13 : index
    %90 = vector.load %arg15[%c0_85, %c13_86] : memref<16x221xf32, #tpu.memory_space<vmem>>, vector<16x190xf32>
    %cst_87 = arith.constant dense<0.000000e+00> : vector<32x190xf32>
    %91 = tpu.matmul %89, %90, %cst_87 {dimension_numbers = #tpu.dot_dimension_numbers<[1], [0], [0], [1], [0, 0, 1, 1], [], []>} : vector<32x16xf32>, vector<16x190xf32>, vector<32x190xf32> -> vector<32x190xf32>
    %92 = arith.addf %87, %91 : vector<32x190xf32>
    %c14 = arith.constant 14 : index
    %c0_88 = arith.constant 0 : index
    %c0_89 = arith.constant 0 : index
    %93 = vector.load %arg4[%c14, %c0_88, %c0_89] : memref<32x32x16xf32, #tpu.memory_space<vmem>>, vector<1x32x16xf32>
    %94 = vector.shape_cast %93 : vector<1x32x16xf32> to vector<32x16xf32>
    %c0_90 = arith.constant 0 : index
    %c14_91 = arith.constant 14 : index
    %95 = vector.load %arg15[%c0_90, %c14_91] : memref<16x221xf32, #tpu.memory_space<vmem>>, vector<16x190xf32>
    %cst_92 = arith.constant dense<0.000000e+00> : vector<32x190xf32>
    %96 = tpu.matmul %94, %95, %cst_92 {dimension_numbers = #tpu.dot_dimension_numbers<[1], [0], [0], [1], [0, 0, 1, 1], [], []>} : vector<32x16xf32>, vector<16x190xf32>, vector<32x190xf32> -> vector<32x190xf32>
    %97 = arith.addf %92, %96 : vector<32x190xf32>
    %c15 = arith.constant 15 : index
    %c0_93 = arith.constant 0 : index
    %c0_94 = arith.constant 0 : index
    %98 = vector.load %arg4[%c15, %c0_93, %c0_94] : memref<32x32x16xf32, #tpu.memory_space<vmem>>, vector<1x32x16xf32>
    %99 = vector.shape_cast %98 : vector<1x32x16xf32> to vector<32x16xf32>
    %c0_95 = arith.constant 0 : index
    %c15_96 = arith.constant 15 : index
    %100 = vector.load %arg15[%c0_95, %c15_96] : memref<16x221xf32, #tpu.memory_space<vmem>>, vector<16x190xf32>
    %cst_97 = arith.constant dense<0.000000e+00> : vector<32x190xf32>
    %101 = tpu.matmul %99, %100, %cst_97 {dimension_numbers = #tpu.dot_dimension_numbers<[1], [0], [0], [1], [0, 0, 1, 1], [], []>} : vector<32x16xf32>, vector<16x190xf32>, vector<32x190xf32> -> vector<32x190xf32>
    %102 = arith.addf %97, %101 : vector<32x190xf32>
    %c16_98 = arith.constant 16 : index
    %c0_99 = arith.constant 0 : index
    %c0_100 = arith.constant 0 : index
    %103 = vector.load %arg4[%c16_98, %c0_99, %c0_100] : memref<32x32x16xf32, #tpu.memory_space<vmem>>, vector<1x32x16xf32>
    %104 = vector.shape_cast %103 : vector<1x32x16xf32> to vector<32x16xf32>
    %c0_101 = arith.constant 0 : index
    %c16_102 = arith.constant 16 : index
    %105 = vector.load %arg15[%c0_101, %c16_102] : memref<16x221xf32, #tpu.memory_space<vmem>>, vector<16x190xf32>
    %cst_103 = arith.constant dense<0.000000e+00> : vector<32x190xf32>
    %106 = tpu.matmul %104, %105, %cst_103 {dimension_numbers = #tpu.dot_dimension_numbers<[1], [0], [0], [1], [0, 0, 1, 1], [], []>} : vector<32x16xf32>, vector<16x190xf32>, vector<32x190xf32> -> vector<32x190xf32>
    %107 = arith.addf %102, %106 : vector<32x190xf32>
    %c17 = arith.constant 17 : index
    %c0_104 = arith.constant 0 : index
    %c0_105 = arith.constant 0 : index
    %108 = vector.load %arg4[%c17, %c0_104, %c0_105] : memref<32x32x16xf32, #tpu.memory_space<vmem>>, vector<1x32x16xf32>
    %109 = vector.shape_cast %108 : vector<1x32x16xf32> to vector<32x16xf32>
    %c0_106 = arith.constant 0 : index
    %c17_107 = arith.constant 17 : index
    %110 = vector.load %arg15[%c0_106, %c17_107] : memref<16x221xf32, #tpu.memory_space<vmem>>, vector<16x190xf32>
    %cst_108 = arith.constant dense<0.000000e+00> : vector<32x190xf32>
    %111 = tpu.matmul %109, %110, %cst_108 {dimension_numbers = #tpu.dot_dimension_numbers<[1], [0], [0], [1], [0, 0, 1, 1], [], []>} : vector<32x16xf32>, vector<16x190xf32>, vector<32x190xf32> -> vector<32x190xf32>
    %112 = arith.addf %107, %111 : vector<32x190xf32>
    %c18 = arith.constant 18 : index
    %c0_109 = arith.constant 0 : index
    %c0_110 = arith.constant 0 : index
    %113 = vector.load %arg4[%c18, %c0_109, %c0_110] : memref<32x32x16xf32, #tpu.memory_space<vmem>>, vector<1x32x16xf32>
    %114 = vector.shape_cast %113 : vector<1x32x16xf32> to vector<32x16xf32>
    %c0_111 = arith.constant 0 : index
    %c18_112 = arith.constant 18 : index
    %115 = vector.load %arg15[%c0_111, %c18_112] : memref<16x221xf32, #tpu.memory_space<vmem>>, vector<16x190xf32>
    %cst_113 = arith.constant dense<0.000000e+00> : vector<32x190xf32>
    %116 = tpu.matmul %114, %115, %cst_113 {dimension_numbers = #tpu.dot_dimension_numbers<[1], [0], [0], [1], [0, 0, 1, 1], [], []>} : vector<32x16xf32>, vector<16x190xf32>, vector<32x190xf32> -> vector<32x190xf32>
    %117 = arith.addf %112, %116 : vector<32x190xf32>
    %c19 = arith.constant 19 : index
    %c0_114 = arith.constant 0 : index
    %c0_115 = arith.constant 0 : index
    %118 = vector.load %arg4[%c19, %c0_114, %c0_115] : memref<32x32x16xf32, #tpu.memory_space<vmem>>, vector<1x32x16xf32>
    %119 = vector.shape_cast %118 : vector<1x32x16xf32> to vector<32x16xf32>
    %c0_116 = arith.constant 0 : index
    %c19_117 = arith.constant 19 : index
    %120 = vector.load %arg15[%c0_116, %c19_117] : memref<16x221xf32, #tpu.memory_space<vmem>>, vector<16x190xf32>
    %cst_118 = arith.constant dense<0.000000e+00> : vector<32x190xf32>
    %121 = tpu.matmul %119, %120, %cst_118 {dimension_numbers = #tpu.dot_dimension_numbers<[1], [0], [0], [1], [0, 0, 1, 1], [], []>} : vector<32x16xf32>, vector<16x190xf32>, vector<32x190xf32> -> vector<32x190xf32>
    %122 = arith.addf %117, %121 : vector<32x190xf32>
    %c20 = arith.constant 20 : index
    %c0_119 = arith.constant 0 : index
    %c0_120 = arith.constant 0 : index
    %123 = vector.load %arg4[%c20, %c0_119, %c0_120] : memref<32x32x16xf32, #tpu.memory_space<vmem>>, vector<1x32x16xf32>
    %124 = vector.shape_cast %123 : vector<1x32x16xf32> to vector<32x16xf32>
    %c0_121 = arith.constant 0 : index
    %c20_122 = arith.constant 20 : index
    %125 = vector.load %arg15[%c0_121, %c20_122] : memref<16x221xf32, #tpu.memory_space<vmem>>, vector<16x190xf32>
    %cst_123 = arith.constant dense<0.000000e+00> : vector<32x190xf32>
    %126 = tpu.matmul %124, %125, %cst_123 {dimension_numbers = #tpu.dot_dimension_numbers<[1], [0], [0], [1], [0, 0, 1, 1], [], []>} : vector<32x16xf32>, vector<16x190xf32>, vector<32x190xf32> -> vector<32x190xf32>
    %127 = arith.addf %122, %126 : vector<32x190xf32>
    %c21 = arith.constant 21 : index
    %c0_124 = arith.constant 0 : index
    %c0_125 = arith.constant 0 : index
    %128 = vector.load %arg4[%c21, %c0_124, %c0_125] : memref<32x32x16xf32, #tpu.memory_space<vmem>>, vector<1x32x16xf32>
    %129 = vector.shape_cast %128 : vector<1x32x16xf32> to vector<32x16xf32>
    %c0_126 = arith.constant 0 : index
    %c21_127 = arith.constant 21 : index
    %130 = vector.load %arg15[%c0_126, %c21_127] : memref<16x221xf32, #tpu.memory_space<vmem>>, vector<16x190xf32>
    %cst_128 = arith.constant dense<0.000000e+00> : vector<32x190xf32>
    %131 = tpu.matmul %129, %130, %cst_128 {dimension_numbers = #tpu.dot_dimension_numbers<[1], [0], [0], [1], [0, 0, 1, 1], [], []>} : vector<32x16xf32>, vector<16x190xf32>, vector<32x190xf32> -> vector<32x190xf32>
    %132 = arith.addf %127, %131 : vector<32x190xf32>
    %c22 = arith.constant 22 : index
    %c0_129 = arith.constant 0 : index
    %c0_130 = arith.constant 0 : index
    %133 = vector.load %arg4[%c22, %c0_129, %c0_130] : memref<32x32x16xf32, #tpu.memory_space<vmem>>, vector<1x32x16xf32>
    %134 = vector.shape_cast %133 : vector<1x32x16xf32> to vector<32x16xf32>
    %c0_131 = arith.constant 0 : index
    %c22_132 = arith.constant 22 : index
    %135 = vector.load %arg15[%c0_131, %c22_132] : memref<16x221xf32, #tpu.memory_space<vmem>>, vector<16x190xf32>
    %cst_133 = arith.constant dense<0.000000e+00> : vector<32x190xf32>
    %136 = tpu.matmul %134, %135, %cst_133 {dimension_numbers = #tpu.dot_dimension_numbers<[1], [0], [0], [1], [0, 0, 1, 1], [], []>} : vector<32x16xf32>, vector<16x190xf32>, vector<32x190xf32> -> vector<32x190xf32>
    %137 = arith.addf %132, %136 : vector<32x190xf32>
    %c23 = arith.constant 23 : index
    %c0_134 = arith.constant 0 : index
    %c0_135 = arith.constant 0 : index
    %138 = vector.load %arg4[%c23, %c0_134, %c0_135] : memref<32x32x16xf32, #tpu.memory_space<vmem>>, vector<1x32x16xf32>
    %139 = vector.shape_cast %138 : vector<1x32x16xf32> to vector<32x16xf32>
    %c0_136 = arith.constant 0 : index
    %c23_137 = arith.constant 23 : index
    %140 = vector.load %arg15[%c0_136, %c23_137] : memref<16x221xf32, #tpu.memory_space<vmem>>, vector<16x190xf32>
    %cst_138 = arith.constant dense<0.000000e+00> : vector<32x190xf32>
    %141 = tpu.matmul %139, %140, %cst_138 {dimension_numbers = #tpu.dot_dimension_numbers<[1], [0], [0], [1], [0, 0, 1, 1], [], []>} : vector<32x16xf32>, vector<16x190xf32>, vector<32x190xf32> -> vector<32x190xf32>
    %142 = arith.addf %137, %141 : vector<32x190xf32>
    %c24 = arith.constant 24 : index
    %c0_139 = arith.constant 0 : index
    %c0_140 = arith.constant 0 : index
    %143 = vector.load %arg4[%c24, %c0_139, %c0_140] : memref<32x32x16xf32, #tpu.memory_space<vmem>>, vector<1x32x16xf32>
    %144 = vector.shape_cast %143 : vector<1x32x16xf32> to vector<32x16xf32>
    %c0_141 = arith.constant 0 : index
    %c24_142 = arith.constant 24 : index
    %145 = vector.load %arg15[%c0_141, %c24_142] : memref<16x221xf32, #tpu.memory_space<vmem>>, vector<16x190xf32>
    %cst_143 = arith.constant dense<0.000000e+00> : vector<32x190xf32>
    %146 = tpu.matmul %144, %145, %cst_143 {dimension_numbers = #tpu.dot_dimension_numbers<[1], [0], [0], [1], [0, 0, 1, 1], [], []>} : vector<32x16xf32>, vector<16x190xf32>, vector<32x190xf32> -> vector<32x190xf32>
    %147 = arith.addf %142, %146 : vector<32x190xf32>
    %c25 = arith.constant 25 : index
    %c0_144 = arith.constant 0 : index
    %c0_145 = arith.constant 0 : index
    %148 = vector.load %arg4[%c25, %c0_144, %c0_145] : memref<32x32x16xf32, #tpu.memory_space<vmem>>, vector<1x32x16xf32>
    %149 = vector.shape_cast %148 : vector<1x32x16xf32> to vector<32x16xf32>
    %c0_146 = arith.constant 0 : index
    %c25_147 = arith.constant 25 : index
    %150 = vector.load %arg15[%c0_146, %c25_147] : memref<16x221xf32, #tpu.memory_space<vmem>>, vector<16x190xf32>
    %cst_148 = arith.constant dense<0.000000e+00> : vector<32x190xf32>
    %151 = tpu.matmul %149, %150, %cst_148 {dimension_numbers = #tpu.dot_dimension_numbers<[1], [0], [0], [1], [0, 0, 1, 1], [], []>} : vector<32x16xf32>, vector<16x190xf32>, vector<32x190xf32> -> vector<32x190xf32>
    %152 = arith.addf %147, %151 : vector<32x190xf32>
    %c26 = arith.constant 26 : index
    %c0_149 = arith.constant 0 : index
    %c0_150 = arith.constant 0 : index
    %153 = vector.load %arg4[%c26, %c0_149, %c0_150] : memref<32x32x16xf32, #tpu.memory_space<vmem>>, vector<1x32x16xf32>
    %154 = vector.shape_cast %153 : vector<1x32x16xf32> to vector<32x16xf32>
    %c0_151 = arith.constant 0 : index
    %c26_152 = arith.constant 26 : index
    %155 = vector.load %arg15[%c0_151, %c26_152] : memref<16x221xf32, #tpu.memory_space<vmem>>, vector<16x190xf32>
    %cst_153 = arith.constant dense<0.000000e+00> : vector<32x190xf32>
    %156 = tpu.matmul %154, %155, %cst_153 {dimension_numbers = #tpu.dot_dimension_numbers<[1], [0], [0], [1], [0, 0, 1, 1], [], []>} : vector<32x16xf32>, vector<16x190xf32>, vector<32x190xf32> -> vector<32x190xf32>
    %157 = arith.addf %152, %156 : vector<32x190xf32>
    %c27 = arith.constant 27 : index
    %c0_154 = arith.constant 0 : index
    %c0_155 = arith.constant 0 : index
    %158 = vector.load %arg4[%c27, %c0_154, %c0_155] : memref<32x32x16xf32, #tpu.memory_space<vmem>>, vector<1x32x16xf32>
    %159 = vector.shape_cast %158 : vector<1x32x16xf32> to vector<32x16xf32>
    %c0_156 = arith.constant 0 : index
    %c27_157 = arith.constant 27 : index
    %160 = vector.load %arg15[%c0_156, %c27_157] : memref<16x221xf32, #tpu.memory_space<vmem>>, vector<16x190xf32>
    %cst_158 = arith.constant dense<0.000000e+00> : vector<32x190xf32>
    %161 = tpu.matmul %159, %160, %cst_158 {dimension_numbers = #tpu.dot_dimension_numbers<[1], [0], [0], [1], [0, 0, 1, 1], [], []>} : vector<32x16xf32>, vector<16x190xf32>, vector<32x190xf32> -> vector<32x190xf32>
    %162 = arith.addf %157, %161 : vector<32x190xf32>
    %c28 = arith.constant 28 : index
    %c0_159 = arith.constant 0 : index
    %c0_160 = arith.constant 0 : index
    %163 = vector.load %arg4[%c28, %c0_159, %c0_160] : memref<32x32x16xf32, #tpu.memory_space<vmem>>, vector<1x32x16xf32>
    %164 = vector.shape_cast %163 : vector<1x32x16xf32> to vector<32x16xf32>
    %c0_161 = arith.constant 0 : index
    %c28_162 = arith.constant 28 : index
    %165 = vector.load %arg15[%c0_161, %c28_162] : memref<16x221xf32, #tpu.memory_space<vmem>>, vector<16x190xf32>
    %cst_163 = arith.constant dense<0.000000e+00> : vector<32x190xf32>
    %166 = tpu.matmul %164, %165, %cst_163 {dimension_numbers = #tpu.dot_dimension_numbers<[1], [0], [0], [1], [0, 0, 1, 1], [], []>} : vector<32x16xf32>, vector<16x190xf32>, vector<32x190xf32> -> vector<32x190xf32>
    %167 = arith.addf %162, %166 : vector<32x190xf32>
    %c29 = arith.constant 29 : index
    %c0_164 = arith.constant 0 : index
    %c0_165 = arith.constant 0 : index
    %168 = vector.load %arg4[%c29, %c0_164, %c0_165] : memref<32x32x16xf32, #tpu.memory_space<vmem>>, vector<1x32x16xf32>
    %169 = vector.shape_cast %168 : vector<1x32x16xf32> to vector<32x16xf32>
    %c0_166 = arith.constant 0 : index
    %c29_167 = arith.constant 29 : index
    %170 = vector.load %arg15[%c0_166, %c29_167] : memref<16x221xf32, #tpu.memory_space<vmem>>, vector<16x190xf32>
    %cst_168 = arith.constant dense<0.000000e+00> : vector<32x190xf32>
    %171 = tpu.matmul %169, %170, %cst_168 {dimension_numbers = #tpu.dot_dimension_numbers<[1], [0], [0], [1], [0, 0, 1, 1], [], []>} : vector<32x16xf32>, vector<16x190xf32>, vector<32x190xf32> -> vector<32x190xf32>
    %172 = arith.addf %167, %171 : vector<32x190xf32>
    %c30 = arith.constant 30 : index
    %c0_169 = arith.constant 0 : index
    %c0_170 = arith.constant 0 : index
    %173 = vector.load %arg4[%c30, %c0_169, %c0_170] : memref<32x32x16xf32, #tpu.memory_space<vmem>>, vector<1x32x16xf32>
    %174 = vector.shape_cast %173 : vector<1x32x16xf32> to vector<32x16xf32>
    %c0_171 = arith.constant 0 : index
    %c30_172 = arith.constant 30 : index
    %175 = vector.load %arg15[%c0_171, %c30_172] : memref<16x221xf32, #tpu.memory_space<vmem>>, vector<16x190xf32>
    %cst_173 = arith.constant dense<0.000000e+00> : vector<32x190xf32>
    %176 = tpu.matmul %174, %175, %cst_173 {dimension_numbers = #tpu.dot_dimension_numbers<[1], [0], [0], [1], [0, 0, 1, 1], [], []>} : vector<32x16xf32>, vector<16x190xf32>, vector<32x190xf32> -> vector<32x190xf32>
    %177 = arith.addf %172, %176 : vector<32x190xf32>
    %c31 = arith.constant 31 : index
    %c0_174 = arith.constant 0 : index
    %c0_175 = arith.constant 0 : index
    %178 = vector.load %arg4[%c31, %c0_174, %c0_175] : memref<32x32x16xf32, #tpu.memory_space<vmem>>, vector<1x32x16xf32>
    %179 = vector.shape_cast %178 : vector<1x32x16xf32> to vector<32x16xf32>
    %c0_176 = arith.constant 0 : index
    %c31_177 = arith.constant 31 : index
    %180 = vector.load %arg15[%c0_176, %c31_177] : memref<16x221xf32, #tpu.memory_space<vmem>>, vector<16x190xf32>
    %cst_178 = arith.constant dense<0.000000e+00> : vector<32x190xf32>
    %181 = tpu.matmul %179, %180, %cst_178 {dimension_numbers = #tpu.dot_dimension_numbers<[1], [0], [0], [1], [0, 0, 1, 1], [], []>} : vector<32x16xf32>, vector<16x190xf32>, vector<32x190xf32> -> vector<32x190xf32>
    %182 = arith.addf %177, %181 : vector<32x190xf32>
    %c0_179 = arith.constant 0 : index
    %c0_180 = arith.constant 0 : index
    %c0_181 = arith.constant 0 : index
    %183 = vector.load %arg6[%c0_179, %c0_180, %c0_181] : memref<2x190x48xf32, #tpu.memory_space<vmem>>, vector<1x190x48xf32>
    %184 = vector.shape_cast %183 : vector<1x190x48xf32> to vector<190x48xf32>
    %cst_182 = arith.constant dense<0.000000e+00> : vector<32x48xf32>
    %185 = tpu.matmul %182, %184, %cst_182 {dimension_numbers = #tpu.dot_dimension_numbers<[1], [0], [0], [1], [0, 0, 1, 1], [], []>} : vector<32x190xf32>, vector<190x48xf32>, vector<32x48xf32> -> vector<32x48xf32>
    %c0_183 = arith.constant 0 : index
    %c0_184 = arith.constant 0 : index
    %186 = vector.load %arg5[%c0_183, %c0_184] : memref<32x3xf32, #tpu.memory_space<vmem>>, vector<32x1xf32>
    %187 = vector.broadcast %186 : vector<32x1xf32> to vector<32x48xf32>
    %188 = arith.addf %185, %187 : vector<32x48xf32>
    %cst_185 = arith.constant 0.000000e+00 : f32
    %189 = vector.broadcast %cst_185 : f32 to vector<32x48xf32>
    %190 = arith.cmpf ogt, %188, %189 : vector<32x48xf32>
    %cst_186 = arith.constant 0.000000e+00 : f32
    %191 = vector.broadcast %cst_186 : f32 to vector<32x48xf32>
    %192 = arith.minimumf %188, %191 : vector<32x48xf32>
    %193 = math.exp %192 : vector<32x48xf32>
    %cst_187 = arith.constant 1.000000e+00 : f32
    %194 = vector.broadcast %cst_187 : f32 to vector<32x48xf32>
    %195 = arith.subf %193, %194 : vector<32x48xf32>
    %196 = arith.select %190, %188, %195 : vector<32x48xi1>, vector<32x48xf32>
    %c0_188 = arith.constant 0 : index
    %c1_189 = arith.constant 1 : index
    %197 = vector.load %arg5[%c0_188, %c1_189] : memref<32x3xf32, #tpu.memory_space<vmem>>, vector<32x1xf32>
    %198 = vector.broadcast %197 : vector<32x1xf32> to vector<32x48xf32>
    %199 = arith.mulf %196, %198 : vector<32x48xf32>
    %c0_190 = arith.constant 0 : index
    %c2_191 = arith.constant 2 : index
    %200 = vector.load %arg5[%c0_190, %c2_191] : memref<32x3xf32, #tpu.memory_space<vmem>>, vector<32x1xf32>
    %201 = vector.broadcast %200 : vector<32x1xf32> to vector<32x48xf32>
    %202 = arith.addf %199, %201 : vector<32x48xf32>
    %c0_192 = arith.constant 0 : index
    %c0_193 = arith.constant 0 : index
    %c0_194 = arith.constant 0 : index
    %203 = vector.load %arg7[%c0_192, %c0_193, %c0_194] : memref<2x16x32xf32, #tpu.memory_space<vmem>>, vector<1x16x32xf32>
    %204 = vector.shape_cast %203 : vector<1x16x32xf32> to vector<16x32xf32>
    %cst_195 = arith.constant dense<0.000000e+00> : vector<16x48xf32>
    %205 = tpu.matmul %204, %202, %cst_195 {dimension_numbers = #tpu.dot_dimension_numbers<[1], [0], [0], [1], [0, 0, 1, 1], [], []>} : vector<16x32xf32>, vector<32x48xf32>, vector<16x48xf32> -> vector<16x48xf32>
    %c1_196 = arith.constant 1 : index
    %c0_197 = arith.constant 0 : index
    %c0_198 = arith.constant 0 : index
    %206 = vector.load %arg7[%c1_196, %c0_197, %c0_198] : memref<2x16x32xf32, #tpu.memory_space<vmem>>, vector<1x16x32xf32>
    %207 = vector.shape_cast %206 : vector<1x16x32xf32> to vector<16x32xf32>
    %cst_199 = arith.constant dense<0.000000e+00> : vector<16x48xf32>
    %208 = tpu.matmul %207, %202, %cst_199 {dimension_numbers = #tpu.dot_dimension_numbers<[1], [0], [0], [1], [0, 0, 1, 1], [], []>} : vector<16x32xf32>, vector<32x48xf32>, vector<16x48xf32> -> vector<16x48xf32>
    %c1_200 = arith.constant 1 : index
    %c0_201 = arith.constant 0 : index
    %c0_202 = arith.constant 0 : index
    %209 = vector.load %arg6[%c1_200, %c0_201, %c0_202] : memref<2x190x48xf32, #tpu.memory_space<vmem>>, vector<1x190x48xf32>
    %210 = vector.shape_cast %209 : vector<1x190x48xf32> to vector<190x48xf32>
    %cst_203 = arith.constant dense<0.000000e+00> : vector<32x48xf32>
    %211 = tpu.matmul %182, %210, %cst_203 {dimension_numbers = #tpu.dot_dimension_numbers<[1], [0], [0], [1], [0, 0, 1, 1], [], []>} : vector<32x190xf32>, vector<190x48xf32>, vector<32x48xf32> -> vector<32x48xf32>
    %c0_204 = arith.constant 0 : index
    %c0_205 = arith.constant 0 : index
    %212 = vector.load %arg5[%c0_204, %c0_205] : memref<32x3xf32, #tpu.memory_space<vmem>>, vector<32x1xf32>
    %213 = vector.broadcast %212 : vector<32x1xf32> to vector<32x48xf32>
    %214 = arith.addf %211, %213 : vector<32x48xf32>
    %cst_206 = arith.constant 0.000000e+00 : f32
    %215 = vector.broadcast %cst_206 : f32 to vector<32x48xf32>
    %216 = arith.cmpf ogt, %214, %215 : vector<32x48xf32>
    %cst_207 = arith.constant 0.000000e+00 : f32
    %217 = vector.broadcast %cst_207 : f32 to vector<32x48xf32>
    %218 = arith.minimumf %214, %217 : vector<32x48xf32>
    %219 = math.exp %218 : vector<32x48xf32>
    %cst_208 = arith.constant 1.000000e+00 : f32
    %220 = vector.broadcast %cst_208 : f32 to vector<32x48xf32>
    %221 = arith.subf %219, %220 : vector<32x48xf32>
    %222 = arith.select %216, %214, %221 : vector<32x48xi1>, vector<32x48xf32>
    %c0_209 = arith.constant 0 : index
    %c1_210 = arith.constant 1 : index
    %223 = vector.load %arg5[%c0_209, %c1_210] : memref<32x3xf32, #tpu.memory_space<vmem>>, vector<32x1xf32>
    %224 = vector.broadcast %223 : vector<32x1xf32> to vector<32x48xf32>
    %225 = arith.mulf %222, %224 : vector<32x48xf32>
    %c0_211 = arith.constant 0 : index
    %c2_212 = arith.constant 2 : index
    %226 = vector.load %arg5[%c0_211, %c2_212] : memref<32x3xf32, #tpu.memory_space<vmem>>, vector<32x1xf32>
    %227 = vector.broadcast %226 : vector<32x1xf32> to vector<32x48xf32>
    %228 = arith.addf %225, %227 : vector<32x48xf32>
    %c0_213 = arith.constant 0 : index
    %c0_214 = arith.constant 0 : index
    %c0_215 = arith.constant 0 : index
    %229 = vector.load %arg7[%c0_213, %c0_214, %c0_215] : memref<2x16x32xf32, #tpu.memory_space<vmem>>, vector<1x16x32xf32>
    %230 = vector.shape_cast %229 : vector<1x16x32xf32> to vector<16x32xf32>
    %cst_216 = arith.constant dense<0.000000e+00> : vector<16x48xf32>
    %231 = tpu.matmul %230, %228, %cst_216 {dimension_numbers = #tpu.dot_dimension_numbers<[1], [0], [0], [1], [0, 0, 1, 1], [], []>} : vector<16x32xf32>, vector<32x48xf32>, vector<16x48xf32> -> vector<16x48xf32>
    %c1_217 = arith.constant 1 : index
    %c0_218 = arith.constant 0 : index
    %c0_219 = arith.constant 0 : index
    %232 = vector.load %arg7[%c1_217, %c0_218, %c0_219] : memref<2x16x32xf32, #tpu.memory_space<vmem>>, vector<1x16x32xf32>
    %233 = vector.shape_cast %232 : vector<1x16x32xf32> to vector<16x32xf32>
    %cst_220 = arith.constant dense<0.000000e+00> : vector<16x48xf32>
    %234 = tpu.matmul %233, %228, %cst_220 {dimension_numbers = #tpu.dot_dimension_numbers<[1], [0], [0], [1], [0, 0, 1, 1], [], []>} : vector<16x32xf32>, vector<32x48xf32>, vector<16x48xf32> -> vector<16x48xf32>
    %235 = arith.maximumf %205, %208 : vector<16x48xf32>
    %236 = arith.maximumf %235, %231 : vector<16x48xf32>
    %237 = arith.maximumf %236, %234 : vector<16x48xf32>
    %cst_221 = arith.constant 0.000000e+00 : f32
    %238 = vector.broadcast %cst_221 : f32 to vector<16x51xf32>
    %c0_222 = arith.constant 0 : index
    %c0_223 = arith.constant 0 : index
    %239 = vector.load %arg16[%c0_222, %c0_223] : memref<16x51xf32, #tpu.memory_space<vmem>>, vector<16x51xf32>
    tpu.vector_store %arg16[%c0_222, %c0_223], %238 {strides = array<i32>} : memref<16x51xf32, #tpu.memory_space<vmem>>, vector<16x51xf32>,
    %c0_224 = arith.constant 0 : index
    %c2_225 = arith.constant 2 : index
    %240 = vector.load %arg16[%c0_224, %c2_225] : memref<16x51xf32, #tpu.memory_space<vmem>>, vector<16x48xf32>
    tpu.vector_store %arg16[%c0_224, %c2_225], %237 {strides = array<i32>} : memref<16x51xf32, #tpu.memory_space<vmem>>, vector<16x48xf32>,
    %c0_226 = arith.constant 0 : index
    %c0_227 = arith.constant 0 : index
    %c0_228 = arith.constant 0 : index
    %241 = vector.load %arg8[%c0_226, %c0_227, %c0_228] : memref<4x16x16xf32, #tpu.memory_space<vmem>>, vector<1x16x16xf32>
    %242 = vector.shape_cast %241 : vector<1x16x16xf32> to vector<16x16xf32>
    %c0_229 = arith.constant 0 : index
    %c0_230 = arith.constant 0 : index
    %243 = vector.load %arg16[%c0_229, %c0_230] : memref<16x51xf32, #tpu.memory_space<vmem>>, vector<16x48xf32>
    %cst_231 = arith.constant dense<0.000000e+00> : vector<16x48xf32>
    %244 = tpu.matmul %242, %243, %cst_231 {dimension_numbers = #tpu.dot_dimension_numbers<[1], [0], [0], [1], [0, 0, 1, 1], [], []>} : vector<16x16xf32>, vector<16x48xf32>, vector<16x48xf32> -> vector<16x48xf32>
    %c1_232 = arith.constant 1 : index
    %c0_233 = arith.constant 0 : index
    %c0_234 = arith.constant 0 : index
    %245 = vector.load %arg8[%c1_232, %c0_233, %c0_234] : memref<4x16x16xf32, #tpu.memory_space<vmem>>, vector<1x16x16xf32>
    %246 = vector.shape_cast %245 : vector<1x16x16xf32> to vector<16x16xf32>
    %c0_235 = arith.constant 0 : index
    %c1_236 = arith.constant 1 : index
    %247 = vector.load %arg16[%c0_235, %c1_236] : memref<16x51xf32, #tpu.memory_space<vmem>>, vector<16x48xf32>
    %cst_237 = arith.constant dense<0.000000e+00> : vector<16x48xf32>
    %248 = tpu.matmul %246, %247, %cst_237 {dimension_numbers = #tpu.dot_dimension_numbers<[1], [0], [0], [1], [0, 0, 1, 1], [], []>} : vector<16x16xf32>, vector<16x48xf32>, vector<16x48xf32> -> vector<16x48xf32>
    %249 = arith.addf %244, %248 : vector<16x48xf32>
    %c2_238 = arith.constant 2 : index
    %c0_239 = arith.constant 0 : index
    %c0_240 = arith.constant 0 : index
    %250 = vector.load %arg8[%c2_238, %c0_239, %c0_240] : memref<4x16x16xf32, #tpu.memory_space<vmem>>, vector<1x16x16xf32>
    %251 = vector.shape_cast %250 : vector<1x16x16xf32> to vector<16x16xf32>
    %c0_241 = arith.constant 0 : index
    %c2_242 = arith.constant 2 : index
    %252 = vector.load %arg16[%c0_241, %c2_242] : memref<16x51xf32, #tpu.memory_space<vmem>>, vector<16x48xf32>
    %cst_243 = arith.constant dense<0.000000e+00> : vector<16x48xf32>
    %253 = tpu.matmul %251, %252, %cst_243 {dimension_numbers = #tpu.dot_dimension_numbers<[1], [0], [0], [1], [0, 0, 1, 1], [], []>} : vector<16x16xf32>, vector<16x48xf32>, vector<16x48xf32> -> vector<16x48xf32>
    %254 = arith.addf %249, %253 : vector<16x48xf32>
    %c3_244 = arith.constant 3 : index
    %c0_245 = arith.constant 0 : index
    %c0_246 = arith.constant 0 : index
    %255 = vector.load %arg8[%c3_244, %c0_245, %c0_246] : memref<4x16x16xf32, #tpu.memory_space<vmem>>, vector<1x16x16xf32>
    %256 = vector.shape_cast %255 : vector<1x16x16xf32> to vector<16x16xf32>
    %c0_247 = arith.constant 0 : index
    %c3_248 = arith.constant 3 : index
    %257 = vector.load %arg16[%c0_247, %c3_248] : memref<16x51xf32, #tpu.memory_space<vmem>>, vector<16x48xf32>
    %cst_249 = arith.constant dense<0.000000e+00> : vector<16x48xf32>
    %258 = tpu.matmul %256, %257, %cst_249 {dimension_numbers = #tpu.dot_dimension_numbers<[1], [0], [0], [1], [0, 0, 1, 1], [], []>} : vector<16x16xf32>, vector<16x48xf32>, vector<16x48xf32> -> vector<16x48xf32>
    %259 = arith.addf %254, %258 : vector<16x48xf32>
    %c0_250 = arith.constant 0 : index
    %c0_251 = arith.constant 0 : index
    %260 = vector.load %arg9[%c0_250, %c0_251] : memref<16x3xf32, #tpu.memory_space<vmem>>, vector<16x1xf32>
    %261 = vector.broadcast %260 : vector<16x1xf32> to vector<16x48xf32>
    %262 = arith.addf %259, %261 : vector<16x48xf32>
    %cst_252 = arith.constant 0.000000e+00 : f32
    %263 = vector.broadcast %cst_252 : f32 to vector<16x48xf32>
    %264 = arith.cmpf ogt, %262, %263 : vector<16x48xf32>
    %cst_253 = arith.constant 0.000000e+00 : f32
    %265 = vector.broadcast %cst_253 : f32 to vector<16x48xf32>
    %266 = arith.minimumf %262, %265 : vector<16x48xf32>
    %267 = math.exp %266 : vector<16x48xf32>
    %cst_254 = arith.constant 1.000000e+00 : f32
    %268 = vector.broadcast %cst_254 : f32 to vector<16x48xf32>
    %269 = arith.subf %267, %268 : vector<16x48xf32>
    %270 = arith.select %264, %262, %269 : vector<16x48xi1>, vector<16x48xf32>
    %c0_255 = arith.constant 0 : index
    %c1_256 = arith.constant 1 : index
    %271 = vector.load %arg9[%c0_255, %c1_256] : memref<16x3xf32, #tpu.memory_space<vmem>>, vector<16x1xf32>
    %272 = vector.broadcast %271 : vector<16x1xf32> to vector<16x48xf32>
    %273 = arith.mulf %270, %272 : vector<16x48xf32>
    %c0_257 = arith.constant 0 : index
    %c2_258 = arith.constant 2 : index
    %274 = vector.load %arg9[%c0_257, %c2_258] : memref<16x3xf32, #tpu.memory_space<vmem>>, vector<16x1xf32>
    %275 = vector.broadcast %274 : vector<16x1xf32> to vector<16x48xf32>
    %276 = arith.addf %273, %275 : vector<16x48xf32>
    %c0_259 = arith.constant 0 : index
    %c0_260 = arith.constant 0 : index
    %c0_261 = arith.constant 0 : index
    %277 = vector.load %arg10[%c0_259, %c0_260, %c0_261] : memref<2x8x16xf32, #tpu.memory_space<vmem>>, vector<1x8x16xf32>
    %278 = vector.shape_cast %277 : vector<1x8x16xf32> to vector<8x16xf32>
    %cst_262 = arith.constant dense<0.000000e+00> : vector<8x48xf32>
    %279 = tpu.matmul %278, %276, %cst_262 {dimension_numbers = #tpu.dot_dimension_numbers<[1], [0], [0], [1], [0, 0, 1, 1], [], []>} : vector<8x16xf32>, vector<16x48xf32>, vector<8x48xf32> -> vector<8x48xf32>
    %c1_263 = arith.constant 1 : index
    %c0_264 = arith.constant 0 : index
    %c0_265 = arith.constant 0 : index
    %280 = vector.load %arg10[%c1_263, %c0_264, %c0_265] : memref<2x8x16xf32, #tpu.memory_space<vmem>>, vector<1x8x16xf32>
    %281 = vector.shape_cast %280 : vector<1x8x16xf32> to vector<8x16xf32>
    %cst_266 = arith.constant dense<0.000000e+00> : vector<8x48xf32>
    %282 = tpu.matmul %281, %276, %cst_266 {dimension_numbers = #tpu.dot_dimension_numbers<[1], [0], [0], [1], [0, 0, 1, 1], [], []>} : vector<8x16xf32>, vector<16x48xf32>, vector<8x48xf32> -> vector<8x48xf32>
    %c0_267 = arith.constant 0 : index
    %c0_268 = arith.constant 0 : index
    %c0_269 = arith.constant 0 : index
    %283 = vector.load %arg11[%c0_267, %c0_268, %c0_269] : memref<4x48x12xf32, #tpu.memory_space<vmem>>, vector<1x48x12xf32>
    %284 = vector.shape_cast %283 : vector<1x48x12xf32> to vector<48x12xf32>
    %cst_270 = arith.constant dense<0.000000e+00> : vector<8x12xf32>
    %285 = tpu.matmul %279, %284, %cst_270 {dimension_numbers = #tpu.dot_dimension_numbers<[1], [0], [0], [1], [0, 0, 1, 1], [], []>} : vector<8x48xf32>, vector<48x12xf32>, vector<8x12xf32> -> vector<8x12xf32>
    %c1_271 = arith.constant 1 : index
    %c0_272 = arith.constant 0 : index
    %c0_273 = arith.constant 0 : index
    %286 = vector.load %arg11[%c1_271, %c0_272, %c0_273] : memref<4x48x12xf32, #tpu.memory_space<vmem>>, vector<1x48x12xf32>
    %287 = vector.shape_cast %286 : vector<1x48x12xf32> to vector<48x12xf32>
    %cst_274 = arith.constant dense<0.000000e+00> : vector<8x12xf32>
    %288 = tpu.matmul %279, %287, %cst_274 {dimension_numbers = #tpu.dot_dimension_numbers<[1], [0], [0], [1], [0, 0, 1, 1], [], []>} : vector<8x48xf32>, vector<48x12xf32>, vector<8x12xf32> -> vector<8x12xf32>
    %c2_275 = arith.constant 2 : index
    %c0_276 = arith.constant 0 : index
    %c0_277 = arith.constant 0 : index
    %289 = vector.load %arg11[%c2_275, %c0_276, %c0_277] : memref<4x48x12xf32, #tpu.memory_space<vmem>>, vector<1x48x12xf32>
    %290 = vector.shape_cast %289 : vector<1x48x12xf32> to vector<48x12xf32>
    %cst_278 = arith.constant dense<0.000000e+00> : vector<8x12xf32>
    %291 = tpu.matmul %279, %290, %cst_278 {dimension_numbers = #tpu.dot_dimension_numbers<[1], [0], [0], [1], [0, 0, 1, 1], [], []>} : vector<8x48xf32>, vector<48x12xf32>, vector<8x12xf32> -> vector<8x12xf32>
    %c3_279 = arith.constant 3 : index
    %c0_280 = arith.constant 0 : index
    %c0_281 = arith.constant 0 : index
    %292 = vector.load %arg11[%c3_279, %c0_280, %c0_281] : memref<4x48x12xf32, #tpu.memory_space<vmem>>, vector<1x48x12xf32>
    %293 = vector.shape_cast %292 : vector<1x48x12xf32> to vector<48x12xf32>
    %cst_282 = arith.constant dense<0.000000e+00> : vector<8x12xf32>
    %294 = tpu.matmul %279, %293, %cst_282 {dimension_numbers = #tpu.dot_dimension_numbers<[1], [0], [0], [1], [0, 0, 1, 1], [], []>} : vector<8x48xf32>, vector<48x12xf32>, vector<8x12xf32> -> vector<8x12xf32>
    %c0_283 = arith.constant 0 : index
    %c0_284 = arith.constant 0 : index
    %c0_285 = arith.constant 0 : index
    %295 = vector.load %arg11[%c0_283, %c0_284, %c0_285] : memref<4x48x12xf32, #tpu.memory_space<vmem>>, vector<1x48x12xf32>
    %296 = vector.shape_cast %295 : vector<1x48x12xf32> to vector<48x12xf32>
    %cst_286 = arith.constant dense<0.000000e+00> : vector<8x12xf32>
    %297 = tpu.matmul %282, %296, %cst_286 {dimension_numbers = #tpu.dot_dimension_numbers<[1], [0], [0], [1], [0, 0, 1, 1], [], []>} : vector<8x48xf32>, vector<48x12xf32>, vector<8x12xf32> -> vector<8x12xf32>
    %c1_287 = arith.constant 1 : index
    %c0_288 = arith.constant 0 : index
    %c0_289 = arith.constant 0 : index
    %298 = vector.load %arg11[%c1_287, %c0_288, %c0_289] : memref<4x48x12xf32, #tpu.memory_space<vmem>>, vector<1x48x12xf32>
    %299 = vector.shape_cast %298 : vector<1x48x12xf32> to vector<48x12xf32>
    %cst_290 = arith.constant dense<0.000000e+00> : vector<8x12xf32>
    %300 = tpu.matmul %282, %299, %cst_290 {dimension_numbers = #tpu.dot_dimension_numbers<[1], [0], [0], [1], [0, 0, 1, 1], [], []>} : vector<8x48xf32>, vector<48x12xf32>, vector<8x12xf32> -> vector<8x12xf32>
    %c2_291 = arith.constant 2 : index
    %c0_292 = arith.constant 0 : index
    %c0_293 = arith.constant 0 : index
    %301 = vector.load %arg11[%c2_291, %c0_292, %c0_293] : memref<4x48x12xf32, #tpu.memory_space<vmem>>, vector<1x48x12xf32>
    %302 = vector.shape_cast %301 : vector<1x48x12xf32> to vector<48x12xf32>
    %cst_294 = arith.constant dense<0.000000e+00> : vector<8x12xf32>
    %303 = tpu.matmul %282, %302, %cst_294 {dimension_numbers = #tpu.dot_dimension_numbers<[1], [0], [0], [1], [0, 0, 1, 1], [], []>} : vector<8x48xf32>, vector<48x12xf32>, vector<8x12xf32> -> vector<8x12xf32>
    %c3_295 = arith.constant 3 : index
    %c0_296 = arith.constant 0 : index
    %c0_297 = arith.constant 0 : index
    %304 = vector.load %arg11[%c3_295, %c0_296, %c0_297] : memref<4x48x12xf32, #tpu.memory_space<vmem>>, vector<1x48x12xf32>
    %305 = vector.shape_cast %304 : vector<1x48x12xf32> to vector<48x12xf32>
    %cst_298 = arith.constant dense<0.000000e+00> : vector<8x12xf32>
    %306 = tpu.matmul %282, %305, %cst_298 {dimension_numbers = #tpu.dot_dimension_numbers<[1], [0], [0], [1], [0, 0, 1, 1], [], []>} : vector<8x48xf32>, vector<48x12xf32>, vector<8x12xf32> -> vector<8x12xf32>
    %307 = arith.maximumf %285, %288 : vector<8x12xf32>
    %308 = arith.maximumf %307, %291 : vector<8x12xf32>
    %309 = arith.maximumf %308, %294 : vector<8x12xf32>
    %310 = arith.maximumf %309, %297 : vector<8x12xf32>
    %311 = arith.maximumf %310, %300 : vector<8x12xf32>
    %312 = arith.maximumf %311, %303 : vector<8x12xf32>
    %313 = arith.maximumf %312, %306 : vector<8x12xf32>
    %c0_299 = arith.constant 0 : index
    %c0_300 = arith.constant 0 : index
    %314 = vector.load %arg12[%c0_299, %c0_300] : memref<8x12xf32, #tpu.memory_space<vmem>>, vector<8x12xf32>
    %315 = arith.mulf %314, %313 : vector<8x12xf32>
    %cst_301 = arith.constant dense<0.000000e+00> : vector<8xf32>
    %316 = vector.multi_reduction <add>, %315, %cst_301 [1] : vector<8x12xf32> to vector<8xf32>
    %317 = vector.shape_cast %316 : vector<8xf32> to vector<8x1xf32>
    %cst_302 = arith.constant dense<0.000000e+00> : vector<1xf32>
    %318 = vector.multi_reduction <add>, %317, %cst_302 [0] : vector<8x1xf32> to vector<1xf32>
    %319 = vector.shape_cast %318 : vector<1xf32> to vector<1x1xf32>
    %c0_303 = arith.constant 0 : index
    %c0_304 = arith.constant 0 : index
    %320 = vector.load %arg13[%c0_303, %c0_304] : memref<1x1xf32, #tpu.memory_space<vmem>>, vector<1x1xf32>
    %321 = arith.addf %319, %320 : vector<1x1xf32>
    %cst_305 = arith.constant 0.000000e+00 : f32
    %322 = vector.broadcast %cst_305 : f32 to vector<1x1xf32>
    %323 = arith.subf %322, %321 : vector<1x1xf32>
    %324 = math.exp %323 : vector<1x1xf32>
    %cst_306 = arith.constant 1.000000e+00 : f32
    %325 = vector.broadcast %cst_306 : f32 to vector<1x1xf32>
    %326 = arith.addf %325, %324 : vector<1x1xf32>
    %cst_307 = arith.constant 1.000000e+00 : f32
    %327 = vector.broadcast %cst_307 : f32 to vector<1x1xf32>
    %328 = arith.divf %327, %326 : vector<1x1xf32>
    %c0_308 = arith.constant 0 : index
    %c0_309 = arith.constant 0 : index
    %c0_310 = arith.constant 0 : index
    %329 = vector.load %arg14[%c0_308, %c0_309, %c0_310] : memref<1x1x1xf32, #tpu.memory_space<vmem>>, vector<1x1x1xf32>
    %330 = vector.shape_cast %329 : vector<1x1x1xf32> to vector<1x1xf32>
    %331 = vector.shape_cast %328 : vector<1x1xf32> to vector<1x1x1xf32>
    tpu.vector_store %arg14[%c0_308, %c0_309, %c0_310], %331 {strides = array<i32>} : memref<1x1x1xf32, #tpu.memory_space<vmem>>, vector<1x1x1xf32>,
    return
  }
  func.func @transform_0(%arg0: i32) -> (i32, i32, i32) {
    %c0_i32 = arith.constant 0 : i32
    %c0_i32_0 = arith.constant 0 : i32
    %c0_i32_1 = arith.constant 0 : i32
    return %arg0, %c0_i32, %c0_i32_0 : i32, i32, i32
  }
  func.func @transform_1(%arg0: i32) -> (i32, i32) {
    %c0_i32 = arith.constant 0 : i32
    %c0_i32_0 = arith.constant 0 : i32
    %c0_i32_1 = arith.constant 0 : i32
    return %c0_i32, %c0_i32_0 : i32, i32
  }
  func.func @transform_2(%arg0: i32) -> (i32, i32) {
    %c0_i32 = arith.constant 0 : i32
    %c0_i32_0 = arith.constant 0 : i32
    %c0_i32_1 = arith.constant 0 : i32
    return %c0_i32, %c0_i32_0 : i32, i32
  }
  func.func @transform_3(%arg0: i32) -> (i32, i32, i32) {
    %c0_i32 = arith.constant 0 : i32
    %c0_i32_0 = arith.constant 0 : i32
    %c0_i32_1 = arith.constant 0 : i32
    %c0_i32_2 = arith.constant 0 : i32
    return %c0_i32, %c0_i32_0, %c0_i32_1 : i32, i32, i32
  }
  func.func @transform_4(%arg0: i32) -> (i32, i32) {
    %c0_i32 = arith.constant 0 : i32
    %c0_i32_0 = arith.constant 0 : i32
    %c0_i32_1 = arith.constant 0 : i32
    return %c0_i32, %c0_i32_0 : i32, i32
  }
  func.func @transform_5(%arg0: i32) -> (i32, i32, i32) {
    %c0_i32 = arith.constant 0 : i32
    %c0_i32_0 = arith.constant 0 : i32
    %c0_i32_1 = arith.constant 0 : i32
    %c0_i32_2 = arith.constant 0 : i32
    return %c0_i32, %c0_i32_0, %c0_i32_1 : i32, i32, i32
  }
  func.func @transform_6(%arg0: i32) -> (i32, i32, i32) {
    %c0_i32 = arith.constant 0 : i32
    %c0_i32_0 = arith.constant 0 : i32
    %c0_i32_1 = arith.constant 0 : i32
    %c0_i32_2 = arith.constant 0 : i32
    return %c0_i32, %c0_i32_0, %c0_i32_1 : i32, i32, i32
  }
  func.func @transform_7(%arg0: i32) -> (i32, i32, i32) {
    %c0_i32 = arith.constant 0 : i32
    %c0_i32_0 = arith.constant 0 : i32
    %c0_i32_1 = arith.constant 0 : i32
    %c0_i32_2 = arith.constant 0 : i32
    return %c0_i32, %c0_i32_0, %c0_i32_1 : i32, i32, i32
  }
  func.func @transform_8(%arg0: i32) -> (i32, i32) {
    %c0_i32 = arith.constant 0 : i32
    %c0_i32_0 = arith.constant 0 : i32
    %c0_i32_1 = arith.constant 0 : i32
    return %c0_i32, %c0_i32_0 : i32, i32
  }
  func.func @transform_9(%arg0: i32) -> (i32, i32, i32) {
    %c0_i32 = arith.constant 0 : i32
    %c0_i32_0 = arith.constant 0 : i32
    %c0_i32_1 = arith.constant 0 : i32
    %c0_i32_2 = arith.constant 0 : i32
    return %c0_i32, %c0_i32_0, %c0_i32_1 : i32, i32, i32
  }
  func.func @transform_10(%arg0: i32) -> (i32, i32, i32) {
    %c0_i32 = arith.constant 0 : i32
    %c0_i32_0 = arith.constant 0 : i32
    %c0_i32_1 = arith.constant 0 : i32
    %c0_i32_2 = arith.constant 0 : i32
    return %c0_i32, %c0_i32_0, %c0_i32_1 : i32, i32, i32
  }
  func.func @transform_11(%arg0: i32) -> (i32, i32) {
    %c0_i32 = arith.constant 0 : i32
    %c0_i32_0 = arith.constant 0 : i32
    %c0_i32_1 = arith.constant 0 : i32
    return %c0_i32, %c0_i32_0 : i32, i32
  }
  func.func @transform_12(%arg0: i32) -> (i32, i32) {
    %c0_i32 = arith.constant 0 : i32
    %c0_i32_0 = arith.constant 0 : i32
    %c0_i32_1 = arith.constant 0 : i32
    return %c0_i32, %c0_i32_0 : i32, i32
  }
  func.func @transform_13(%arg0: i32) -> (i32, i32, i32) {
    %c0_i32 = arith.constant 0 : i32
    %c0_i32_0 = arith.constant 0 : i32
    %c0_i32_1 = arith.constant 0 : i32
    return %arg0, %c0_i32, %c0_i32_0 : i32, i32, i32
  }
}

</mosaic_0001>

<bundles_post_ra>
// kernel: eegnet_forward.1
= control target key start
LH: loop header
LB: loop body
LE: loop exit
PB: predicated region body
PF: predicated region fallthrough
CT: control target
= control target key end

     0   :  { %s7675_s27 = smov 0   ;;  %s9792_s0 = inlined_call_operand.vmem [shape: f32[2,272,188], index: 0, kind: input, shape index: {}]   ;;  %s9793_s1 = inlined_call_operand.vmem [shape: f32[16,272], index: 1, kind: input, shape index: {}]   ;;  %s9794_s2 = inlined_call_operand.vmem [shape: f32[16,3], index: 2, kind: input, shape index: {}]   ;;  %s9795_s3 = inlined_call_operand.vmem [shape: f32[32,32,16], index: 3, kind: input, shape index: {}]   ;;  %s9796_s4 = inlined_call_operand.vmem [shape: f32[32,3], index: 4, kind: input, shape index: {}]   ;;  %s9797_s5 = inlined_call_operand.vmem [shape: f32[2,190,48], index: 5, kind: input, shape index: {}]   ;;  %s9798_s6 = inlined_call_operand.vmem [shape: f32[2,16,32], index: 6, kind: input, shape index: {}]   ;;  %s9799_s7 = inlined_call_operand.vmem [shape: f32[4,16,16], index: 7, kind: input, shape index: {}]   ;;  %s9800_s8 = inlined_call_operand.vmem [shape: f32[16,3], index: 8, kind: input, shape index: {}]   ;;  %s9801_s9 = inlined_call_operand.vmem [shape: f32[2,8,16], index: 9, kind: input, shape index: {}]   ;;  %s9802_s10 = inlined_call_operand.vmem [shape: f32[4,48,12], index: 10, kind: input, shape index: {}]   ;;  %s9803_s11 = inlined_call_operand.vmem [shape: f32[8,12], index: 11, kind: input, shape index: {}]   ;;  %s9804_s12 = inlined_call_operand.<no memory space> [shape: f32[1,1], index: 12, kind: input, shape index: {}]   ;;  %s9805_s13 = inlined_call_operand.vmem [shape: f32[2,1,1], index: 13, kind: output, shape index: {}]  }
   0x1   :  { %v18_v0 = vstv %s9804_s12 }
   0x2   :  { %19 = vst [vmem:[#allocation4] sm:$0x1] %v18_v0 }
   0x3 LB: > { %s6790_s28 = sadd.s32 4294967295, %s7562_s27   ;;  %p6794_p0 = scmp.ge.s32.totalorder %s7562_s27, 1  ;;  %s7562_s27 = sphi %s7675_s27, %s25_s27  }
   0x4   : > { %p389_p1 = scmp.lt.s32.totalorder %s7562_s27, 3 }
   0x6   : > { %p390_p2 = pnand %p6794_p0, %p389_p1 }
   0x8   : > { %393 = sbr.rel (%p390_p2) target bundleno = 2874 (0xb3a), region = 72 }
   0xd   : > { %p431_p3 = scmp.lt.s32.totalorder %s6790_s28, 1  ;;  %v440_v1 = vld [vmem:[%s9793_s1 + $0x8] sm:$0xff]  ;;  %v9810_v2 = vmov 0.0   ;;  %v7565_v3 = vmov 0   ;;  %v9808_v5 = vmov 1   ;;  %v513_v6 = vld [vmem:[%s9794_s2] sm:$0xff] }
   0xe   : > { %596 = vmatprep.mubr.f32.mxu0 %v440_v1  ;;  %673 = vmatprep.mubr.f32.mxu1 %v9810_v2  ;;  %734 = vst [vmem:[#allocation2] sm:$0xff] %v9810_v2  ;;  %737 = vst [vmem:[#allocation2 + $0x10] sm:$0xff] %v9810_v2  ;;  %v514_v4 = vld [vmem:[%s9794_s2 + $0x8] sm:$0xff]  ;;  %v9806_v14 = vmov 2   ;;  %v441_v37 = vld [vmem:[%s9793_s1 + $0x10] sm:$0xff]  ;;  %vm525_vm0 = vcmask 130048  }
   0xf   : > { %s9852_s28 = smov (!%p431_p3, %s6790_s28), 1  ;;  %7508 = vset.pattern.permute.xlu0 %v7565_v3  ;;  %7509 = vset.pattern.permute.xlu1 %v9808_v5  ;;  %v444_v42 = vld [vmem:[%s9793_s1 + $0x28] sm:$0xff]  ;;  %vm735_vm1 = vcmask 760832   ;;  %vm757_vm6 = vcmask 1047680   ;;  %vm759_vm7 = vcmask 621568   ;;  %s7569_s16 = smov 127  }
  0x10   : > { %522 = vperm.xlu0 %7508, %v514_v4   ;;  %715 = vperm.xlu1 %7509, %v514_v4   ;;  %s7461_s15 = smul.u32 544, %s9852_s28  ;;  %738 = vst.msk [vmem:[#allocation2 + $0x18] sm:$0xff] %vm735_vm1, %v9810_v2  ;;  %736 = vst.msk [vmem:[#allocation2 + $0x8] sm:$0xff] %vm735_vm1, %v9810_v2  ;;  %s7570_s17 = smov 126   ;;  %vm788_vm8 = vcmask 1039360   ;;  %vm1010_vm9 = vcmask 1031168  }
  0x11   : > { %s7571_s18 = smov 125   ;;  %s7572_s19 = smov 124   ;;  %vm1268_vm10 = vcmask 1014784   ;;  %vm1139_vm11 = vcmask 1022976   ;;  %vm1526_vm12 = vcmask 998400   ;;  %vm1397_vm13 = vcmask 1006592  }
  0x12   : > { %s7703_s20 = scalar_lea.vmem %s9792_s0, %s7461_s15  ;;  %s7568_s15 = smov 16   ;;  %vm1784_vm14 = vcmask 982016   ;;  %vm1655_vm15 = vcmask 990208   ;;  %vm2042_vm1 = vcmask 965632  }
  0x13   : > { %v476_v7 = vld [vmem:[%s7703_s20 + $0xf8] sm:$0xff]  ;;  %v475_v8 = vld [vmem:[%s7703_s20 + $0xf0] sm:$0xff]  ;;  %v474_v9 = vld [vmem:[%s7703_s20 + $0xe8] sm:$0xff]  ;;  %s7574_s21 = smov 122   ;;  %s7575_s22 = smov 121  }
  0x14   : > { %517 = vperm.xlu0 %7508, %v513_v6   ;;  %711 = vperm.xlu1 %7509, %v513_v6   ;;  %v473_v10 = vld [vmem:[%s7703_s20 + $0xe0] sm:$0xff]  ;;  %v472_v11 = vld [vmem:[%s7703_s20 + $0xd8] sm:$0xff]  ;;  %v471_v12 = vld [vmem:[%s7703_s20 + $0xd0] sm:$0xff]  ;;  %s7576_s23 = smov 120   ;;  %s7577_s24 = smov 119  }
  0x15   : > { %532 = vmatprep.subr.mxu0 %v476_v7  ;;  %v470_v13 = vld [vmem:[%s7703_s20 + $0xc8] sm:$0xff]  ;;  %v469_v15 = vld [vmem:[%s7703_s20 + $0xc0] sm:$0xff]  ;;  %v468_v16 = vld [vmem:[%s7703_s20 + $0xb8] sm:$0xff]  ;;  %s7578_s25 = smov 118   ;;  %s7579_s26 = smov 117  }
  0x16   : > { %533 = vmatpush1.msra.mxu0 %v475_v8  ;;  %v467_v17 = vld [vmem:[%s7703_s20 + $0xb0] sm:$0xff]  ;;  %v466_v18 = vld [vmem:[%s7703_s20 + $0xa8] sm:$0xff]  ;;  %v465_v19 = vld [vmem:[%s7703_s20 + $0xa0] sm:$0xff]  ;;  %s7580_s29 = smov 116   ;;  %s7581_s30 = smov 115  }
  0x17   : > { %534 = vmatprep.subr.mxu0 %v474_v9  ;;  %v464_v20 = vld [vmem:[%s7703_s20 + $0x98] sm:$0xff]  ;;  %v463_v21 = vld [vmem:[%s7703_s20 + $0x90] sm:$0xff]  ;;  %v462_v22 = vld [vmem:[%s7703_s20 + $0x88] sm:$0xff]  ;;  %s7582_s12 = smov 114   ;;  %s7583_s14 = smov 113  }
  0x18   : > { %535 = vmatpush1.msra.mxu0 %v473_v10  ;;  %7511 = vset.pattern.permute.xlu1 %v9806_v14  ;;  %v461_v23 = vld [vmem:[%s7703_s20 + $0x80] sm:$0xff]  ;;  %v460_v24 = vld [vmem:[%s7703_s20 + $0x78] sm:$0xff]  ;;  %v459_v25 = vld [vmem:[%s7703_s20 + $0x70] sm:$0xff] }
  0x19   : > { %536 = vmatprep.subr.mxu0 %v472_v11  ;;  %723 = vperm.xlu1 %7511, %v513_v6   ;;  %v458_v26 = vld [vmem:[%s7703_s20 + $0x68] sm:$0xff]  ;;  %v457_v27 = vld [vmem:[%s7703_s20 + $0x60] sm:$0xff]  ;;  %v456_v28 = vld [vmem:[%s7703_s20 + $0x58] sm:$0xff] }
  0x1a   : > { %537 = vmatpush1.msra.mxu0 %v471_v12  ;;  %7510 = vset.pattern.permute.xlu0 %v9806_v14  ;;  %v455_v29 = vld [vmem:[%s7703_s20 + $0x50] sm:$0xff]  ;;  %v454_v30 = vld [vmem:[%s7703_s20 + $0x48] sm:$0xff]  ;;  %v512_v31 = vld [vmem:[%s7703_s20 + $0x218] sm:$0xff] }
  0x1b   : > { %538 = vmatprep.subr.mxu0 %v470_v13  ;;  %727 = vperm.xlu0 %7510, %v514_v4   ;;  %v453_v32 = vld [vmem:[%s7703_s20 + $0x40] sm:$0xff]  ;;  %v511_v33 = vld [vmem:[%s7703_s20 + $0x210] sm:$0xff]  ;;  %v510_v34 = vld [vmem:[%s7703_s20 + $0x208] sm:$0xff] }
  0x1c   : > { %539 = vmatpush1.msra.mxu0 %v469_v15  ;;  %637 = vmatprep.subr.mxu1 %v512_v31  ;;  %v452_v35 = vld [vmem:[%s7703_s20 + $0x38] sm:$0xff]  ;;  %v509_v36 = vld [vmem:[%s7703_s20 + $0x200] sm:$0xff]  ;;  %v451_v38 = vld [vmem:[%s7703_s20 + $0x30] sm:$0xff] }
  0x1d   : > { %540 = vmatprep.subr.mxu0 %v468_v16  ;;  %7512 = vset.pattern.permute.xlu1 %v7565_v3  ;;  %v450_v39 = vld [vmem:[%s7703_s20 + $0x28] sm:$0xff]  ;;  %v449_v40 = vld [vmem:[%s7703_s20 + $0x20] sm:$0xff]  ;;  %v448_v41 = vld [vmem:[%s7703_s20 + $0x18] sm:$0xff] }
  0x1e   : > { %541 = vmatpush1.msra.mxu0 %v467_v17  ;;  %638 = vmatpush1.msra.mxu1 %v511_v33  ;;  %v447_v43 = vld [vmem:[%s7703_s20 + $0x10] sm:$0xff]  ;;  %v446_v44 = vld [vmem:[%s7703_s20 + $0x8] sm:$0xff]  ;;  %v445_v45 = vld [vmem:[%s7703_s20] sm:$0xff] }
  0x1f   : > { %542 = vmatprep.subr.mxu0 %v466_v18  ;;  %7513 = vset.pattern.permute.xlu0 %v7565_v3  ;;  %v508_v46 = vld [vmem:[%s7703_s20 + $0x1f8] sm:$0xff]  ;;  %v507_v47 = vld [vmem:[%s7703_s20 + $0x1f0] sm:$0xff]  ;;  %v506_v48 = vld [vmem:[%s7703_s20 + $0x1e8] sm:$0xff] }
  0x20   : > { %543 = vmatpush1.msra.mxu0 %v465_v19  ;;  %639 = vmatprep.subr.mxu1 %v510_v34  ;;  %v505_v49 = vld [vmem:[%s7703_s20 + $0x1e0] sm:$0xff]  ;;  %v504_v50 = vld [vmem:[%s7703_s20 + $0x1d8] sm:$0xff]  ;;  %v503_v51 = vld [vmem:[%s7703_s20 + $0x1d0] sm:$0xff] }
  0x21   : > { %544 = vmatprep.subr.mxu0 %v464_v20  ;;  %640 = vmatpush1.msra.mxu1 %v509_v36  ;;  %v502_v52 = vld [vmem:[%s7703_s20 + $0x1c8] sm:$0xff]  ;;  %v501_v53 = vld [vmem:[%s7703_s20 + $0x1c0] sm:$0xff]  ;;  %v500_v54 = vld [vmem:[%s7703_s20 + $0x1b8] sm:$0xff] }
  0x22   : > { %545 = vmatpush1.msra.mxu0 %v463_v21  ;;  %6796 = vmatmul.mubr.msk.f32.vlgmr.msra.gmra.mxu1 %vm525_vm0, %v441_v37  ;;  %v499_v55 = vld [vmem:[%s7703_s20 + $0x1b0] sm:$0xff]  ;;  %v498_v56 = vld [vmem:[%s7703_s20 + $0x1a8] sm:$0xff]  ;;  %v497_v57 = vld [vmem:[%s7703_s20 + $0x1a0] sm:$0xff] }
  0x23   : > { %546 = vmatprep.subr.mxu0 %v462_v22  ;;  %679 = vmatprep.mubr.f32.mxu1 %v9810_v2  ;;  %v496_v58 = vld [vmem:[%s7703_s20 + $0x198] sm:$0xff]  ;;  %v495_v59 = vld [vmem:[%s7703_s20 + $0x190] sm:$0xff]  ;;  %v494_v60 = vld [vmem:[%s7703_s20 + $0x188] sm:$0xff] }
  0x24   : > { %547 = vmatpush1.msra.mxu0 %v461_v23  ;;  %v493_v61 = vld [vmem:[%s7703_s20 + $0x180] sm:$0xff]  ;;  %v492_v62 = vld [vmem:[%s7703_s20 + $0x178] sm:$0xff]  ;;  %v491_v63 = vld [vmem:[%s7703_s20 + $0x170] sm:$0xff] }
  0x25   : > { %548 = vmatprep.subr.mxu0 %v460_v24  ;;  %v490_v0 = vld [vmem:[%s7703_s20 + $0x168] sm:$0xff]  ;;  %v489_v1 = vld [vmem:[%s7703_s20 + $0x160] sm:$0xff]  ;;  %v488_v4 = vld [vmem:[%s7703_s20 + $0x158] sm:$0xff] }
  0x26   : > { %549 = vmatpush1.msra.mxu0 %v459_v25  ;;  %6797 = vmatmul.mubr.msk.f32.gmra.mxu1 %vm525_vm0, %v444_v42  ;;  %v487_v6 = vld [vmem:[%s7703_s20 + $0x150] sm:$0xff]  ;;  %v486_v7 = vld [vmem:[%s7703_s20 + $0x148] sm:$0xff]  ;;  %v485_v8 = vld [vmem:[%s7703_s20 + $0x140] sm:$0xff] }
  0x27   : > { %550 = vmatprep.subr.mxu0 %v458_v26  ;;  %871 = vmatprep.mubr.f32.mxu1 %v9810_v2  ;;  %v484_v9 = vld [vmem:[%s7703_s20 + $0x138] sm:$0xff]  ;;  %v483_v10 = vld [vmem:[%s7703_s20 + $0x130] sm:$0xff]  ;;  %v482_v11 = vld [vmem:[%s7703_s20 + $0x128] sm:$0xff] }
  0x28   : > { %551 = vmatpush1.msra.mxu0 %v457_v27  ;;  %v481_v12 = vld [vmem:[%s7703_s20 + $0x120] sm:$0xff]  ;;  %v480_v13 = vld [vmem:[%s7703_s20 + $0x118] sm:$0xff]  ;;  %v479_v15 = vld [vmem:[%s7703_s20 + $0x110] sm:$0xff] }
  0x29   : > { %552 = vmatprep.subr.mxu0 %v456_v28  ;;  %v478_v16 = vld [vmem:[%s7703_s20 + $0x108] sm:$0xff]  ;;  %v477_v17 = vld [vmem:[%s7703_s20 + $0x100] sm:$0xff]  ;;  %v442_v20 = vld [vmem:[%s9793_s1 + $0x18] sm:$0xff]  ;;  %s7573_s20 = smov 123  }
  0x2a   : > { %553 = vmatpush1.msra.mxu0 %v455_v29  ;;  %v439_v18 = vld [vmem:[%s9793_s1] sm:$0xff] }
  0x2b   : > { %554 = vmatprep.subr.mxu0 %v454_v30  ;;  %v443_v19 = vld [vmem:[%s9793_s1 + $0x20] sm:$0xff] }
  0x2c   : > { %555 = vmatpush1.msra.mxu0 %v453_v32 }
  0x2d   : > { %556 = vmatprep.subr.mxu0 %v452_v35 }
  0x2e   : > { %557 = vmatpush1.msra.mxu0 %v451_v38 }
  0x2f   : > { %558 = vmatprep.subr.mxu0 %v450_v39 }
  0x30   : > { %559 = vmatpush1.msra.mxu0 %v449_v40 }
  0x31   : > { %560 = vmatprep.subr.mxu0 %v448_v41 }
  0x32   : > { %561 = vmatpush1.msra.mxu0 %v447_v43 }
  0x33   : > { %562 = vmatprep.subr.mxu0 %v446_v44 }
  0x34   : > { %563 = vmatpush1.msra.mxu0 %v445_v45 }
  0x35   : > { %564 = vmatprep.subr.mxu0 %v508_v46 }
  0x36   : > { %565 = vmatpush2.msra.mxu0 %v507_v47 }
  0x37   : > { %566 = vmatprep.subr.mxu0 %v506_v48 }
  0x38   : > { %567 = vmatpush2.msra.mxu0 %v505_v49 }
  0x39   : > { %568 = vmatprep.subr.mxu0 %v504_v50 }
  0x3a   : > { %569 = vmatpush2.msra.mxu0 %v503_v51 }
  0x3b   : > { %570 = vmatprep.subr.mxu0 %v502_v52 }
  0x3c   : > { %571 = vmatpush2.msra.mxu0 %v501_v53 }
  0x3d   : > { %572 = vmatprep.subr.mxu0 %v500_v54 }
  0x3e   : > { %573 = vmatpush2.msra.mxu0 %v499_v55 }
  0x3f   : > { %574 = vmatprep.subr.mxu0 %v498_v56 }
  0x40   : > { %575 = vmatpush2.msra.mxu0 %v497_v57 }
  0x41   : > { %576 = vmatprep.subr.mxu0 %v496_v58 }
  0x42   : > { %577 = vmatpush2.msra.mxu0 %v495_v59 }
  0x43   : > { %578 = vmatprep.subr.mxu0 %v494_v60 }
  0x44   : > { %579 = vmatpush2.msra.mxu0 %v493_v61 }
  0x45   : > { %580 = vmatprep.subr.mxu0 %v492_v62 }
  0x46   : > { %581 = vmatpush2.msra.mxu0 %v491_v63 }
  0x47   : > { %582 = vmatprep.subr.mxu0 %v490_v0 }
  0x48   : > { %583 = vmatpush2.msra.mxu0 %v489_v1 }
  0x49   : > { %584 = vmatprep.subr.mxu0 %v488_v4 }
  0x4a   : > { %585 = vmatpush2.msra.mxu0 %v487_v6 }
  0x4b   : > { %586 = vmatprep.subr.mxu0 %v486_v7 }
  0x4c   : > { %587 = vmatpush2.msra.mxu0 %v485_v8 }
  0x4d   : > { %588 = vmatprep.subr.mxu0 %v484_v9 }
  0x4e   : > { %589 = vmatpush2.msra.mxu0 %v483_v10 }
  0x4f   : > { %590 = vmatprep.subr.mxu0 %v482_v11 }
  0x50   : > { %591 = vmatpush2.msra.mxu0 %v481_v12 }
  0x51   : > { %592 = vmatprep.subr.mxu0 %v480_v13 }
  0x52   : > { %593 = vmatpush2.msra.mxu0 %v479_v15 }
  0x53   : > { %594 = vmatprep.subr.mxu0 %v478_v16 }
  0x54   : > { %595 = vmatpush2.msra.mxu0 %v477_v17 }
  0x55   : > { %597 = vmatmul.mubr.f32.vlgmr.msra.gmra.mxu0 %v439_v18 }
  0x56   : > { %602 = vmatprep.mubr.f32.mxu0 %v443_v19 }
  0x59   : > { %603 = vmatmul.mubr.f32.gmra.mxu0 %v442_v20 }
  0x5a   : > { %1351 = vmatprep.mubr.f32.mxu0 %v9810_v2 }
  0x8b   : > { %v523_v21 = vpop.permute.xlu0 %522  ;;  %v716_v47 = vpop.permute.xlu1 %715 }
  0x8f   : > { %v518_v23 = vpop.permute.xlu0 %517  ;;  %v712_v53 = vpop.permute.xlu1 %711 }
  0x94   : > { %v724_v4 = vpop.permute.xlu1 %723 }
  0x96   : > { %v728_v58 = vpop.permute.xlu0 %727 }
  0xe2   : > { %v675_v22 = vpop.f32.mrf.mxu1 }
  0xe4   : > { %v677_v26 = vpop.f32.mrf.mxu1 }
  0xe6   : > { %v681_v34 = vpop.f32.mrf.mxu1 }
  0xe8   : > { %v683_v42 = vpop.f32.mrf.mxu1 }
 0x115   : > { %v598_v24 = vpop.f32.mrf.mxu0 }
 0x116   : > { %v599_v25 = vadd.f32 %v598_v24, %v518_v23 }
 0x117   : > { %v600_v27 = vpop.f32.mrf.mxu0 }
 0x118   : > { %v676_v28 = vadd.f32 %v675_v22, %v599_v25  ;;  %v601_v29 = vadd.f32 %v600_v27, %v518_v23  ;;  %v6802_v27 = vld [vmem:[%s9795_s3 + $0x20] sm:$0xff] }
 0x119   : > { %v604_v30 = vpop.f32.mrf.mxu0 }
 0x11a   : > { %v690_v31 = vmin.f32 %v676_v28, 0.0  ;;  %v678_v32 = vadd.f32 %v677_v26, %v601_v29  ;;  %v605_v33 = vadd.f32 %v604_v30, %v523_v21  ;;  %vm686_vm2 = vcmp.gt.f32.partialorder %v676_v28, 0.0 }
 0x11b   : > { %v606_v35 = vpop.f32.mrf.mxu0 }
 0x11c   : > { %v694_v36 = vmul.f32 1.442695, %v690_v31  ;;  %v691_v37 = vmin.f32 %v678_v32, 0.0  ;;  %v682_v38 = vadd.f32 %v681_v34, %v605_v33  ;;  %v607_v39 = vadd.f32 %v606_v35, %v523_v21  ;;  %v6803_v31 = vld [vmem:[%s9795_s3 + $0x28] sm:$0xff]  ;;  %v6804_v34 = vld [vmem:[%s9795_s3 + $0x30] sm:$0xff] }
 0x11d   : > { %vm687_vm4 = vcmp.gt.f32.partialorder %v678_v32, 0.0 }
 0x11e   : > { %7524 = vpow2.f32 %v694_v36  ;;  %v696_v40 = vmul.f32 1.442695, %v691_v37  ;;  %v692_v41 = vmin.f32 %v682_v38, 0.0  ;;  %v684_v43 = vadd.f32 %v683_v42, %v607_v39  ;;  %v6805_v37 = vld [vmem:[%s9795_s3 + $0x38] sm:$0xff] }
 0x11f   : > { %vm688_vm3 = vcmp.gt.f32.partialorder %v682_v38, 0.0 }
 0x120   : > { %v698_v44 = vmul.f32 1.442695, %v692_v41  ;;  %7526 = vpow2.f32 %v696_v40  ;;  %v693_v45 = vmin.f32 %v684_v43, 0.0  ;;  %vm689_vm5 = vcmp.gt.f32.partialorder %v684_v43, 0.0  ;;  %v763_v40 = vld [vmem:[%s9795_s3] sm:$0xff] }
 0x122   : > { %7528 = vpow2.f32 %v698_v44  ;;  %v700_v46 = vmul.f32 1.442695, %v693_v45  ;;  %v764_v44 = vld [vmem:[%s9795_s3 + $0x8] sm:$0xff] }
 0x124   : > { %7530 = vpow2.f32 %v700_v46 }
 0x12b   : > { %v7525_v48 = vpop.eup %7524 }
 0x12c   : > { %v6798_v50 = vadd.f32 -1.0, %v7525_v48 }
 0x12d   : > { %v7527_v49 = vpop.eup %7526 }
 0x12e   : > { %v6799_v54 = vadd.f32 -1.0, %v7527_v49  ;;  %v706_v57 = vsel %vm686_vm2, %v676_v28, %v6798_v50  ;;  %v765_v49 = vld [vmem:[%s9795_s3 + $0x10] sm:$0xff]  ;;  %v6830_v50 = vld [vmem:[%s9795_s3 + $0x80] sm:$0xff]  ;;  %vm1913_vm2 = vcmask 973824  }
 0x12f   : > { %v7529_v51 = vpop.eup %7528  ;;  %v718_v63 = vmul.f32 %v712_v53, %v706_v57 }
 0x130   : > { %v6800_v52 = vadd.f32 -1.0, %v7529_v51  ;;  %v707_v62 = vsel %vm687_vm4, %v678_v32, %v6799_v54  ;;  %v766_v54 = vld [vmem:[%s9795_s3 + $0x18] sm:$0xff]  ;;  %vm2171_vm4 = vcmask 957440  }
 0x131   : > { %v7531_v55 = vpop.eup %7530  ;;  %v719_v6 = vmul.f32 %v712_v53, %v707_v62  ;;  %v730_v8 = vadd.f32 %v724_v4, %v718_v63  ;;  %v6815_v62 = vld [vmem:[%s9795_s3 + $0x48] sm:$0xff] }
 0x132   : > { %v708_v56 = vsel %vm688_vm3, %v682_v38, %v6800_v52  ;;  %v6801_v59 = vadd.f32 -1.0, %v7531_v55  ;;  %v6831_v55 = vld [vmem:[%s9795_s3 + $0x88] sm:$0xff]  ;;  %vm2300_vm3 = vcmask 949248  }
 0x133   : > { %v720_v60 = vmul.f32 %v716_v47, %v708_v56  ;;  %v731_v9 = vadd.f32 %v724_v4, %v719_v6  ;;  %v6816_v6 = vld [vmem:[%s9795_s3 + $0x50] sm:$0xff] }
 0x134   : > { %v709_v61 = vsel %vm689_vm5, %v684_v43, %v6801_v59  ;;  %vm2558_vm5 = vcmask 932864  }
 0x135   : > { %v732_v0 = vadd.f32 %v728_v58, %v720_v60  ;;  %v721_v1 = vmul.f32 %v716_v47, %v709_v61 }
 0x137   : > { %747 = vrot.lane.b32.xlu1 %v732_v0, %s7568_s15  ;;  %v733_v7 = vadd.f32 %v728_v58, %v721_v1  ;;  %v6814_v58 = vld [vmem:[%s9795_s3 + $0x40] sm:$0xff] }
 0x139   : > { %749 = vrot.lane.b32.xlu0 %v733_v7, %s7568_s15  ;;  %v6832_v7 = vld [vmem:[%s9795_s3 + $0x90] sm:$0xff] }
 0x13b   : > { %743 = vrot.lane.b32.xlu1 %v730_v8, %s7568_s15 }
 0x13d   : > { %745 = vrot.lane.b32.xlu0 %v731_v9, %s7568_s15  ;;  %s7584_s15 = smov 112  }
 0x1a9   : > { %v748_v10 = vpop.permute.xlu1 %747 }
 0x1aa   : > { %761 = vst.msk [vmem:[#allocation2 + $0x10] sm:$0xff] %vm757_vm6, %v748_v10 }
 0x1ab   : > { %v750_v11 = vpop.permute.xlu0 %749 }
 0x1ac   : > { %v752_v12 = vsel %vm525_vm0, %v748_v10, %v750_v11  ;;  %v6817_v11 = vld [vmem:[%s9795_s3 + $0x58] sm:$0xff] }
 0x1ad   : > { %v744_v13 = vpop.permute.xlu1 %743  ;;  %762 = vst.msk [vmem:[#allocation2 + $0x18] sm:$0xff] %vm759_vm7, %v752_v12  ;;  %v6833_v12 = vld [vmem:[%s9795_s3 + $0x98] sm:$0xff] }
 0x1ae   : > { %758 = vst.msk [vmem:[#allocation2] sm:$0xff] %vm757_vm6, %v744_v13  ;;  %vm2429_vm6 = vcmask 941056  }
 0x1af   : > { %v746_v15 = vpop.permute.xlu0 %745 }
 0x1b0   : > { %v751_v17 = vsel %vm525_vm0, %v744_v13, %v746_v15 }
 0x1b1   : > { %v7800_v16 = vld [vmem:[#allocation2 + $0x10] sm:$0xff]  ;;  %760 = vst.msk [vmem:[#allocation2 + $0x8] sm:$0xff] %vm759_vm7, %v751_v17  ;;  %v6822_v17 = vld [vmem:[%s9795_s3 + $0x60] sm:$0xff]  ;;  %vm2816_vm7 = vcmask 916480  }
 0x1b2   : > { %784 = vrot.lane.b32.xlu1 %v7800_v16, %s7569_s16 }
 0x1b4   : > { %v7805_v18 = vld [vmem:[#allocation2 + $0x18] sm:$0xff] }
 0x1b5   : > { %v7807_v19 = vld [vmem:[#allocation2] sm:$0xff]  ;;  %786 = vrot.lane.b32.xlu0 %v7805_v18, %s7569_s16 }
 0x1b6   : > { %780 = vrot.lane.b32.xlu1 %v7807_v19, %s7569_s16 }
 0x1b8   : > { %v7813_v20 = vld [vmem:[#allocation2 + $0x8] sm:$0xff] }
 0x1b9   : > { %782 = vrot.lane.b32.xlu0 %v7813_v20, %s7569_s16 }
 0x1ba   : > { %1006 = vrot.lane.b32.xlu1 %v7800_v16, %s7570_s17 }
 0x1bd   : > { %1008 = vrot.lane.b32.xlu0 %v7805_v18, %s7570_s17 }
 0x1be   : > { %1002 = vrot.lane.b32.xlu1 %v7807_v19, %s7570_s17 }
 0x1c1   : > { %1004 = vrot.lane.b32.xlu0 %v7813_v20, %s7570_s17 }
 0x1c2   : > { %1135 = vrot.lane.b32.xlu1 %v7800_v16, %s7571_s18 }
 0x1c5   : > { %1137 = vrot.lane.b32.xlu0 %v7805_v18, %s7571_s18 }
 0x1c6   : > { %1131 = vrot.lane.b32.xlu1 %v7807_v19, %s7571_s18 }
 0x1c9   : > { %1133 = vrot.lane.b32.xlu0 %v7813_v20, %s7571_s18 }
 0x1ca   : > { %1264 = vrot.lane.b32.xlu1 %v7800_v16, %s7572_s19 }
 0x1cd   : > { %1262 = vrot.lane.b32.xlu0 %v7813_v20, %s7572_s19 }
 0x1ce   : > { %1260 = vrot.lane.b32.xlu1 %v7807_v19, %s7572_s19 }
 0x1d1   : > { %1266 = vrot.lane.b32.xlu0 %v7805_v18, %s7572_s19  ;;  %s7595_s19 = smov 101  }
 0x1d2   : > { %1393 = vrot.lane.b32.xlu1 %v7800_v16, %s7573_s20 }
 0x1d5   : > { %1395 = vrot.lane.b32.xlu0 %v7805_v18, %s7573_s20 }
 0x1d6   : > { %1389 = vrot.lane.b32.xlu1 %v7807_v19, %s7573_s20 }
 0x1d9   : > { %1391 = vrot.lane.b32.xlu0 %v7813_v20, %s7573_s20  ;;  %s7587_s20 = smov 109  }
 0x1da   : > { %1522 = vrot.lane.b32.xlu1 %v7800_v16, %s7574_s21 }
 0x1dd   : > { %1520 = vrot.lane.b32.xlu0 %v7813_v20, %s7574_s21 }
 0x1de   : > { %1518 = vrot.lane.b32.xlu1 %v7807_v19, %s7574_s21 }
 0x1e1   : > { %1524 = vrot.lane.b32.xlu0 %v7805_v18, %s7574_s21  ;;  %s7589_s21 = smov 107  }
 0x1e2   : > { %1651 = vrot.lane.b32.xlu1 %v7800_v16, %s7575_s22 }
 0x1e5   : > { %1653 = vrot.lane.b32.xlu0 %v7805_v18, %s7575_s22 }
 0x1e6   : > { %1647 = vrot.lane.b32.xlu1 %v7807_v19, %s7575_s22 }
 0x1e9   : > { %1649 = vrot.lane.b32.xlu0 %v7813_v20, %s7575_s22  ;;  %s7591_s22 = smov 105  }
 0x1ea   : > { %1780 = vrot.lane.b32.xlu1 %v7800_v16, %s7576_s23 }
 0x1ed   : > { %1778 = vrot.lane.b32.xlu0 %v7813_v20, %s7576_s23 }
 0x1ee   : > { %1776 = vrot.lane.b32.xlu1 %v7807_v19, %s7576_s23 }
 0x1f1   : > { %1782 = vrot.lane.b32.xlu0 %v7805_v18, %s7576_s23  ;;  %s7585_s23 = smov 111  }
 0x1f2   : > { %1909 = vrot.lane.b32.xlu1 %v7800_v16, %s7577_s24 }
 0x1f5   : > { %1911 = vrot.lane.b32.xlu0 %v7805_v18, %s7577_s24 }
 0x1f6   : > { %1905 = vrot.lane.b32.xlu1 %v7807_v19, %s7577_s24 }
 0x1f9   : > { %1907 = vrot.lane.b32.xlu0 %v7813_v20, %s7577_s24  ;;  %s7597_s24 = smov 99  }
 0x1fa   : > { %2038 = vrot.lane.b32.xlu1 %v7800_v16, %s7578_s25 }
 0x1fd   : > { %2036 = vrot.lane.b32.xlu0 %v7813_v20, %s7578_s25 }
 0x1fe   : > { %2034 = vrot.lane.b32.xlu1 %v7807_v19, %s7578_s25 }
 0x201   : > { %2040 = vrot.lane.b32.xlu0 %v7805_v18, %s7578_s25  ;;  %s7600_s25 = smov 2  }
 0x202   : > { %2167 = vrot.lane.b32.xlu1 %v7800_v16, %s7579_s26 }
 0x205   : > { %2169 = vrot.lane.b32.xlu0 %v7805_v18, %s7579_s26 }
 0x206   : > { %2163 = vrot.lane.b32.xlu1 %v7807_v19, %s7579_s26 }
 0x209   : > { %2165 = vrot.lane.b32.xlu0 %v7813_v20, %s7579_s26 }
 0x20a   : > { %2296 = vrot.lane.b32.xlu1 %v7800_v16, %s7580_s29 }
 0x20d   : > { %2294 = vrot.lane.b32.xlu0 %v7813_v20, %s7580_s29 }
 0x20e   : > { %2292 = vrot.lane.b32.xlu1 %v7807_v19, %s7580_s29 }
 0x211   : > { %2298 = vrot.lane.b32.xlu0 %v7805_v18, %s7580_s29  ;;  %s7593_s29 = smov 103  }
 0x212   : > { %2425 = vrot.lane.b32.xlu1 %v7800_v16, %s7581_s30 }
 0x215   : > { %2427 = vrot.lane.b32.xlu0 %v7805_v18, %s7581_s30 }
 0x216   : > { %2421 = vrot.lane.b32.xlu1 %v7807_v19, %s7581_s30 }
 0x219   : > { %2423 = vrot.lane.b32.xlu0 %v7813_v20, %s7581_s30  ;;  %s7586_s30 = smov 110  }
 0x21a   : > { %2554 = vrot.lane.b32.xlu1 %v7800_v16, %s7582_s12 }
 0x21d   : > { %2552 = vrot.lane.b32.xlu0 %v7813_v20, %s7582_s12 }
 0x21e   : > { %2550 = vrot.lane.b32.xlu1 %v7807_v19, %s7582_s12 }
 0x221   : > { %2556 = vrot.lane.b32.xlu0 %v7805_v18, %s7582_s12  ;;  %s7588_s12 = smov 108  }
 0x222   : > { %2683 = vrot.lane.b32.xlu1 %v7800_v16, %s7583_s14 }
 0x224   : > { %v785_v21 = vpop.permute.xlu1 %784 }
 0x225   : > { %2685 = vrot.lane.b32.xlu0 %v7805_v18, %s7583_s14 }
 0x226   : > { %2679 = vrot.lane.b32.xlu1 %v7807_v19, %s7583_s14 }
 0x227   : > { %v787_v22 = vpop.permute.xlu0 %786 }
 0x228   : > { %v781_v23 = vpop.permute.xlu1 %780  ;;  %835 = vmatprep.subr.mxu1 %v787_v22  ;;  %v790_v24 = vsel %vm788_vm8, %v785_v21, %v787_v22 }
 0x229   : > { %2681 = vrot.lane.b32.xlu0 %v7813_v20, %s7583_s14  ;;  %836 = vmatpush1.msra.mxu1 %v790_v24  ;;  %s7590_s14 = smov 106   ;;  %v6823_v24 = vld [vmem:[%s9795_s3 + $0x68] sm:$0xff] }
 0x22a   : > { %2812 = vrot.lane.b32.xlu1 %v7800_v16, %s7584_s15 }
 0x22b   : > { %v783_v25 = vpop.permute.xlu0 %782 }
 0x22c   : > { %v1007_v26 = vpop.permute.xlu1 %1006  ;;  %837 = vmatprep.subr.mxu1 %v783_v25  ;;  %v789_v28 = vsel %vm788_vm8, %v781_v23, %v783_v25  ;;  %vm2687_vm8 = vcmask 924672  }
 0x22d   : > { %2810 = vrot.lane.b32.xlu0 %v7813_v20, %s7584_s15  ;;  %838 = vmatpush1.msra.mxu1 %v789_v28 }
 0x22e   : > { %2808 = vrot.lane.b32.xlu1 %v7807_v19, %s7584_s15  ;;  %6806 = vmatmul.mubr.msk.f32.vlgmr.msra.gmra.mxu1 %vm525_vm0, %v6802_v27 }
 0x22f   : > { %936 = vmatprep.subr.mxu1 %v7805_v18  ;;  %v1009_v29 = vpop.permute.xlu0 %1008  ;;  %877 = vmatprep.mubr.f32.mxu1 %v9810_v2 }
 0x230   : > { %v1003_v30 = vpop.permute.xlu1 %1002  ;;  %937 = vmatpush1.msra.mxu1 %v7800_v16  ;;  %v1012_v41 = vsel %vm1010_vm9, %v1007_v26, %v1009_v29  ;;  %v6846_v26 = vld [vmem:[%s9795_s3 + $0xc0] sm:$0xff] }
 0x231   : > { %938 = vmatprep.subr.mxu1 %v7813_v20  ;;  %2814 = vrot.lane.b32.xlu0 %v7805_v18, %s7584_s15  ;;  %s7592_s15 = smov 104  }
 0x232   : > { %939 = vmatpush1.msra.mxu1 %v7807_v19  ;;  %2941 = vrot.lane.b32.xlu1 %v7800_v16, %s7585_s23 }
 0x233   : > { %6807 = vmatmul.mubr.msk.f32.gmra.mxu1 %vm525_vm0, %v6803_v31  ;;  %1057 = vmatprep.subr.mxu1 %v1009_v29  ;;  %v1005_v32 = vpop.permute.xlu0 %1004 }
 0x234   : > { %v7899_v33 = vpop.permute.xlu1 %1135  ;;  %883 = vmatprep.mubr.f32.mxu1 %v9810_v2  ;;  %v1011_v45 = vsel %vm1010_vm9, %v1003_v30, %v1005_v32  ;;  %v6824_v30 = vld [vmem:[%s9795_s3 + $0x70] sm:$0xff]  ;;  %vm3074_vm9 = vcmask 900096  }
 0x235   : > { %2943 = vrot.lane.b32.xlu0 %v7805_v18, %s7585_s23 }
 0x236   : > { %2937 = vrot.lane.b32.xlu1 %v7807_v19, %s7585_s23 }
 0x237   : > { %6808 = vmatmul.mubr.msk.f32.gmra.mxu1 %vm525_vm0, %v6804_v34  ;;  %v7908_v35 = vpop.permute.xlu0 %1137  ;;  %v6847_v34 = vld [vmem:[%s9795_s3 + $0xc8] sm:$0xff] }
 0x238   : > { %v7910_v36 = vpop.permute.xlu1 %1131  ;;  %889 = vmatprep.mubr.f32.mxu1 %v9810_v2  ;;  %v1141_v59 = vsel %vm1139_vm11, %v7899_v33, %v7908_v35 }
 0x239   : > { %2939 = vrot.lane.b32.xlu0 %v7813_v20, %s7585_s23  ;;  %s7594_s23 = smov 102  }
 0x23a   : > { %3070 = vrot.lane.b32.xlu1 %v7800_v16, %s7586_s30 }
 0x23b   : > { %6809 = vmatmul.mubr.msk.f32.gmra.mxu1 %vm525_vm0, %v6805_v37  ;;  %v7919_v38 = vpop.permute.xlu0 %1133 }
 0x23c   : > { %v1265_v39 = vpop.permute.xlu1 %1264  ;;  %972 = vmatprep.mubr.f32.mxu1 %v9810_v2  ;;  %v1140_v63 = vsel %vm1139_vm11, %v7910_v36, %v7919_v38  ;;  %vm3332_vm11 = vcmask 883712  }
 0x23d   : > { %3068 = vrot.lane.b32.xlu0 %v7813_v20, %s7586_s30 }
 0x23e   : > { %3066 = vrot.lane.b32.xlu1 %v7807_v19, %s7586_s30 }
 0x23f   : > { %6810 = vmatmul.mubr.msk.f32.vlgmr.msra.gmra.mxu1 %vm525_vm0, %v763_v40  ;;  %v1263_v42 = vpop.permute.xlu0 %1262 }
 0x240   : > { %v1261_v43 = vpop.permute.xlu1 %1260  ;;  %1058 = vmatpush1.msra.mxu1 %v1012_v41  ;;  %978 = vmatprep.mubr.f32.mxu1 %v9810_v2 }
 0x241   : > { %1059 = vmatprep.subr.mxu1 %v1005_v32  ;;  %3072 = vrot.lane.b32.xlu0 %v7805_v18, %s7586_s30  ;;  %v1269_v51 = vsel %vm1268_vm10, %v1261_v43, %v1263_v42  ;;  %v6849_v43 = vld [vmem:[%s9795_s3 + $0xd8] sm:$0xff]  ;;  %s7596_s30 = smov 100  }
 0x242   : > { %1060 = vmatpush1.msra.mxu1 %v1011_v45  ;;  %3199 = vrot.lane.b32.xlu1 %v7800_v16, %s7587_s20  ;;  %v6839_v45 = vld [vmem:[%s9795_s3 + $0xa8] sm:$0xff] }
 0x243   : > { %1186 = vmatprep.subr.mxu1 %v7908_v35  ;;  %6811 = vmatmul.mubr.msk.f32.gmra.mxu1 %vm525_vm0, %v764_v44  ;;  %v1267_v46 = vpop.permute.xlu0 %1266  ;;  %v6825_v35 = vld [vmem:[%s9795_s3 + $0x78] sm:$0xff] }
 0x244   : > { %v7936_v47 = vpop.permute.xlu1 %1393  ;;  %1315 = vmatprep.subr.mxu0 %v1267_v46  ;;  %984 = vmatprep.mubr.f32.mxu1 %v9810_v2  ;;  %v1270_v48 = vsel %vm1268_vm10, %v1265_v39, %v1267_v46  ;;  %v6838_v39 = vld [vmem:[%s9795_s3 + $0xa0] sm:$0xff]  ;;  %vm2945_vm10 = vcmask 908288  }
 0x245   : > { %3201 = vrot.lane.b32.xlu0 %v7805_v18, %s7587_s20  ;;  %1316 = vmatpush1.msra.mxu0 %v1270_v48  ;;  %v6862_v48 = vld [vmem:[%s9795_s3 + $0x100] sm:$0xff] }
 0x246   : > { %3195 = vrot.lane.b32.xlu1 %v7807_v19, %s7587_s20  ;;  %1317 = vmatprep.subr.mxu0 %v1263_v42 }
 0x247   : > { %6812 = vmatmul.mubr.msk.f32.gmra.mxu1 %vm525_vm0, %v765_v49  ;;  %v7948_v52 = vpop.permute.xlu0 %1395  ;;  %1318 = vmatpush1.msra.mxu0 %v1269_v51 }
 0x248   : > { %v7950_v53 = vpop.permute.xlu1 %1389  ;;  %990 = vmatprep.mubr.f32.mxu1 %v9810_v2  ;;  %6834 = vmatmul.mubr.msk.f32.vlgmr.msra.gmra.mxu0 %vm525_vm0, %v6830_v50  ;;  %v1399_v21 = vsel %vm1397_vm13, %v7936_v47, %v7948_v52  ;;  %v6840_v50 = vld [vmem:[%s9795_s3 + $0xb0] sm:$0xff] }
 0x249   : > { %3197 = vrot.lane.b32.xlu0 %v7813_v20, %s7587_s20  ;;  %1357 = vmatprep.mubr.f32.mxu0 %v9810_v2  ;;  %s7598_s20 = smov 98  }
 0x24a   : > { %3328 = vrot.lane.b32.xlu1 %v7800_v16, %s7588_s12 }
 0x24b   : > { %6813 = vmatmul.mubr.msk.f32.gmra.mxu1 %vm525_vm0, %v766_v54  ;;  %v7964_v56 = vpop.permute.xlu0 %1391  ;;  %v6863_v54 = vld [vmem:[%s9795_s3 + $0x108] sm:$0xff] }
 0x24c   : > { %v1523_v57 = vpop.permute.xlu1 %1522  ;;  %1093 = vmatprep.mubr.f32.mxu1 %v9810_v2  ;;  %6835 = vmatmul.mubr.msk.f32.gmra.mxu0 %vm525_vm0, %v6831_v55  ;;  %v1398_v25 = vsel %vm1397_vm13, %v7950_v53, %v7964_v56  ;;  %v6841_v55 = vld [vmem:[%s9795_s3 + $0xb8] sm:$0xff]  ;;  %vm3590_vm13 = vcmask 867328  }
 0x24d   : > { %3326 = vrot.lane.b32.xlu0 %v7813_v20, %s7588_s12  ;;  %1363 = vmatprep.mubr.f32.mxu0 %v9810_v2 }
 0x24e   : > { %3324 = vrot.lane.b32.xlu1 %v7807_v19, %s7588_s12 }
 0x24f   : > { %6818 = vmatmul.mubr.msk.f32.vlgmr.msra.gmra.mxu1 %vm525_vm0, %v6814_v58  ;;  %v1521_v60 = vpop.permute.xlu0 %1520  ;;  %v6864_v58 = vld [vmem:[%s9795_s3 + $0x110] sm:$0xff] }
 0x250   : > { %v1519_v61 = vpop.permute.xlu1 %1518  ;;  %1187 = vmatpush1.msra.mxu1 %v1141_v59  ;;  %1099 = vmatprep.mubr.f32.mxu1 %v9810_v2  ;;  %v6854_v59 = vld [vmem:[%s9795_s3 + $0xe0] sm:$0xff] }
 0x251   : > { %1188 = vmatprep.subr.mxu1 %v7919_v38  ;;  %3330 = vrot.lane.b32.xlu0 %v7805_v18, %s7588_s12  ;;  %v1527_v8 = vsel %vm1526_vm12, %v1519_v61, %v1521_v60  ;;  %v6848_v38 = vld [vmem:[%s9795_s3 + $0xd0] sm:$0xff]  ;;  %s7599_s12 = smov 97  }
 0x252   : > { %1189 = vmatpush1.msra.mxu1 %v1140_v63  ;;  %3457 = vrot.lane.b32.xlu1 %v7800_v16, %s7589_s21  ;;  %v6865_v63 = vld [vmem:[%s9795_s3 + $0x118] sm:$0xff] }
 0x253   : > { %1444 = vmatprep.subr.mxu1 %v7948_v52  ;;  %6819 = vmatmul.mubr.msk.f32.gmra.mxu1 %vm525_vm0, %v6815_v62  ;;  %v1525_v0 = vpop.permute.xlu0 %1524 }
 0x254   : > { %v7988_v1 = vpop.permute.xlu1 %1651  ;;  %1573 = vmatprep.subr.mxu0 %v1525_v0  ;;  %1105 = vmatprep.mubr.f32.mxu1 %v9810_v2  ;;  %v1528_v4 = vsel %vm1526_vm12, %v1523_v57, %v1525_v0  ;;  %vm3203_vm12 = vcmask 891904  }
 0x255   : > { %3459 = vrot.lane.b32.xlu0 %v7805_v18, %s7589_s21  ;;  %1574 = vmatpush1.msra.mxu0 %v1528_v4 }
 0x256   : > { %3453 = vrot.lane.b32.xlu1 %v7807_v19, %s7589_s21  ;;  %1575 = vmatprep.subr.mxu0 %v1521_v60 }
 0x257   : > { %6820 = vmatmul.mubr.msk.f32.gmra.mxu1 %vm525_vm0, %v6816_v6  ;;  %v8000_v9 = vpop.permute.xlu0 %1653  ;;  %1576 = vmatpush1.msra.mxu0 %v1527_v8 }
 0x258   : > { %v8002_v10 = vpop.permute.xlu1 %1647  ;;  %1111 = vmatprep.mubr.f32.mxu1 %v9810_v2  ;;  %6836 = vmatmul.mubr.msk.f32.gmra.mxu0 %vm525_vm0, %v6832_v7  ;;  %v1657_v40 = vsel %vm1655_vm15, %v7988_v1, %v8000_v9  ;;  %v6855_v1 = vld [vmem:[%s9795_s3 + $0xe8] sm:$0xff]  ;;  %v6878_v7 = vld [vmem:[%s9795_s3 + $0x140] sm:$0xff] }
 0x259   : > { %3455 = vrot.lane.b32.xlu0 %v7813_v20, %s7589_s21  ;;  %1369 = vmatprep.mubr.f32.mxu0 %v9810_v2 }
 0x25a   : > { %3586 = vrot.lane.b32.xlu1 %v7800_v16, %s7590_s14 }
 0x25b   : > { %6821 = vmatmul.mubr.msk.f32.gmra.mxu1 %vm525_vm0, %v6817_v11  ;;  %v8016_v13 = vpop.permute.xlu0 %1649 }
 0x25c   : > { %v1781_v15 = vpop.permute.xlu1 %1780  ;;  %1222 = vmatprep.mubr.f32.mxu1 %v9810_v2  ;;  %6837 = vmatmul.mubr.msk.f32.gmra.mxu0 %vm525_vm0, %v6833_v12  ;;  %v1656_v44 = vsel %vm1655_vm15, %v8002_v10, %v8016_v13  ;;  %vm3848_vm15 = vcmask 850944  }
 0x25d   : > { %3584 = vrot.lane.b32.xlu0 %v7813_v20, %s7590_s14  ;;  %1609 = vmatprep.mubr.f32.mxu0 %v9810_v2 }
 0x25e   : > { %3582 = vrot.lane.b32.xlu1 %v7807_v19, %s7590_s14 }
 0x25f   : > { %6826 = vmatmul.mubr.msk.f32.vlgmr.msra.gmra.mxu1 %vm525_vm0, %v6822_v17  ;;  %v1779_v22 = vpop.permute.xlu0 %1778 }
 0x260   : > { %v1777_v23 = vpop.permute.xlu1 %1776  ;;  %1445 = vmatpush1.msra.mxu1 %v1399_v21  ;;  %1228 = vmatprep.mubr.f32.mxu1 %v9810_v2 }
 0x261   : > { %1446 = vmatprep.subr.mxu1 %v7964_v56  ;;  %3588 = vrot.lane.b32.xlu0 %v7805_v18, %s7590_s14  ;;  %v1785_v31 = vsel %vm1784_vm14, %v1777_v23, %v1779_v22  ;;  %v6870_v23 = vld [vmem:[%s9795_s3 + $0x120] sm:$0xff] }
 0x262   : > { %1447 = vmatpush1.msra.mxu1 %v1398_v25  ;;  %3715 = vrot.lane.b32.xlu1 %v7800_v16, %s7591_s22 }
 0x263   : > { %1702 = vmatprep.subr.mxu1 %v8000_v9  ;;  %6827 = vmatmul.mubr.msk.f32.gmra.mxu1 %vm525_vm0, %v6823_v24  ;;  %v1783_v27 = vpop.permute.xlu0 %1782  ;;  %v6856_v9 = vld [vmem:[%s9795_s3 + $0xf0] sm:$0xff] }
 0x264   : > { %v8043_v28 = vpop.permute.xlu1 %1909  ;;  %1831 = vmatprep.subr.mxu0 %v1783_v27  ;;  %1234 = vmatprep.mubr.f32.mxu1 %v9810_v2  ;;  %v1786_v29 = vsel %vm1784_vm14, %v1781_v15, %v1783_v27  ;;  %v6857_v15 = vld [vmem:[%s9795_s3 + $0xf8] sm:$0xff]  ;;  %vm3461_vm14 = vcmask 875520  }
 0x265   : > { %3717 = vrot.lane.b32.xlu0 %v7805_v18, %s7591_s22  ;;  %6850 = vmatmul.mubr.msk.f32.vlgmr.msra.gmra.mxu0 %vm525_vm0, %v6846_v26  ;;  %v6881_v27 = vld [vmem:[%s9795_s3 + $0x158] sm:$0xff] }
 0x266   : > { %1832 = vmatpush1.msra.mxu0 %v1786_v29  ;;  %3711 = vrot.lane.b32.xlu1 %v7807_v19, %s7591_s22  ;;  %v6871_v29 = vld [vmem:[%s9795_s3 + $0x128] sm:$0xff] }
 0x267   : > { %6828 = vmatmul.mubr.msk.f32.gmra.mxu1 %vm525_vm0, %v6824_v30  ;;  %1833 = vmatprep.subr.mxu0 %v1779_v22  ;;  %v8053_v32 = vpop.permute.xlu0 %1911  ;;  %v6880_v22 = vld [vmem:[%s9795_s3 + $0x150] sm:$0xff] }
 0x268   : > { %v8055_v33 = vpop.permute.xlu1 %1905  ;;  %1834 = vmatpush1.msra.mxu0 %v1785_v31  ;;  %1615 = vmatprep.mubr.f32.mxu0 %v9810_v2  ;;  %v1915_v62 = vsel %vm1913_vm2, %v8043_v28, %v8053_v32 }
 0x269   : > { %3713 = vrot.lane.b32.xlu0 %v7813_v20, %s7591_s22  ;;  %1240 = vmatprep.mubr.f32.mxu1 %v9810_v2  ;;  %s438_s22 = scalar_lea.vmem %s9805_s13, %s9852_s28 }
 0x26a   : > { %6851 = vmatmul.mubr.msk.f32.gmra.mxu0 %vm525_vm0, %v6847_v34  ;;  %3844 = vrot.lane.b32.xlu1 %v7800_v16, %s7592_s15  ;;  %v6872_v34 = vld [vmem:[%s9795_s3 + $0x130] sm:$0xff] }
 0x26b   : > { %6829 = vmatmul.mubr.msk.f32.gmra.mxu1 %vm525_vm0, %v6825_v35  ;;  %v8069_v36 = vpop.permute.xlu0 %1907  ;;  %1621 = vmatprep.mubr.f32.mxu0 %v9810_v2 }
 0x26c   : > { %v2039_v37 = vpop.permute.xlu1 %2038  ;;  %1480 = vmatprep.mubr.f32.mxu1 %v9810_v2  ;;  %v1914_v0 = vsel %vm1913_vm2, %v8055_v33, %v8069_v36  ;;  %vm4106_vm2 = vcmask 834560  }
 0x26d   : > { %3842 = vrot.lane.b32.xlu0 %v7813_v20, %s7592_s15 }
 0x26e   : > { %6852 = vmatmul.mubr.msk.f32.gmra.mxu0 %vm525_vm0, %v6848_v38  ;;  %3840 = vrot.lane.b32.xlu1 %v7807_v19, %s7592_s15  ;;  %v6895_v38 = vld [vmem:[%s9795_s3 + $0x188] sm:$0xff] }
 0x26f   : > { %6842 = vmatmul.mubr.msk.f32.vlgmr.msra.gmra.mxu1 %vm525_vm0, %v6838_v39  ;;  %v2037_v41 = vpop.permute.xlu0 %2036  ;;  %1627 = vmatprep.mubr.f32.mxu0 %v9810_v2  ;;  %v6873_v39 = vld [vmem:[%s9795_s3 + $0x138] sm:$0xff] }
 0x270   : > { %v2035_v42 = vpop.permute.xlu1 %2034  ;;  %1703 = vmatpush1.msra.mxu1 %v1657_v40  ;;  %1486 = vmatprep.mubr.f32.mxu1 %v9810_v2 }
 0x271   : > { %1704 = vmatprep.subr.mxu1 %v8016_v13  ;;  %3846 = vrot.lane.b32.xlu0 %v7805_v18, %s7592_s15  ;;  %v2043_v53 = vsel %vm2042_vm1, %v2035_v42, %v2037_v41  ;;  %v6879_v13 = vld [vmem:[%s9795_s3 + $0x148] sm:$0xff]  ;;  %v6896_v42 = vld [vmem:[%s9795_s3 + $0x190] sm:$0xff] }
 0x272   : > { %1705 = vmatpush1.msra.mxu1 %v1656_v44  ;;  %6853 = vmatmul.mubr.msk.f32.gmra.mxu0 %vm525_vm0, %v6849_v43  ;;  %v6886_v43 = vld [vmem:[%s9795_s3 + $0x160] sm:$0xff] }
 0x273   : > { %1960 = vmatprep.subr.mxu1 %v8053_v32  ;;  %3973 = vrot.lane.b32.xlu1 %v7800_v16, %s7593_s29  ;;  %v2041_v46 = vpop.permute.xlu0 %2040  ;;  %v6894_v32 = vld [vmem:[%s9795_s3 + $0x180] sm:$0xff] }
 0x274   : > { %v8100_v47 = vpop.permute.xlu1 %2167  ;;  %6843 = vmatmul.mubr.msk.f32.gmra.mxu1 %vm525_vm0, %v6839_v45  ;;  %1867 = vmatprep.mubr.f32.mxu0 %v9810_v2  ;;  %v2044_v49 = vsel %vm2042_vm1, %v2039_v37, %v2041_v46  ;;  %vm3719_vm1 = vcmask 859136  }
 0x275   : > { %2089 = vmatprep.subr.mxu0 %v2041_v46  ;;  %3975 = vrot.lane.b32.xlu0 %v7805_v18, %s7593_s29 }
 0x276   : > { %1492 = vmatprep.mubr.f32.mxu1 %v9810_v2  ;;  %6866 = vmatmul.mubr.msk.f32.vlgmr.msra.gmra.mxu0 %vm525_vm0, %v6862_v48 }
 0x277   : > { %2090 = vmatpush1.msra.mxu0 %v2044_v49  ;;  %3969 = vrot.lane.b32.xlu1 %v7807_v19, %s7593_s29  ;;  %v8115_v51 = vpop.permute.xlu0 %2169 }
 0x278   : > { %v8117_v52 = vpop.permute.xlu1 %2163  ;;  %6844 = vmatmul.mubr.msk.f32.gmra.mxu1 %vm525_vm0, %v6840_v50  ;;  %2091 = vmatprep.subr.mxu0 %v2037_v41  ;;  %v2173_v26 = vsel %vm2171_vm4, %v8100_v47, %v8115_v51  ;;  %v6897_v47 = vld [vmem:[%s9795_s3 + $0x198] sm:$0xff]  ;;  %v6887_v50 = vld [vmem:[%s9795_s3 + $0x168] sm:$0xff] }
 0x279   : > { %2092 = vmatpush1.msra.mxu0 %v2043_v53  ;;  %1873 = vmatprep.mubr.f32.mxu0 %v9810_v2 }
 0x27a   : > { %3971 = vrot.lane.b32.xlu0 %v7813_v20, %s7593_s29  ;;  %1498 = vmatprep.mubr.f32.mxu1 %v9810_v2 }
 0x27b   : > { %6867 = vmatmul.mubr.msk.f32.gmra.mxu0 %vm525_vm0, %v6863_v54  ;;  %4102 = vrot.lane.b32.xlu1 %v7800_v16, %s7594_s23  ;;  %v8132_v56 = vpop.permute.xlu0 %2165 }
 0x27c   : > { %v2297_v57 = vpop.permute.xlu1 %2296  ;;  %6845 = vmatmul.mubr.msk.f32.gmra.mxu1 %vm525_vm0, %v6841_v55  ;;  %1879 = vmatprep.mubr.f32.mxu0 %v9810_v2  ;;  %v2172_v28 = vsel %vm2171_vm4, %v8117_v52, %v8132_v56  ;;  %v6910_v52 = vld [vmem:[%s9795_s3 + $0x1c0] sm:$0xff]  ;;  %v6888_v55 = vld [vmem:[%s9795_s3 + $0x170] sm:$0xff]  ;;  %vm4364_vm4 = vcmask 818176  }
 0x27d   : > { %1738 = vmatprep.mubr.f32.mxu1 %v9810_v2 }
 0x27e   : > { %4100 = vrot.lane.b32.xlu0 %v7813_v20, %s7594_s23 }
 0x27f   : > { %6868 = vmatmul.mubr.msk.f32.gmra.mxu0 %vm525_vm0, %v6864_v58  ;;  %4098 = vrot.lane.b32.xlu1 %v7807_v19, %s7594_s23  ;;  %v2295_v60 = vpop.permute.xlu0 %2294  ;;  %v6889_v58 = vld [vmem:[%s9795_s3 + $0x178] sm:$0xff] }
 0x280   : > { %v2293_v61 = vpop.permute.xlu1 %2292  ;;  %6858 = vmatmul.mubr.msk.f32.vlgmr.msra.gmra.mxu1 %vm525_vm0, %v6854_v59  ;;  %1885 = vmatprep.mubr.f32.mxu0 %v9810_v2 }
 0x281   : > { %1961 = vmatpush1.msra.mxu1 %v1915_v62  ;;  %1744 = vmatprep.mubr.f32.mxu1 %v9810_v2  ;;  %v2301_v12 = vsel %vm2300_vm3, %v2293_v61, %v2295_v60 }
 0x282   : > { %1962 = vmatprep.subr.mxu1 %v8069_v36  ;;  %4104 = vrot.lane.b32.xlu0 %v7805_v18, %s7594_s23 }
 0x283   : > { %1963 = vmatpush1.msra.mxu1 %v1914_v0  ;;  %6869 = vmatmul.mubr.msk.f32.gmra.mxu0 %vm525_vm0, %v6865_v63  ;;  %v2299_v4 = vpop.permute.xlu0 %2298  ;;  %v6913_v63 = vld [vmem:[%s9795_s3 + $0x1d8] sm:$0xff] }
 0x284   : > { %v8162_v6 = vpop.permute.xlu1 %2425  ;;  %2218 = vmatprep.subr.mxu1 %v8115_v51  ;;  %4231 = vrot.lane.b32.xlu1 %v7800_v16, %s7595_s19  ;;  %v2302_v8 = vsel %vm2300_vm3, %v2297_v57, %v2299_v4  ;;  %vm3977_vm3 = vcmask 842752  }
 0x285   : > { %6859 = vmatmul.mubr.msk.f32.gmra.mxu1 %vm525_vm0, %v6855_v1  ;;  %2125 = vmatprep.mubr.f32.mxu0 %v9810_v2  ;;  %v6903_v1 = vld [vmem:[%s9795_s3 + $0x1a8] sm:$0xff] }
 0x286   : > { %2347 = vmatprep.subr.mxu0 %v2299_v4  ;;  %4233 = vrot.lane.b32.xlu0 %v7805_v18, %s7595_s19 }
 0x287   : > { %1750 = vmatprep.mubr.f32.mxu1 %v9810_v2  ;;  %6882 = vmatmul.mubr.msk.f32.vlgmr.msra.gmra.mxu0 %vm525_vm0, %v6878_v7  ;;  %v8178_v10 = vpop.permute.xlu0 %2427  ;;  %v6926_v7 = vld [vmem:[%s9795_s3 + $0x200] sm:$0xff] }
 0x288   : > { %v8180_v11 = vpop.permute.xlu1 %2421  ;;  %2348 = vmatpush1.msra.mxu0 %v2302_v8  ;;  %4227 = vrot.lane.b32.xlu1 %v7807_v19, %s7595_s19  ;;  %v2431_v46 = vsel %vm2429_vm6, %v8162_v6, %v8178_v10 }
 0x289   : > { %6860 = vmatmul.mubr.msk.f32.gmra.mxu1 %vm525_vm0, %v6856_v9  ;;  %2349 = vmatprep.subr.mxu0 %v2295_v60 }
 0x28a   : > { %2350 = vmatpush1.msra.mxu0 %v2301_v12  ;;  %2131 = vmatprep.mubr.f32.mxu0 %v9810_v2  ;;  %v6927_v12 = vld [vmem:[%s9795_s3 + $0x208] sm:$0xff] }
 0x28b   : > { %4229 = vrot.lane.b32.xlu0 %v7813_v20, %s7595_s19  ;;  %1756 = vmatprep.mubr.f32.mxu1 %v9810_v2  ;;  %v8194_v17 = vpop.permute.xlu0 %2423 }
 0x28c   : > { %v2555_v21 = vpop.permute.xlu1 %2554  ;;  %6883 = vmatmul.mubr.msk.f32.gmra.mxu0 %vm525_vm0, %v6879_v13  ;;  %4360 = vrot.lane.b32.xlu1 %v7800_v16, %s7596_s30  ;;  %v2430_v49 = vsel %vm2429_vm6, %v8180_v11, %v8194_v17  ;;  %vm4622_vm6 = vcmask 801792  }
 0x28d   : > { %6861 = vmatmul.mubr.msk.f32.gmra.mxu1 %vm525_vm0, %v6857_v15  ;;  %2137 = vmatprep.mubr.f32.mxu0 %v9810_v2 }
 0x28e   : > { %1996 = vmatprep.mubr.f32.mxu1 %v9810_v2 }
 0x28f   : > { %4358 = vrot.lane.b32.xlu0 %v7813_v20, %s7596_s30  ;;  %v2553_v24 = vpop.permute.xlu0 %2552 }
 0x290   : > { %v2551_v25 = vpop.permute.xlu1 %2550  ;;  %6884 = vmatmul.mubr.msk.f32.gmra.mxu0 %vm525_vm0, %v6880_v22  ;;  %4356 = vrot.lane.b32.xlu1 %v7807_v19, %s7596_s30  ;;  %v6928_v22 = vld [vmem:[%s9795_s3 + $0x210] sm:$0xff] }
 0x291   : > { %6874 = vmatmul.mubr.msk.f32.vlgmr.msra.gmra.mxu1 %vm525_vm0, %v6870_v23  ;;  %2143 = vmatprep.mubr.f32.mxu0 %v9810_v2  ;;  %v2559_v37 = vsel %vm2558_vm5, %v2551_v25, %v2553_v24 }
 0x292   : > { %2219 = vmatpush1.msra.mxu1 %v2173_v26  ;;  %2002 = vmatprep.mubr.f32.mxu1 %v9810_v2 }
 0x293   : > { %2220 = vmatprep.subr.mxu1 %v8132_v56  ;;  %4362 = vrot.lane.b32.xlu0 %v7805_v18, %s7596_s30  ;;  %v2557_v30 = vpop.permute.xlu0 %2556 }
 0x294   : > { %v8225_v31 = vpop.permute.xlu1 %2683  ;;  %2221 = vmatpush1.msra.mxu1 %v2172_v28  ;;  %6885 = vmatmul.mubr.msk.f32.gmra.mxu0 %vm525_vm0, %v6881_v27  ;;  %v2560_v33 = vsel %vm2558_vm5, %v2555_v21, %v2557_v30  ;;  %v6929_v27 = vld [vmem:[%s9795_s3 + $0x218] sm:$0xff]  ;;  %vm4235_vm5 = vcmask 826368  }
 0x295   : > { %2476 = vmatprep.subr.mxu1 %v8178_v10  ;;  %4489 = vrot.lane.b32.xlu1 %v7800_v16, %s7597_s24  ;;  %v6904_v10 = vld [vmem:[%s9795_s3 + $0x1b0] sm:$0xff] }
 0x296   : > { %6875 = vmatmul.mubr.msk.f32.gmra.mxu1 %vm525_vm0, %v6871_v29  ;;  %2383 = vmatprep.mubr.f32.mxu0 %v9810_v2  ;;  %v6919_v29 = vld [vmem:[%s9795_s3 + $0x1e8] sm:$0xff] }
 0x297   : > { %2605 = vmatprep.subr.mxu0 %v2557_v30  ;;  %4491 = vrot.lane.b32.xlu0 %v7805_v18, %s7597_s24  ;;  %v8240_v35 = vpop.permute.xlu0 %2685 }
 0x298   : > { %v8242_v36 = vpop.permute.xlu1 %2679  ;;  %2008 = vmatprep.mubr.f32.mxu1 %v9810_v2  ;;  %6898 = vmatmul.mubr.msk.f32.vlgmr.msra.gmra.mxu0 %vm525_vm0, %v6894_v32  ;;  %v2689_v62 = vsel %vm2687_vm8, %v8225_v31, %v8240_v35  ;;  %v6942_v32 = vld [vmem:[%s9795_s3 + $0x240] sm:$0xff] }
 0x299   : > { %2606 = vmatpush1.msra.mxu0 %v2560_v33  ;;  %4485 = vrot.lane.b32.xlu1 %v7807_v19, %s7597_s24 }
 0x29a   : > { %6876 = vmatmul.mubr.msk.f32.gmra.mxu1 %vm525_vm0, %v6872_v34  ;;  %2607 = vmatprep.subr.mxu0 %v2553_v24  ;;  %v6918_v24 = vld [vmem:[%s9795_s3 + $0x1e0] sm:$0xff] }
 0x29b   : > { %2608 = vmatpush1.msra.mxu0 %v2559_v37  ;;  %2389 = vmatprep.mubr.f32.mxu0 %v9810_v2  ;;  %v8256_v40 = vpop.permute.xlu0 %2681  ;;  %v6943_v37 = vld [vmem:[%s9795_s3 + $0x248] sm:$0xff] }
 0x29c   : > { %4487 = vrot.lane.b32.xlu0 %v7813_v20, %s7597_s24  ;;  %2014 = vmatprep.mubr.f32.mxu1 %v9810_v2  ;;  %v2813_v41 = vpop.permute.xlu1 %2812  ;;  %v2688_v6 = vsel %vm2687_vm8, %v8242_v36, %v8256_v40  ;;  %vm4751_vm8 = vcmask 793600  }
 0x29d   : > { %6899 = vmatmul.mubr.msk.f32.gmra.mxu0 %vm525_vm0, %v6895_v38  ;;  %4618 = vrot.lane.b32.xlu1 %v7800_v16, %s7598_s20 }
 0x29e   : > { %6877 = vmatmul.mubr.msk.f32.gmra.mxu1 %vm525_vm0, %v6873_v39  ;;  %2395 = vmatprep.mubr.f32.mxu0 %v9810_v2 }
 0x29f   : > { %2254 = vmatprep.mubr.f32.mxu1 %v9810_v2  ;;  %v2811_v44 = vpop.permute.xlu0 %2810 }
 0x2a0   : > { %4616 = vrot.lane.b32.xlu0 %v7813_v20, %s7598_s20  ;;  %v2809_v45 = vpop.permute.xlu1 %2808 }
 0x2a1   : > { %6900 = vmatmul.mubr.msk.f32.gmra.mxu0 %vm525_vm0, %v6896_v42  ;;  %4614 = vrot.lane.b32.xlu1 %v7807_v19, %s7598_s20  ;;  %v2817_v56 = vsel %vm2816_vm7, %v2809_v45, %v2811_v44  ;;  %v6944_v42 = vld [vmem:[%s9795_s3 + $0x250] sm:$0xff] }
 0x2a2   : > { %6890 = vmatmul.mubr.msk.f32.vlgmr.msra.gmra.mxu1 %vm525_vm0, %v6886_v43  ;;  %2401 = vmatprep.mubr.f32.mxu0 %v9810_v2 }
 0x2a3   : > { %2477 = vmatpush1.msra.mxu1 %v2431_v46  ;;  %2260 = vmatprep.mubr.f32.mxu1 %v9810_v2  ;;  %v2815_v48 = vpop.permute.xlu0 %2814 }
 0x2a4   : > { %2478 = vmatprep.subr.mxu1 %v8194_v17  ;;  %4620 = vrot.lane.b32.xlu0 %v7805_v18, %s7598_s20  ;;  %v8289_v51 = vpop.permute.xlu1 %2941  ;;  %v2818_v53 = vsel %vm2816_vm7, %v2813_v41, %v2815_v48  ;;  %v6905_v17 = vld [vmem:[%s9795_s3 + $0x1b8] sm:$0xff]  ;;  %vm4493_vm7 = vcmask 809984  }
 0x2a5   : > { %2479 = vmatpush1.msra.mxu1 %v2430_v49  ;;  %6901 = vmatmul.mubr.msk.f32.gmra.mxu0 %vm525_vm0, %v6897_v47  ;;  %v6945_v47 = vld [vmem:[%s9795_s3 + $0x258] sm:$0xff]  ;;  %v6935_v49 = vld [vmem:[%s9795_s3 + $0x228] sm:$0xff] }
 0x2a6   : > { %2734 = vmatprep.subr.mxu1 %v8240_v35  ;;  %4747 = vrot.lane.b32.xlu1 %v7800_v16, %s7599_s12  ;;  %v6920_v35 = vld [vmem:[%s9795_s3 + $0x1f0] sm:$0xff] }
 0x2a7   : > { %6891 = vmatmul.mubr.msk.f32.gmra.mxu1 %vm525_vm0, %v6887_v50  ;;  %2641 = vmatprep.mubr.f32.mxu0 %v9810_v2  ;;  %v8300_v54 = vpop.permute.xlu0 %2943 }
 0x2a8   : > { %2863 = vmatprep.subr.mxu0 %v2815_v48  ;;  %4749 = vrot.lane.b32.xlu0 %v7805_v18, %s7599_s12  ;;  %v8306_v16 = vpop.permute.xlu1 %2937  ;;  %v6911_v18 = vld [vmem:[%s9795_s3 + $0x1c8] sm:$0xff]  ;;  %v2947_v26 = vsel %vm2945_vm10, %v8289_v51, %v8300_v54 }
 0x2a9   : > { %2266 = vmatprep.mubr.f32.mxu1 %v9810_v2  ;;  %6914 = vmatmul.mubr.msk.f32.vlgmr.msra.gmra.mxu0 %vm525_vm0, %v6910_v52  ;;  %v6958_v52 = vld [vmem:[%s9795_s3 + $0x280] sm:$0xff] }
 0x2aa   : > { %2864 = vmatpush1.msra.mxu0 %v2818_v53  ;;  %4743 = vrot.lane.b32.xlu1 %v7807_v19, %s7599_s12  ;;  %v6912_v19 = vld [vmem:[%s9795_s3 + $0x1d0] sm:$0xff] }
 0x2ab   : > { %6892 = vmatmul.mubr.msk.f32.gmra.mxu1 %vm525_vm0, %v6888_v55  ;;  %2865 = vmatprep.subr.mxu0 %v2811_v44  ;;  %v8316_v57 = vpop.permute.xlu0 %2939  ;;  %v6934_v44 = vld [vmem:[%s9795_s3 + $0x220] sm:$0xff]  ;;  %v6936_v55 = vld [vmem:[%s9795_s3 + $0x230] sm:$0xff] }
 0x2ac   : > { %2866 = vmatpush1.msra.mxu0 %v2817_v56  ;;  %2647 = vmatprep.mubr.f32.mxu0 %v9810_v2  ;;  %v3071_v59 = vpop.permute.xlu1 %3070  ;;  %v2946_v31 = vsel %vm2945_vm10, %v8306_v16, %v8316_v57  ;;  %v6959_v56 = vld [vmem:[%s9795_s3 + $0x288] sm:$0xff]  ;;  %vm4915_vm10 = vcmask 506880  }
 0x2ad   : > { %4745 = vrot.lane.b32.xlu0 %v7813_v20, %s7599_s12  ;;  %2272 = vmatprep.mubr.f32.mxu1 %v9810_v2  ;;  %v6902_v20 = vld [vmem:[%s9795_s3 + $0x1a0] sm:$0xff] }
 0x2ae   : > { %6915 = vmatmul.mubr.msk.f32.gmra.mxu0 %vm525_vm0, %v6911_v18 }
 0x2af   : > { %6893 = vmatmul.mubr.msk.f32.gmra.mxu1 %vm525_vm0, %v6889_v58  ;;  %2653 = vmatprep.mubr.f32.mxu0 %v9810_v2  ;;  %v3069_v60 = vpop.permute.xlu0 %3068  ;;  %v6937_v58 = vld [vmem:[%s9795_s3 + $0x238] sm:$0xff] }
 0x2b0   : > { %2512 = vmatprep.mubr.f32.mxu1 %v9810_v2  ;;  %v3067_v61 = vpop.permute.xlu1 %3066 }
 0x2b1   : > { %v3075_v15 = vsel %vm3074_vm9, %v3067_v61, %v3069_v60 }
 0x2b2   : > { %6916 = vmatmul.mubr.msk.f32.gmra.mxu0 %vm525_vm0, %v6912_v19  ;;  %v6960_v19 = vld [vmem:[%s9795_s3 + $0x290] sm:$0xff] }
 0x2b3   : > { %6906 = vmatmul.mubr.msk.f32.vlgmr.msra.gmra.mxu1 %vm525_vm0, %v6902_v20  ;;  %2659 = vmatprep.mubr.f32.mxu0 %v9810_v2  ;;  %v3073_v0 = vpop.permute.xlu0 %3072  ;;  %v6950_v20 = vld [vmem:[%s9795_s3 + $0x260] sm:$0xff] }
 0x2b4   : > { %2735 = vmatpush1.msra.mxu1 %v2689_v62  ;;  %2518 = vmatprep.mubr.f32.mxu1 %v9810_v2  ;;  %v8346_v4 = vpop.permute.xlu1 %3199  ;;  %v3076_v9 = vsel %vm3074_vm9, %v3071_v59, %v3073_v0  ;;  %vm4928_vm9 = vcmask 1045504  }
 0x2b5   : > { %2736 = vmatprep.subr.mxu1 %v8256_v40  ;;  %3121 = vmatprep.subr.mxu0 %v3073_v0  ;;  %v6921_v40 = vld [vmem:[%s9795_s3 + $0x1f8] sm:$0xff] }
 0x2b6   : > { %2737 = vmatpush1.msra.mxu1 %v2688_v6  ;;  %6917 = vmatmul.mubr.msk.f32.gmra.mxu0 %vm525_vm0, %v6913_v63  ;;  %v6961_v63 = vld [vmem:[%s9795_s3 + $0x298] sm:$0xff] }
 0x2b7   : > { %2992 = vmatprep.subr.mxu1 %v8300_v54  ;;  %6907 = vmatmul.mubr.msk.f32.gmra.mxu1 %vm525_vm0, %v6903_v1  ;;  %v8357_v8 = vpop.permute.xlu0 %3201  ;;  %v6951_v1 = vld [vmem:[%s9795_s3 + $0x268] sm:$0xff] }
 0x2b8   : > { %2899 = vmatprep.mubr.f32.mxu0 %v9810_v2  ;;  %2524 = vmatprep.mubr.f32.mxu1 %v9810_v2  ;;  %v8364_v11 = vpop.permute.xlu1 %3195  ;;  %v3205_v46 = vsel %vm3203_vm12, %v8346_v4, %v8357_v8 }
 0x2ba   : > { %6930 = vmatmul.mubr.msk.f32.vlgmr.msra.gmra.mxu0 %vm525_vm0, %v6926_v7  ;;  %v6974_v7 = vld [vmem:[%s9795_s3 + $0x2c0] sm:$0xff] }
 0x2bb   : > { %3122 = vmatpush1.msra.mxu0 %v3076_v9  ;;  %6908 = vmatmul.mubr.msk.f32.gmra.mxu1 %vm525_vm0, %v6904_v10  ;;  %v8371_v13 = vpop.permute.xlu0 %3197  ;;  %v6952_v10 = vld [vmem:[%s9795_s3 + $0x270] sm:$0xff] }
 0x2bc   : > { %3123 = vmatprep.subr.mxu0 %v3069_v60  ;;  %2905 = vmatprep.mubr.f32.mxu0 %v9810_v2  ;;  %v3329_v21 = vpop.permute.xlu1 %3328  ;;  %v3204_v51 = vsel %vm3203_vm12, %v8364_v11, %v8371_v13 }
 0x2bd   : > { %3124 = vmatpush1.msra.mxu0 %v3075_v15  ;;  %2530 = vmatprep.mubr.f32.mxu1 %v9810_v2  ;;  %v6953_v15 = vld [vmem:[%s9795_s3 + $0x278] sm:$0xff] }
 0x2be   : > { %6931 = vmatmul.mubr.msk.f32.gmra.mxu0 %vm525_vm0, %v6927_v12  ;;  %v6975_v12 = vld [vmem:[%s9795_s3 + $0x2c8] sm:$0xff] }
 0x2bf   : > { %6909 = vmatmul.mubr.msk.f32.gmra.mxu1 %vm525_vm0, %v6905_v17  ;;  %2911 = vmatprep.mubr.f32.mxu0 %v9810_v2  ;;  %v3327_v23 = vpop.permute.xlu0 %3326 }
 0x2c0   : > { %2770 = vmatprep.mubr.f32.mxu1 %v9810_v2  ;;  %v3325_v25 = vpop.permute.xlu1 %3324 }
 0x2c1   : > { %v3333_v39 = vsel %vm3332_vm11, %v3325_v25, %v3327_v23 }
 0x2c2   : > { %6932 = vmatmul.mubr.msk.f32.gmra.mxu0 %vm525_vm0, %v6928_v22 }
 0x2c3   : > { %6922 = vmatmul.mubr.msk.f32.vlgmr.msra.gmra.mxu1 %vm525_vm0, %v6918_v24  ;;  %2917 = vmatprep.mubr.f32.mxu0 %v9810_v2  ;;  %v3331_v28 = vpop.permute.xlu0 %3330  ;;  %v6966_v24 = vld [vmem:[%s9795_s3 + $0x2a0] sm:$0xff] }
 0x2c4   : > { %2993 = vmatpush1.msra.mxu1 %v2947_v26  ;;  %2776 = vmatprep.mubr.f32.mxu1 %v9810_v2  ;;  %v8400_v30 = vpop.permute.xlu1 %3457  ;;  %v3334_v34 = vsel %vm3332_vm11, %v3329_v21, %v3331_v28  ;;  %vm5083_vm11 = vcmask 261120  }
 0x2c5   : > { %2994 = vmatprep.subr.mxu1 %v8316_v57  ;;  %3379 = vmatprep.subr.mxu0 %v3331_v28 }
 0x2c6   : > { %2995 = vmatpush1.msra.mxu1 %v2946_v31  ;;  %6933 = vmatmul.mubr.msk.f32.gmra.mxu0 %vm525_vm0, %v6929_v27  ;;  %v6967_v31 = vld [vmem:[%s9795_s3 + $0x2a8] sm:$0xff] }
 0x2c7   : > { %3250 = vmatprep.subr.mxu1 %v8357_v8  ;;  %6923 = vmatmul.mubr.msk.f32.gmra.mxu1 %vm525_vm0, %v6919_v29  ;;  %v8411_v33 = vpop.permute.xlu0 %3459  ;;  %v6977_v29 = vld [vmem:[%s9795_s3 + $0x2d8] sm:$0xff] }
 0x2c8   : > { %3157 = vmatprep.mubr.f32.mxu0 %v9810_v2  ;;  %2782 = vmatprep.mubr.f32.mxu1 %v9810_v2  ;;  %v8418_v36 = vpop.permute.xlu1 %3453  ;;  %v3463_v62 = vsel %vm3461_vm14, %v8400_v30, %v8411_v33 }
 0x2ca   : > { %6946 = vmatmul.mubr.msk.f32.vlgmr.msra.gmra.mxu0 %vm525_vm0, %v6942_v32 }
 0x2cb   : > { %3380 = vmatpush1.msra.mxu0 %v3334_v34  ;;  %6924 = vmatmul.mubr.msk.f32.gmra.mxu1 %vm525_vm0, %v6920_v35  ;;  %v8425_v38 = vpop.permute.xlu0 %3455 }
 0x2cc   : > { %3381 = vmatprep.subr.mxu0 %v3327_v23  ;;  %3163 = vmatprep.mubr.f32.mxu0 %v9810_v2  ;;  %v3587_v41 = vpop.permute.xlu1 %3586  ;;  %v3462_v4 = vsel %vm3461_vm14, %v8418_v36, %v8425_v38  ;;  %v6976_v23 = vld [vmem:[%s9795_s3 + $0x2d0] sm:$0xff]  ;;  %v6990_v36 = vld [vmem:[%s9795_s3 + $0x300] sm:$0xff] }
 0x2cd   : > { %3382 = vmatpush1.msra.mxu0 %v3333_v39  ;;  %2788 = vmatprep.mubr.f32.mxu1 %v9810_v2  ;;  %v6968_v39 = vld [vmem:[%s9795_s3 + $0x2b0] sm:$0xff] }
 0x2ce   : > { %6947 = vmatmul.mubr.msk.f32.gmra.mxu0 %vm525_vm0, %v6943_v37 }
 0x2cf   : > { %6925 = vmatmul.mubr.msk.f32.gmra.mxu1 %vm525_vm0, %v6921_v40  ;;  %3169 = vmatprep.mubr.f32.mxu0 %v9810_v2  ;;  %v3585_v43 = vpop.permute.xlu0 %3584 }
 0x2d0   : > { %3028 = vmatprep.mubr.f32.mxu1 %v9810_v2  ;;  %v3583_v45 = vpop.permute.xlu1 %3582 }
 0x2d1   : > { %v3591_v57 = vsel %vm3590_vm13, %v3583_v45, %v3585_v43 }
 0x2d2   : > { %6948 = vmatmul.mubr.msk.f32.gmra.mxu0 %vm525_vm0, %v6944_v42 }
 0x2d3   : > { %6938 = vmatmul.mubr.msk.f32.vlgmr.msra.gmra.mxu1 %vm525_vm0, %v6934_v44  ;;  %3175 = vmatprep.mubr.f32.mxu0 %v9810_v2  ;;  %v3589_v48 = vpop.permute.xlu0 %3588 }
 0x2d4   : > { %3251 = vmatpush1.msra.mxu1 %v3205_v46  ;;  %3034 = vmatprep.mubr.f32.mxu1 %v9810_v2  ;;  %v8454_v50 = vpop.permute.xlu1 %3715  ;;  %v3592_v54 = vsel %vm3590_vm13, %v3587_v41, %v3589_v48  ;;  %v6969_v46 = vld [vmem:[%s9795_s3 + $0x2b8] sm:$0xff] }
 0x2d5   : > { %3252 = vmatprep.subr.mxu1 %v8371_v13  ;;  %3637 = vmatprep.subr.mxu0 %v3589_v48 }
 0x2d6   : > { %3253 = vmatpush1.msra.mxu1 %v3204_v51  ;;  %6949 = vmatmul.mubr.msk.f32.gmra.mxu0 %vm525_vm0, %v6945_v47 }
 0x2d7   : > { %3508 = vmatprep.subr.mxu1 %v8411_v33  ;;  %6939 = vmatmul.mubr.msk.f32.gmra.mxu1 %vm525_vm0, %v6935_v49  ;;  %v8465_v53 = vpop.permute.xlu0 %3717 }
 0x2d8   : > { %3415 = vmatprep.mubr.f32.mxu0 %v9810_v2  ;;  %3040 = vmatprep.mubr.f32.mxu1 %v9810_v2  ;;  %v8472_v16 = vpop.permute.xlu1 %3711  ;;  %v3721_v28 = vsel %vm3719_vm1, %v8454_v50, %v8465_v53  ;;  %v6992_v50 = vld [vmem:[%s9795_s3 + $0x310] sm:$0xff] }
 0x2da   : > { %6962 = vmatmul.mubr.msk.f32.vlgmr.msra.gmra.mxu0 %vm525_vm0, %v6958_v52 }
 0x2db   : > { %3638 = vmatpush1.msra.mxu0 %v3592_v54  ;;  %6940 = vmatmul.mubr.msk.f32.gmra.mxu1 %vm525_vm0, %v6936_v55  ;;  %v8479_v18 = vpop.permute.xlu0 %3713 }
 0x2dc   : > { %3639 = vmatprep.subr.mxu0 %v3585_v43  ;;  %3421 = vmatprep.mubr.f32.mxu0 %v9810_v2  ;;  %v3845_v59 = vpop.permute.xlu1 %3844  ;;  %v3720_v33 = vsel %vm3719_vm1, %v8472_v16, %v8479_v18  ;;  %v6991_v43 = vld [vmem:[%s9795_s3 + $0x308] sm:$0xff] }
 0x2dd   : > { %3640 = vmatpush1.msra.mxu0 %v3591_v57  ;;  %3046 = vmatprep.mubr.f32.mxu1 %v9810_v2  ;;  %v6993_v57 = vld [vmem:[%s9795_s3 + $0x318] sm:$0xff] }
 0x2de   : > { %6963 = vmatmul.mubr.msk.f32.gmra.mxu0 %vm525_vm0, %v6959_v56 }
 0x2df   : > { %6941 = vmatmul.mubr.msk.f32.gmra.mxu1 %vm525_vm0, %v6937_v58  ;;  %3427 = vmatprep.mubr.f32.mxu0 %v9810_v2  ;;  %v3843_v60 = vpop.permute.xlu0 %3842 }
 0x2e0   : > { %3286 = vmatprep.mubr.f32.mxu1 %v9810_v2  ;;  %v3841_v61 = vpop.permute.xlu1 %3840 }
 0x2e1   : > { %v3849_v13 = vsel %vm3848_vm15, %v3841_v61, %v3843_v60 }
 0x2e2   : > { %6964 = vmatmul.mubr.msk.f32.gmra.mxu0 %vm525_vm0, %v6960_v19  ;;  %v6983_v19 = vld [vmem:[%s9795_s3 + $0x2e8] sm:$0xff] }
 0x2e3   : > { %6954 = vmatmul.mubr.msk.f32.vlgmr.msra.gmra.mxu1 %vm525_vm0, %v6950_v20  ;;  %3433 = vmatprep.mubr.f32.mxu0 %v9810_v2  ;;  %v3847_v0 = vpop.permute.xlu0 %3846 }
 0x2e4   : > { %3509 = vmatpush1.msra.mxu1 %v3463_v62  ;;  %3292 = vmatprep.mubr.f32.mxu1 %v9810_v2  ;;  %v3850_v9 = vsel %vm3848_vm15, %v3845_v59, %v3847_v0 }
 0x2e5   : > { %3510 = vmatprep.subr.mxu1 %v8425_v38  ;;  %3895 = vmatprep.subr.mxu0 %v3847_v0  ;;  %v8511_v6 = vpop.permute.xlu1 %3973  ;;  %v7006_v0 = vld [vmem:[%s9795_s3 + $0x340] sm:$0xff] }
 0x2e6   : > { %3511 = vmatpush1.msra.mxu1 %v3462_v4  ;;  %6965 = vmatmul.mubr.msk.f32.gmra.mxu0 %vm525_vm0, %v6961_v63 }
 0x2e7   : > { %3766 = vmatprep.subr.mxu1 %v8465_v53  ;;  %6955 = vmatmul.mubr.msk.f32.gmra.mxu1 %vm525_vm0, %v6951_v1  ;;  %v8519_v8 = vpop.permute.xlu0 %3975  ;;  %v6982_v53 = vld [vmem:[%s9795_s3 + $0x2e0] sm:$0xff] }
 0x2e8   : > { %3673 = vmatprep.mubr.f32.mxu0 %v9810_v2  ;;  %3298 = vmatprep.mubr.f32.mxu1 %v9810_v2 }
 0x2e9   : > { %v8526_v11 = vpop.permute.xlu1 %3969 }
 0x2ea   : > { %6978 = vmatmul.mubr.msk.f32.vlgmr.msra.gmra.mxu0 %vm525_vm0, %v6974_v7  ;;  %v6984_v7 = vld [vmem:[%s9795_s3 + $0x2f0] sm:$0xff] }
 0x2eb   : > { %3896 = vmatpush1.msra.mxu0 %v3850_v9  ;;  %6956 = vmatmul.mubr.msk.f32.gmra.mxu1 %vm525_vm0, %v6952_v10 }
 0x2ec   : > { %3897 = vmatprep.subr.mxu0 %v3843_v60  ;;  %3679 = vmatprep.mubr.f32.mxu0 %v9810_v2  ;;  %v8537_v17 = vpop.permute.xlu0 %3971 }
 0x2ed   : > { %3898 = vmatpush1.msra.mxu0 %v3849_v13  ;;  %3304 = vmatprep.mubr.f32.mxu1 %v9810_v2  ;;  %v4103_v21 = vpop.permute.xlu1 %4102  ;;  %v3978_v60 = vsel %vm3977_vm3, %v8526_v11, %v8537_v17 }
 0x2ee   : > { %6979 = vmatmul.mubr.msk.f32.gmra.mxu0 %vm525_vm0, %v6975_v12  ;;  %v873_v22 = vpop.f32.mrf.mxu1  ;;  %v7007_v12 = vld [vmem:[%s9795_s3 + $0x348] sm:$0xff] }
 0x2ef   : > { %6957 = vmatmul.mubr.msk.f32.gmra.mxu1 %vm525_vm0, %v6953_v15  ;;  %3685 = vmatprep.mubr.f32.mxu0 %v9810_v2 }
 0x2f0   : > { %3544 = vmatprep.mubr.f32.mxu1 %v9810_v2  ;;  %v4101_v25 = vpop.permute.xlu0 %4100  ;;  %v875_v26 = vpop.f32.mrf.mxu1 }
 0x2f1   : > { %v4099_v27 = vpop.permute.xlu1 %4098 }
 0x2f2   : > { %6980 = vmatmul.mubr.msk.f32.gmra.mxu0 %vm525_vm0, %v6976_v23  ;;  %v4107_v45 = vsel %vm4106_vm2, %v4099_v27, %v4101_v25  ;;  %v7008_v27 = vld [vmem:[%s9795_s3 + $0x350] sm:$0xff] }
 0x2f3   : > { %6970 = vmatmul.mubr.msk.f32.vlgmr.msra.gmra.mxu1 %vm525_vm0, %v6966_v24  ;;  %3691 = vmatprep.mubr.f32.mxu0 %v9810_v2  ;;  %v879_v30 = vpop.f32.mrf.mxu1 }
 0x2f4   : > { %3767 = vmatpush1.msra.mxu1 %v3721_v28  ;;  %3550 = vmatprep.mubr.f32.mxu1 %v9810_v2  ;;  %v4105_v32 = vpop.permute.xlu0 %4104 }
 0x2f5   : > { %3768 = vmatprep.subr.mxu1 %v8479_v18  ;;  %v881_v34 = vpop.f32.mrf.mxu1  ;;  %4153 = vmatprep.subr.mxu0 %v4105_v32  ;;  %v4108_v38 = vsel %vm4106_vm2, %v4103_v21, %v4105_v32  ;;  %v3979_v18 = vsel %vm3977_vm3, %v8511_v6, %v8519_v8  ;;  %v6985_v21 = vld [vmem:[%s9795_s3 + $0x2f8] sm:$0xff] }
 0x2f6   : > { %3769 = vmatpush1.msra.mxu1 %v3720_v33  ;;  %6981 = vmatmul.mubr.msk.f32.gmra.mxu0 %vm525_vm0, %v6977_v29  ;;  %v8568_v35 = vpop.permute.xlu1 %4231 }
 0x2f7   : > { %4024 = vmatprep.subr.mxu1 %v8519_v8  ;;  %6971 = vmatmul.mubr.msk.f32.gmra.mxu1 %vm525_vm0, %v6967_v31  ;;  %v885_v37 = vpop.f32.mrf.mxu1 }
 0x2f8   : > { %3931 = vmatprep.mubr.f32.mxu0 %v9810_v2  ;;  %3556 = vmatprep.mubr.f32.mxu1 %v9810_v2  ;;  %v8581_v40 = vpop.permute.xlu0 %4233 }
 0x2f9   : > { %v887_v41 = vpop.f32.mrf.mxu1 }
 0x2fa   : > { %6994 = vmatmul.mubr.msk.f32.vlgmr.msra.gmra.mxu0 %vm525_vm0, %v6990_v36  ;;  %v8584_v42 = vpop.permute.xlu1 %4227  ;;  %v4237_v36 = vsel %vm4235_vm5, %v8568_v35, %v8581_v40  ;;  %v6999_v35 = vld [vmem:[%s9795_s3 + $0x328] sm:$0xff] }
 0x2fb   : > { %4154 = vmatpush1.msra.mxu0 %v4108_v38  ;;  %6972 = vmatmul.mubr.msk.f32.gmra.mxu1 %vm525_vm0, %v6968_v39  ;;  %v8590_v44 = vpop.f32.mrf.mxu1  ;;  %v7009_v38 = vld [vmem:[%s9795_s3 + $0x358] sm:$0xff] }
 0x2fc   : > { %4155 = vmatprep.subr.mxu0 %v4101_v25  ;;  %3937 = vmatprep.mubr.f32.mxu0 %v9810_v2 }
 0x2fd   : > { %4156 = vmatpush1.msra.mxu0 %v4107_v45  ;;  %3562 = vmatprep.mubr.f32.mxu1 %v9810_v2  ;;  %v8598_v47 = vpop.permute.xlu0 %4229  ;;  %v8600_v48 = vpop.f32.mrf.mxu1 }
 0x2fe   : > { %6995 = vmatmul.mubr.msk.f32.gmra.mxu0 %vm525_vm0, %v6991_v43  ;;  %v4361_v49 = vpop.permute.xlu1 %4360  ;;  %v4236_v43 = vsel %vm4235_vm5, %v8584_v42, %v8598_v47  ;;  %vm5550_vm5 = vcmask 416768  }
 0x2ff   : > { %6973 = vmatmul.mubr.msk.f32.gmra.mxu1 %vm525_vm0, %v6969_v46  ;;  %3943 = vmatprep.mubr.f32.mxu0 %v9810_v2  ;;  %v974_v51 = vpop.f32.mrf.mxu1 }
 0x300   : > { %3802 = vmatprep.mubr.f32.mxu1 %v9810_v2  ;;  %v8609_v52 = vadd.f32 %v974_v51, %v873_v22 }
 0x301   : > { %v4359_v54 = vpop.permute.xlu0 %4358  ;;  %v976_v55 = vpop.f32.mrf.mxu1 }
 0x302   : > { %6996 = vmatmul.mubr.msk.f32.gmra.mxu0 %vm525_vm0, %v6992_v50  ;;  %v8615_v16 = vadd.f32 %v976_v55, %v875_v26  ;;  %v4357_v56 = vpop.permute.xlu1 %4356  ;;  %v7000_v50 = vld [vmem:[%s9795_s3 + $0x330] sm:$0xff] }
 0x303   : > { %6986 = vmatmul.mubr.msk.f32.vlgmr.msra.gmra.mxu1 %vm525_vm0, %v6982_v53  ;;  %3949 = vmatprep.mubr.f32.mxu0 %v9810_v2  ;;  %v980_v58 = vpop.f32.mrf.mxu1  ;;  %v4365_v15 = vsel %vm4364_vm4, %v4357_v56, %v4359_v54  ;;  %v7023_v56 = vld [vmem:[%s9795_s3 + $0x388] sm:$0xff] }
 0x304   : > { %4025 = vmatpush1.msra.mxu1 %v3979_v18  ;;  %3808 = vmatprep.mubr.f32.mxu1 %v9810_v2  ;;  %v8626_v59 = vadd.f32 %v980_v58, %v879_v30  ;;  %v6998_v30 = vld [vmem:[%s9795_s3 + $0x320] sm:$0xff]  ;;  %v7001_v58 = vld [vmem:[%s9795_s3 + $0x338] sm:$0xff] }
 0x305   : > { %4026 = vmatprep.subr.mxu1 %v8537_v17  ;;  %v4363_v20 = vpop.permute.xlu0 %4362  ;;  %v982_v61 = vpop.f32.mrf.mxu1 }
 0x306   : > { %4027 = vmatpush1.msra.mxu1 %v3978_v60  ;;  %6997 = vmatmul.mubr.msk.f32.gmra.mxu0 %vm525_vm0, %v6993_v57  ;;  %v8636_v62 = vadd.f32 %v982_v61, %v881_v34  ;;  %v4366_v4 = vsel %vm4364_vm4, %v4361_v49, %v4363_v20  ;;  %v7024_v61 = vld [vmem:[%s9795_s3 + $0x390] sm:$0xff] }
 0x307   : > { %4282 = vmatprep.subr.mxu1 %v8581_v40  ;;  %6987 = vmatmul.mubr.msk.f32.gmra.mxu1 %vm525_vm0, %v6983_v19  ;;  %v8640_v63 = vpop.permute.xlu1 %4489  ;;  %v986_v1 = vpop.f32.mrf.mxu1 }
 0x308   : > { %4189 = vmatprep.mubr.f32.mxu0 %v9810_v2  ;;  %4411 = vmatprep.subr.mxu0 %v4363_v20  ;;  %v8647_v6 = vadd.f32 %v986_v1, %v885_v37  ;;  %v8652_v8 = vpop.f32.mrf.mxu0 }
 0x309   : > { %3814 = vmatprep.mubr.f32.mxu1 %v9810_v2  ;;  %v8655_v9 = vpop.permute.xlu0 %4491  ;;  %v988_v10 = vpop.f32.mrf.mxu1 }
 0x30a   : > { %7010 = vmatmul.mubr.msk.f32.vlgmr.msra.gmra.mxu0 %vm525_vm0, %v7006_v0  ;;  %v8658_v11 = vadd.f32 %v988_v10, %v887_v41  ;;  %v8672_v22 = vpop.f32.mrf.mxu0  ;;  %v7014_v0 = vld [vmem:[%s9795_s3 + $0x360] sm:$0xff]  ;;  %v4495_v10 = vsel %vm4493_vm7, %v8640_v63, %v8655_v9 }
 0x30b   : > { %4412 = vmatpush1.msra.mxu0 %v4366_v4  ;;  %6988 = vmatmul.mubr.msk.f32.gmra.mxu1 %vm525_vm0, %v6984_v7  ;;  %v992_v13 = vpop.f32.mrf.mxu1  ;;  %v8674_v23 = vpop.permute.xlu1 %4485 }
 0x30c   : > { %4413 = vmatprep.subr.mxu0 %v4359_v54  ;;  %4195 = vmatprep.mubr.f32.mxu0 %v9810_v2  ;;  %v8667_v17 = vadd.f32 %v992_v13, %v8590_v44  ;;  %v8693_v31 = vpop.f32.mrf.mxu0  ;;  %v7015_v13 = vld [vmem:[%s9795_s3 + $0x368] sm:$0xff] }
 0x30d   : > { %4414 = vmatpush1.msra.mxu0 %v4365_v15  ;;  %3820 = vmatprep.mubr.f32.mxu1 %v9810_v2  ;;  %v994_v24 = vpop.f32.mrf.mxu1 }
 0x30e   : > { %7011 = vmatmul.mubr.msk.f32.gmra.mxu0 %vm525_vm0, %v7007_v12  ;;  %v8678_v25 = vpop.permute.xlu0 %4487  ;;  %v995_v26 = vadd.f32 %v994_v24, %v8600_v48  ;;  %v8712_v40 = vpop.f32.mrf.mxu0  ;;  %v7022_v48 = vld [vmem:[%s9795_s3 + $0x380] sm:$0xff]  ;;  %v7025_v12 = vld [vmem:[%s9795_s3 + $0x398] sm:$0xff] }
 0x30f   : > { %6989 = vmatmul.mubr.msk.f32.gmra.mxu1 %vm525_vm0, %v6985_v21  ;;  %4201 = vmatprep.mubr.f32.mxu0 %v9810_v2  ;;  %v1095_v28 = vpop.f32.mrf.mxu1  ;;  %v4619_v37 = vpop.permute.xlu1 %4618  ;;  %v4494_v63 = vsel %vm4493_vm7, %v8674_v23, %v8678_v25  ;;  %v7038_v23 = vld [vmem:[%s9795_s3 + $0x3c0] sm:$0xff]  ;;  %vm7601_vm7 = vmmov 0  }
 0x310   : > { %4060 = vmatprep.mubr.f32.mxu1 %v9810_v2  ;;  %v8688_v29 = vadd.f32 %v1095_v28, %v8609_v52  ;;  %v7016_v28 = vld [vmem:[%s9795_s3 + $0x370] sm:$0xff] }
 0x311   : > { %v1097_v32 = vpop.f32.mrf.mxu1 }
 0x312   : > { %7012 = vmatmul.mubr.msk.f32.gmra.mxu0 %vm525_vm0, %v7008_v27  ;;  %v4617_v33 = vpop.permute.xlu0 %4616  ;;  %v1119_v34 = vadd.f32 %v1097_v32, %v8615_v16 }
 0x313   : > { %7002 = vmatmul.mubr.msk.f32.vlgmr.msra.gmra.mxu1 %vm525_vm0, %v6998_v30  ;;  %4207 = vmatprep.mubr.f32.mxu0 %v9810_v2  ;;  %v1101_v39 = vpop.f32.mrf.mxu1  ;;  %v4615_v52 = vpop.permute.xlu1 %4614 }
 0x314   : > { %4283 = vmatpush1.msra.mxu1 %v4237_v36  ;;  %4066 = vmatprep.mubr.f32.mxu1 %v9810_v2  ;;  %v8707_v41 = vadd.f32 %v1101_v39, %v8626_v59  ;;  %v4623_v18 = vsel %vm4622_vm6, %v4615_v52, %v4617_v33 }
 0x315   : > { %4284 = vmatprep.subr.mxu1 %v8598_v47  ;;  %v1103_v44 = vpop.f32.mrf.mxu1 }
 0x316   : > { %4285 = vmatpush1.msra.mxu1 %v4236_v43  ;;  %7013 = vmatmul.mubr.msk.f32.gmra.mxu0 %vm525_vm0, %v7009_v38  ;;  %v4621_v45 = vpop.permute.xlu0 %4620  ;;  %v1121_v46 = vadd.f32 %v1103_v44, %v8636_v62 }
 0x317   : > { %4540 = vmatprep.subr.mxu1 %v8655_v9  ;;  %7003 = vmatmul.mubr.msk.f32.gmra.mxu1 %vm525_vm0, %v6999_v35  ;;  %v1107_v49 = vpop.f32.mrf.mxu1  ;;  %v4624_v42 = vsel %vm4622_vm6, %v4619_v37, %v4621_v45  ;;  %v7017_v37 = vld [vmem:[%s9795_s3 + $0x378] sm:$0xff]  ;;  %vm5561_vm6 = vcmask 408592  }
 0x318   : > { %4447 = vmatprep.mubr.f32.mxu0 %v9810_v2  ;;  %4669 = vmatprep.subr.mxu0 %v4621_v45  ;;  %v1122_v47 = vadd.f32 %v1107_v49, %v8647_v6  ;;  %v8731_v51 = vpop.f32.mrf.mxu0  ;;  %v4748_v39 = vpop.permute.xlu1 %4747  ;;  %v7030_v49 = vld [vmem:[%s9795_s3 + $0x3a0] sm:$0xff] }
 0x319   : > { %4072 = vmatprep.mubr.f32.mxu1 %v9810_v2  ;;  %v1109_v53 = vpop.f32.mrf.mxu1 }
 0x31a   : > { %7026 = vmatmul.mubr.msk.f32.vlgmr.msra.gmra.mxu0 %vm525_vm0, %v7022_v48  ;;  %v1123_v54 = vadd.f32 %v1109_v53, %v8658_v11  ;;  %v8736_v55 = vpop.f32.mrf.mxu0 }
 0x31b   : > { %4670 = vmatpush1.msra.mxu0 %v4624_v42  ;;  %7004 = vmatmul.mubr.msk.f32.gmra.mxu1 %vm525_vm0, %v7000_v50  ;;  %v1113_v16 = vpop.f32.mrf.mxu1 }
 0x31c   : > { %4671 = vmatprep.subr.mxu0 %v4617_v33  ;;  %4078 = vmatprep.mubr.f32.mxu1 %v9810_v2  ;;  %v1124_v57 = vadd.f32 %v1113_v16, %v8667_v17  ;;  %v1371_v19 = vpop.f32.mrf.mxu0  ;;  %v4750_v17 = vpop.permute.xlu0 %4749  ;;  %v7041_v16 = vld [vmem:[%s9795_s3 + $0x3d8] sm:$0xff] }
 0x31d   : > { %4672 = vmatpush1.msra.mxu0 %v4623_v18  ;;  %v1115_v59 = vpop.f32.mrf.mxu1  ;;  %4453 = vmatprep.mubr.f32.mxu0 %v9810_v2  ;;  %v4753_v53 = vsel %vm4751_vm8, %v4748_v39, %v4750_v17  ;;  %v7031_v18 = vld [vmem:[%s9795_s3 + $0x3a8] sm:$0xff] }
 0x31e   : > { %v1125_v60 = vadd.f32 %v1115_v59, %v995_v26  ;;  %7027 = vmatmul.mubr.msk.f32.gmra.mxu0 %vm525_vm0, %v7023_v56  ;;  %4932 = vmatprep.subr.mxu0 %v9810_v2  ;;  %v8761_v4 = vpop.f32.mrf.mxu0 }
 0x31f   : > { %7005 = vmatmul.mubr.msk.f32.gmra.mxu1 %vm525_vm0, %v7001_v58  ;;  %v1224_v20 = vpop.f32.mrf.mxu1  ;;  %4459 = vmatprep.mubr.f32.mxu0 %v9810_v2 }
 0x320   : > { %4318 = vmatprep.mubr.f32.mxu1 %v9810_v2  ;;  %v1247_v62 = vadd.f32 %v1224_v20, %v8688_v29  ;;  %v4746_v50 = vpop.permute.xlu0 %4745 }
 0x321   : > { %v1226_v1 = vpop.f32.mrf.mxu1 }
 0x322   : > { %v8763_v6 = vadd.f32 %v1226_v1, %v1119_v34  ;;  %v1376_v7 = vadd.f32 %v8652_v8, %v1247_v62  ;;  %7028 = vmatmul.mubr.msk.f32.gmra.mxu0 %vm525_vm0, %v7024_v61  ;;  %v7039_v34 = vld [vmem:[%s9795_s3 + $0x3c8] sm:$0xff]  ;;  %v7032_v62 = vld [vmem:[%s9795_s3 + $0x3b0] sm:$0xff] }
 0x323   : > { %7018 = vmatmul.mubr.msk.f32.vlgmr.msra.gmra.mxu1 %vm525_vm0, %v7014_v0  ;;  %v1230_v11 = vpop.f32.mrf.mxu1  ;;  %4465 = vmatprep.mubr.f32.mxu0 %v9810_v2 }
 0x324   : > { %4541 = vmatpush1.msra.mxu1 %v4495_v10  ;;  %4324 = vmatprep.mubr.f32.mxu1 %v9810_v2  ;;  %v1249_v8 = vadd.f32 %v1230_v11, %v8707_v41 }
 0x325   : > { %4542 = vmatprep.subr.mxu1 %v8678_v25  ;;  %v1232_v9 = vpop.f32.mrf.mxu1  ;;  %v1611_v15 = vpop.f32.mrf.mxu0 }
 0x326   : > { %4543 = vmatpush1.msra.mxu1 %v4494_v63  ;;  %v8784_v21 = vadd.f32 %v1232_v9, %v1121_v46  ;;  %v1378_v24 = vadd.f32 %v8693_v31, %v1249_v8  ;;  %7029 = vmatmul.mubr.msk.f32.gmra.mxu0 %vm525_vm0, %v7025_v12  ;;  %v7040_v46 = vld [vmem:[%s9795_s3 + $0x3d0] sm:$0xff]  ;;  %v7033_v8 = vld [vmem:[%s9795_s3 + $0x3b8] sm:$0xff] }
 0x327   : > { %4798 = vmatprep.subr.mxu1 %v4750_v17  ;;  %7019 = vmatmul.mubr.msk.f32.gmra.mxu1 %vm525_vm0, %v7015_v13  ;;  %v1236_v26 = vpop.f32.mrf.mxu1  ;;  %v8792_v27 = vpop.f32.mrf.mxu0 }
 0x328   : > { %4330 = vmatprep.mubr.f32.mxu1 %v9810_v2  ;;  %v1251_v25 = vadd.f32 %v1236_v26, %v1122_v47  ;;  %4705 = vmatprep.mubr.f32.mxu0 %v9810_v2  ;;  %v7046_v26 = vld [vmem:[%s9795_s3 + $0x3e0] sm:$0xff] }
 0x329   : > { %v1238_v29 = vpop.f32.mrf.mxu1 }
 0x32a   : > { %v8799_v30 = vadd.f32 %v1238_v29, %v1123_v54  ;;  %v1380_v31 = vadd.f32 %v8731_v51, %v1251_v25  ;;  %7042 = vmatmul.mubr.msk.f32.vlgmr.msra.gmra.mxu0 %vm525_vm0, %v7038_v23  ;;  %v1617_v32 = vpop.f32.mrf.mxu0  ;;  %v4744_v54 = vpop.permute.xlu1 %4743 }
 0x32b   : > { %7020 = vmatmul.mubr.msk.f32.gmra.mxu1 %vm525_vm0, %v7016_v28  ;;  %v1242_v33 = vpop.f32.mrf.mxu1  ;;  %4711 = vmatprep.mubr.f32.mxu0 %v9810_v2  ;;  %v4752_v58 = vsel %vm4751_vm8, %v4744_v54, %v4746_v50 }
 0x32c   : > { %4336 = vmatprep.mubr.f32.mxu1 %v9810_v2  ;;  %v1253_v36 = vadd.f32 %v1242_v33, %v1124_v57  ;;  %v8812_v38 = vpop.f32.mrf.mxu0 }
 0x32d   : > { %v1244_v41 = vpop.f32.mrf.mxu1 }
 0x32e   : > { %v8814_v35 = vadd.f32 %v1244_v41, %v1125_v60  ;;  %v1382_v43 = vadd.f32 %v1371_v19, %v1253_v36  ;;  %7043 = vmatmul.mubr.msk.f32.gmra.mxu0 %vm525_vm0, %v7039_v34  ;;  %v1623_v44 = vpop.f32.mrf.mxu0 }
 0x32f   : > { %7021 = vmatmul.mubr.msk.f32.gmra.mxu1 %vm525_vm0, %v7017_v37  ;;  %v1482_v45 = vpop.f32.mrf.mxu1  ;;  %4717 = vmatprep.mubr.f32.mxu0 %v9810_v2 }
 0x330   : > { %4576 = vmatprep.mubr.f32.mxu1 %v9810_v2  ;;  %v1505_v48 = vadd.f32 %v1482_v45, %v1376_v7  ;;  %v8826_v42 = vpop.f32.mrf.mxu0 }
 0x331   : > { %v8828_v47 = vpop.f32.mrf.mxu1 }
 0x332   : > { %v1634_v51 = vadd.f32 %v1611_v15, %v1505_v48  ;;  %7044 = vmatmul.mubr.msk.f32.gmra.mxu0 %vm525_vm0, %v7040_v46  ;;  %v1629_v52 = vpop.f32.mrf.mxu0 }
 0x333   : > { %7034 = vmatmul.mubr.msk.f32.vlgmr.msra.gmra.mxu1 %vm525_vm0, %v7030_v49  ;;  %4723 = vmatprep.mubr.f32.mxu0 %v9810_v2 }
 0x334   : > { %4799 = vmatpush1.msra.mxu1 %v4753_v53  ;;  %4582 = vmatprep.mubr.f32.mxu1 %v9810_v2  ;;  %v1488_v56 = vpop.f32.mrf.mxu1  ;;  %v8841_v57 = vpop.f32.mrf.mxu0 }
 0x335   : > { %4800 = vmatprep.subr.mxu1 %v4746_v50  ;;  %v1507_v59 = vadd.f32 %v1488_v56, %v1378_v24  ;;  %v7049_v50 = vld [vmem:[%s9795_s3 + $0x3f8] sm:$0xff] }
 0x336   : > { %4801 = vmatpush1.msra.mxu1 %v4752_v58  ;;  %v8844_v19 = vpop.f32.mrf.mxu1  ;;  %7045 = vmatmul.mubr.msk.f32.gmra.mxu0 %vm525_vm0, %v7041_v16  ;;  %v1869_v60 = vpop.f32.mrf.mxu0  ;;  %v1377_v58 = vadd.f32 %v8672_v22, %v8763_v6 }
 0x337   : > { %7035 = vmatmul.mubr.msk.f32.gmra.mxu1 %vm525_vm0, %v7031_v18  ;;  %v1636_v20 = vadd.f32 %v1617_v32, %v1507_v59  ;;  %v7047_v32 = vld [vmem:[%s9795_s3 + $0x3e8] sm:$0xff] }
 0x338   : > { %4588 = vmatprep.mubr.f32.mxu1 %v9810_v2  ;;  %v1494_v61 = vpop.f32.mrf.mxu1  ;;  %v8852_v0 = vpop.f32.mrf.mxu0 }
 0x339   : > { %v1509_v1 = vadd.f32 %v1494_v61, %v1380_v31  ;;  %v1383_v61 = vadd.f32 %v8761_v4, %v8814_v35 }
 0x33a   : > { %v8854_v7 = vpop.f32.mrf.mxu1 }
 0x33b   : > { %7036 = vmatmul.mubr.msk.f32.gmra.mxu1 %vm525_vm0, %v7032_v62  ;;  %v1638_v10 = vadd.f32 %v1623_v44, %v1509_v1  ;;  %v1875_v11 = vpop.f32.mrf.mxu0  ;;  %v1506_v62 = vadd.f32 %v8828_v47, %v1377_v58 }
 0x33c   : > { %4594 = vmatprep.mubr.f32.mxu1 %v9810_v2  ;;  %v1500_v12 = vpop.f32.mrf.mxu1 }
 0x33d   : > { %v1511_v13 = vadd.f32 %v1500_v12, %v1382_v43  ;;  %v8861_v63 = vpop.f32.mrf.mxu0  ;;  %v7048_v43 = vld [vmem:[%s9795_s3 + $0x3f0] sm:$0xff]  ;;  %v1635_v22 = vadd.f32 %v8792_v27, %v1506_v62 }
 0x33e   : > { %v1502_v9 = vpop.f32.mrf.mxu1 }
 0x33f   : > { %7037 = vmatmul.mubr.msk.f32.gmra.mxu1 %vm525_vm0, %v7033_v8  ;;  %v1640_v15 = vadd.f32 %v1629_v52, %v1511_v13  ;;  %v1881_v17 = vpop.f32.mrf.mxu0  ;;  %v1512_v12 = vadd.f32 %v1502_v9, %v1383_v61  ;;  %v1379_v8 = vadd.f32 %v8712_v40, %v8784_v21  ;;  %v4882_v40 = vld [vmem:[%s9797_s5 + $0x78] sm:$0xff] }
 0x340   : > { %4834 = vmatprep.mubr.f32.mxu1 %v9810_v2  ;;  %v1740_v24 = vpop.f32.mrf.mxu1  ;;  %4933 = vmatpush1.msra.mxu0 %v4882_v40 }
 0x341   : > { %v1763_v23 = vadd.f32 %v1740_v24, %v1634_v51  ;;  %v8868_v25 = vpop.f32.mrf.mxu0  ;;  %v1641_v4 = vadd.f32 %v8841_v57, %v1512_v12  ;;  %4934 = vmatprep.subr.mxu0 %v9810_v2 }
 0x342   : > { %v1742_v28 = vpop.f32.mrf.mxu1 }
 0x343   : > { %7050 = vmatmul.mubr.msk.f32.vlgmr.msra.gmra.mxu1 %vm525_vm0, %v7046_v26  ;;  %v1892_v29 = vadd.f32 %v1869_v60, %v1763_v23  ;;  %v1887_v31 = vpop.f32.mrf.mxu0  ;;  %v1764_v35 = vadd.f32 %v1742_v28, %v1635_v22  ;;  %v1381_v23 = vadd.f32 %v8736_v55, %v8799_v30  ;;  %v4881_v55 = vld [vmem:[%s9797_s5 + $0x70] sm:$0xff] }
 0x344   : > { %4840 = vmatprep.mubr.f32.mxu1 %v9810_v2  ;;  %4935 = vmatpush1.msra.mxu0 %v4881_v55  ;;  %v4871_v55 = vld [vmem:[%s9797_s5 + $0x20] sm:$0xff] }
 0x345   : > { %v1746_v33 = vpop.f32.mrf.mxu1  ;;  %v8875_v34 = vpop.f32.mrf.mxu0  ;;  %v1893_v30 = vadd.f32 %v8852_v0, %v1764_v35  ;;  %4936 = vmatprep.subr.mxu0 %v9810_v2 }
 0x346   : > { %v1765_v36 = vadd.f32 %v1746_v33, %v1636_v20 }
 0x347   : > { %7051 = vmatmul.mubr.msk.f32.gmra.mxu1 %vm525_vm0, %v7047_v32  ;;  %v1748_v37 = vpop.f32.mrf.mxu1  ;;  %v2127_v39 = vpop.f32.mrf.mxu0 }
 0x348   : > { %v1894_v41 = vadd.f32 %v1875_v11, %v1765_v36  ;;  %4846 = vmatprep.mubr.f32.mxu1 %v9810_v2 }
 0x349   : > { %v1752_v44 = vpop.f32.mrf.mxu1  ;;  %v8882_v45 = vpop.f32.mrf.mxu0 }
 0x34a   : > { %v1767_v46 = vadd.f32 %v1752_v44, %v1638_v10 }
 0x34b   : > { %7052 = vmatmul.mubr.msk.f32.gmra.mxu1 %vm525_vm0, %v7048_v43  ;;  %v8885_v48 = vpop.f32.mrf.mxu1 }
 0x34c   : > { %v1896_v49 = vadd.f32 %v1881_v17, %v1767_v46  ;;  %4852 = vmatprep.mubr.f32.mxu1 %v9810_v2  ;;  %v2133_v51 = vpop.f32.mrf.mxu0  ;;  %v1508_v17 = vadd.f32 %v8844_v19, %v1379_v8 }
 0x34d   : > { %v1758_v52 = vpop.f32.mrf.mxu1 }
 0x34e   : > { %v1769_v53 = vadd.f32 %v1758_v52, %v1640_v15  ;;  %v8891_v54 = vpop.f32.mrf.mxu0  ;;  %v1637_v19 = vadd.f32 %v8812_v38, %v1508_v17  ;;  %v4880_v38 = vld [vmem:[%s9797_s5 + $0x68] sm:$0xff] }
 0x34f   : > { %7053 = vmatmul.mubr.msk.f32.gmra.mxu1 %vm525_vm0, %v7049_v50  ;;  %v1760_v16 = vpop.f32.mrf.mxu1  ;;  %4937 = vmatpush1.msra.mxu0 %v4880_v38 }
 0x350   : > { %v1898_v56 = vadd.f32 %v1887_v31, %v1769_v53  ;;  %v2139_v18 = vpop.f32.mrf.mxu0  ;;  %v1770_v21 = vadd.f32 %v1760_v16, %v1641_v4  ;;  %v1510_v31 = vadd.f32 %v8854_v7, %v1381_v23  ;;  %v1766_v33 = vadd.f32 %v1748_v37, %v1637_v19  ;;  %4938 = vmatprep.subr.mxu0 %v9810_v2  ;;  %v4879_v37 = vld [vmem:[%s9797_s5 + $0x60] sm:$0xff]  ;;  %v4873_v23 = vld [vmem:[%s9797_s5 + $0x30] sm:$0xff] }
 0x351   : > { %v1998_v59 = vpop.f32.mrf.mxu1  ;;  %4939 = vmatpush1.msra.mxu0 %v4879_v37 }
 0x352   : > { %v2021_v60 = vadd.f32 %v1998_v59, %v1892_v29  ;;  %v8896_v20 = vpop.f32.mrf.mxu0  ;;  %v1899_v7 = vadd.f32 %v8875_v34, %v1770_v21  ;;  %v1639_v44 = vadd.f32 %v8826_v42, %v1510_v31  ;;  %4940 = vmatprep.subr.mxu0 %v9810_v2  ;;  %v4878_v42 = vld [vmem:[%s9797_s5 + $0x58] sm:$0xff] }
 0x353   : > { %v2000_v1 = vpop.f32.mrf.mxu1  ;;  %4941 = vmatpush1.msra.mxu0 %v4878_v42  ;;  %v4867_v42 = vld [vmem:[%s9797_s5] sm:$0xff] }
 0x354   : > { %v2150_v10 = vadd.f32 %v2127_v39, %v2021_v60  ;;  %v2145_v11 = vpop.f32.mrf.mxu0  ;;  %v2022_v39 = vadd.f32 %v2000_v1, %v1893_v30  ;;  %v1768_v34 = vadd.f32 %v8885_v48, %v1639_v44  ;;  %4942 = vmatprep.subr.mxu0 %v9810_v2 }
 0x356   : > { %v2004_v13 = vpop.f32.mrf.mxu1  ;;  %v2147_v15 = vpop.f32.mrf.mxu0  ;;  %v2151_v53 = vadd.f32 %v8882_v45, %v2022_v39  ;;  %v1897_v62 = vadd.f32 %v8868_v25, %v1768_v34  ;;  %v4876_v45 = vld [vmem:[%s9797_s5 + $0x48] sm:$0xff]  ;;  %v4875_v25 = vld [vmem:[%s9797_s5 + $0x40] sm:$0xff] }
 0x357   : > { %v2023_v6 = vadd.f32 %v2004_v13, %v1894_v41 }
 0x358   : > { %v2006_v24 = vpop.f32.mrf.mxu1  ;;  %v2385_v26 = vpop.f32.mrf.mxu0 }
 0x359   : > { %v2152_v47 = vadd.f32 %v2133_v51, %v2023_v6  ;;  %v1895_v51 = vadd.f32 %v8861_v63, %v1766_v33  ;;  %v4877_v63 = vld [vmem:[%s9797_s5 + $0x50] sm:$0xff] }
 0x35a   : > { %v2010_v9 = vpop.f32.mrf.mxu1  ;;  %v2387_v29 = vpop.f32.mrf.mxu0  ;;  %4943 = vmatpush1.msra.mxu0 %v4877_v63 }
 0x35b   : > { %v2025_v27 = vadd.f32 %v2010_v9, %v1896_v49  ;;  %v2024_v58 = vadd.f32 %v2006_v24, %v1895_v51  ;;  %4944 = vmatprep.subr.mxu0 %v9810_v2  ;;  %v4874_v24 = vld [vmem:[%s9797_s5 + $0x38] sm:$0xff] }
 0x35c   : > { %v2012_v32 = vpop.f32.mrf.mxu1  ;;  %4945 = vmatpush1.msra.mxu0 %v4876_v45 }
 0x35d   : > { %v2154_v57 = vadd.f32 %v2139_v18, %v2025_v27  ;;  %v2391_v28 = vpop.f32.mrf.mxu0  ;;  %v2153_v12 = vadd.f32 %v8891_v54, %v2024_v58  ;;  %v2026_v8 = vadd.f32 %v2012_v32, %v1897_v62  ;;  %4946 = vmatprep.subr.mxu0 %v9810_v2  ;;  %v4872_v27 = vld [vmem:[%s9797_s5 + $0x28] sm:$0xff]  ;;  %v4890_v58 = vld [vmem:[%s9797_s5 + $0xb8] sm:$0x3f] }
 0x35e   : > { %v2016_v36 = vpop.f32.mrf.mxu1  ;;  %4947 = vmatpush1.msra.mxu0 %v4875_v25 }
 0x35f   : > { %v2027_v41 = vadd.f32 %v2016_v36, %v1898_v56  ;;  %v2393_v43 = vpop.f32.mrf.mxu0  ;;  %4948 = vmatprep.subr.mxu0 %v9810_v2  ;;  %v2155_v4 = vadd.f32 %v8896_v20, %v2026_v8  ;;  %v4870_v36 = vld [vmem:[%s9797_s5 + $0x18] sm:$0xff] }
 0x360   : > { %v2018_v0 = vpop.f32.mrf.mxu1  ;;  %4949 = vmatpush1.msra.mxu0 %v4874_v24 }
 0x361   : > { %v2028_v46 = vadd.f32 %v2018_v0, %v1899_v7  ;;  %v2156_v49 = vadd.f32 %v2145_v11, %v2027_v41  ;;  %v2397_v50 = vpop.f32.mrf.mxu0  ;;  %4950 = vmatprep.subr.mxu0 %v9810_v2 }
 0x362   : > { %v2256_v52 = vpop.f32.mrf.mxu1  ;;  %4951 = vmatpush1.msra.mxu0 %v4873_v23  ;;  %v4885_v23 = vld [vmem:[%s9797_s5 + $0x90] sm:$0xff] }
 0x363   : > { %v2157_v16 = vadd.f32 %v2147_v15, %v2028_v46  ;;  %v2279_v56 = vadd.f32 %v2256_v52, %v2150_v10  ;;  %v2399_v18 = vpop.f32.mrf.mxu0  ;;  %4952 = vmatprep.subr.mxu0 %v9810_v2 }
 0x364   : > { %v2258_v59 = vpop.f32.mrf.mxu1  ;;  %4953 = vmatpush1.msra.mxu0 %v4872_v27  ;;  %v4884_v27 = vld [vmem:[%s9797_s5 + $0x88] sm:$0xff] }
 0x365   : > { %v2280_v48 = vadd.f32 %v2258_v59, %v2151_v53  ;;  %v2408_v60 = vadd.f32 %v2385_v26, %v2279_v56  ;;  %v2403_v61 = vpop.f32.mrf.mxu0  ;;  %4954 = vmatprep.subr.mxu0 %v9810_v2 }
 0x366   : > { %4955 = vmatpush1.msra.mxu0 %v4871_v55  ;;  %v4883_v55 = vld [vmem:[%s9797_s5 + $0x80] sm:$0xff] }
 0x367   : > { %v2262_v1 = vpop.f32.mrf.mxu1  ;;  %v2409_v10 = vadd.f32 %v2387_v29, %v2280_v48  ;;  %v2405_v11 = vpop.f32.mrf.mxu0  ;;  %4956 = vmatprep.subr.mxu0 %v9810_v2 }
 0x368   : > { %v2281_v13 = vadd.f32 %v2262_v1, %v2152_v47  ;;  %4957 = vmatpush1.msra.mxu0 %v4870_v36 }
 0x369   : > { %v2264_v15 = vpop.f32.mrf.mxu1  ;;  %v2643_v22 = vpop.f32.mrf.mxu0  ;;  %4958 = vmatprep.subr.mxu0 %v9810_v2 }
 0x36a   : > { %v2282_v6 = vadd.f32 %v2264_v15, %v2153_v12  ;;  %v2410_v17 = vadd.f32 %v2391_v28, %v2281_v13  ;;  %v4887_v15 = vld [vmem:[%s9797_s5 + $0xa0] sm:$0xff] }
 0x36b   : > { %v2268_v54 = vpop.f32.mrf.mxu1  ;;  %v2645_v26 = vpop.f32.mrf.mxu0 }
 0x36c   : > { %v2283_v35 = vadd.f32 %v2268_v54, %v2154_v57  ;;  %v2411_v47 = vadd.f32 %v2393_v43, %v2282_v6  ;;  %v4869_v43 = vld [vmem:[%s9797_s5 + $0x10] sm:$0xff]  ;;  %v4886_v54 = vld [vmem:[%s9797_s5 + $0x98] sm:$0xff] }
 0x36d   : > { %v2270_v9 = vpop.f32.mrf.mxu1  ;;  %4959 = vmatpush1.msra.mxu0 %v4869_v43 }
 0x36e   : > { %v2284_v29 = vadd.f32 %v2270_v9, %v2155_v4  ;;  %v2412_v40 = vadd.f32 %v2397_v50, %v2283_v35  ;;  %v2649_v21 = vpop.f32.mrf.mxu0  ;;  %4960 = vmatprep.subr.mxu0 %v9810_v2 }
 0x36f   : > { %v2274_v20 = vpop.f32.mrf.mxu1 }
 0x370   : > { %v2285_v19 = vadd.f32 %v2274_v20, %v2156_v49  ;;  %v2413_v31 = vadd.f32 %v2399_v18, %v2284_v29  ;;  %v2651_v32 = vpop.f32.mrf.mxu0  ;;  %v4868_v49 = vld [vmem:[%s9797_s5 + $0x8] sm:$0xff] }
 0x371   : > { %v2276_v30 = vpop.f32.mrf.mxu1  ;;  %4961 = vmatpush1.msra.mxu0 %v4868_v49 }
 0x372   : > { %v2286_v57 = vadd.f32 %v2276_v30, %v2157_v16  ;;  %v2414_v28 = vadd.f32 %v2403_v61, %v2285_v19  ;;  %v2655_v33 = vpop.f32.mrf.mxu0  ;;  %4962 = vmatprep.subr.mxu0 %v9810_v2  ;;  %v4889_v61 = vld [vmem:[%s9797_s5 + $0xb0] sm:$0xff] }
 0x373   : > { %v2514_v38 = vpop.f32.mrf.mxu1  ;;  %4963 = vmatpush1.msra.mxu0 %v4867_v42 }
 0x374   : > { %v2415_v7 = vadd.f32 %v2405_v11, %v2286_v57  ;;  %v2537_v39 = vadd.f32 %v2514_v38, %v2408_v60  ;;  %v2657_v41 = vpop.f32.mrf.mxu0  ;;  %4980 = vmatprep.subr.mxu0 %v9810_v2  ;;  %v4888_v11 = vld [vmem:[%s9797_s5 + $0xa8] sm:$0xff] }
 0x375   : > { %v2516_v44 = vpop.f32.mrf.mxu1  ;;  %7054 = vmatpush2.msk.msra.mxu0 %vm4928_vm9, %v4890_v58 }
 0x376   : > { %v2538_v0 = vadd.f32 %v2516_v44, %v2409_v10  ;;  %v2666_v37 = vadd.f32 %v2643_v22, %v2537_v39  ;;  %v2661_v46 = vpop.f32.mrf.mxu0  ;;  %4982 = vmatprep.subr.mxu0 %v9810_v2 }
 0x377   : > { %v2520_v50 = vpop.f32.mrf.mxu1  ;;  %4983 = vmatpush2.msra.mxu0 %v4889_v61  ;;  %v4893_v61 = vld [vmem:[%s9796_s4 + $0x10] sm:$0xff] }
 0x378   : > { %v2539_v51 = vadd.f32 %v2520_v50, %v2410_v17  ;;  %v2667_v34 = vadd.f32 %v2645_v26, %v2538_v0  ;;  %v2663_v52 = vpop.f32.mrf.mxu0  ;;  %4984 = vmatprep.subr.mxu0 %v9810_v2  ;;  %4907 = vperm.xlu0 %7513, %v4893_v61  }
 0x379   : > { %v2522_v53 = vpop.f32.mrf.mxu1  ;;  %4985 = vmatpush2.msra.mxu0 %v4888_v11 }
 0x37a   : > { %v2540_v16 = vadd.f32 %v2522_v53, %v2411_v47  ;;  %v2668_v56 = vadd.f32 %v2649_v21, %v2539_v51  ;;  %v2901_v18 = vpop.f32.mrf.mxu0  ;;  %4986 = vmatprep.subr.mxu0 %v9810_v2 }
 0x37b   : > { %v2526_v59 = vpop.f32.mrf.mxu1  ;;  %4987 = vmatpush2.msra.mxu0 %v4887_v15 }
 0x37c   : > { %v2541_v63 = vadd.f32 %v2526_v59, %v2412_v40  ;;  %v2669_v48 = vadd.f32 %v2651_v32, %v2540_v16  ;;  %v2903_v60 = vpop.f32.mrf.mxu0  ;;  %4988 = vmatprep.subr.mxu0 %v9810_v2  ;;  %v4894_v59 = vld [vmem:[%s9796_s4 + $0x18] sm:$0xff]  ;;  %7514 = vset.pattern.permute.xlu0 %v9808_v5 }
 0x37d   : > { %v2528_v62 = vpop.f32.mrf.mxu1  ;;  %4989 = vmatpush2.msra.mxu0 %v4886_v54  ;;  %4912 = vperm.xlu1 %7512, %v4894_v59  }
 0x37e   : > { %v2542_v45 = vadd.f32 %v2528_v62, %v2413_v31  ;;  %v2670_v1 = vadd.f32 %v2655_v33, %v2541_v63  ;;  %v2907_v10 = vpop.f32.mrf.mxu0  ;;  %4990 = vmatprep.subr.mxu0 %v9810_v2  ;;  %5054 = vperm.xlu0 %7514, %v4894_v59  }
 0x37f   : > { %v2532_v12 = vpop.f32.mrf.mxu1  ;;  %4991 = vmatpush2.msra.mxu0 %v4885_v23 }
 0x380   : > { %v2543_v8 = vadd.f32 %v2532_v12, %v2414_v28  ;;  %v2671_v13 = vadd.f32 %v2657_v41, %v2542_v45  ;;  %v2909_v25 = vpop.f32.mrf.mxu0  ;;  %4992 = vmatprep.subr.mxu0 %v9810_v2  ;;  %v4892_v45 = vld [vmem:[%s9796_s4 + $0x8] sm:$0xff] }
 0x381   : > { %v2534_v22 = vpop.f32.mrf.mxu1  ;;  %4993 = vmatpush2.msra.mxu0 %v4884_v27  ;;  %4902 = vperm.xlu1 %7512, %v4892_v45  }
 0x382   : > { %v2544_v6 = vadd.f32 %v2534_v22, %v2415_v7  ;;  %v2672_v17 = vadd.f32 %v2661_v46, %v2543_v8  ;;  %v2913_v24 = vpop.f32.mrf.mxu0  ;;  %4994 = vmatprep.subr.mxu0 %v9810_v2  ;;  %v4891_v22 = vld [vmem:[%s9796_s4] sm:$0xff]  ;;  %5046 = vperm.xlu0 %7514, %v4892_v45  }
 0x383   : > { %v2772_v26 = vpop.f32.mrf.mxu1  ;;  %4995 = vmatpush2.msra.mxu0 %v4883_v55 }
 0x384   : > { %v2673_v4 = vadd.f32 %v2663_v52, %v2544_v6  ;;  %v2795_v35 = vadd.f32 %v2772_v26, %v2666_v37  ;;  %v2915_v47 = vpop.f32.mrf.mxu0 }
 0x385   : > { %v2774_v9 = vpop.f32.mrf.mxu1  ;;  %4897 = vperm.xlu1 %7512, %v4891_v22  }
 0x386   : > { %v2796_v29 = vadd.f32 %v2774_v9, %v2667_v34  ;;  %v2924_v40 = vadd.f32 %v2901_v18, %v2795_v35  ;;  %v2919_v21 = vpop.f32.mrf.mxu0  ;;  %5042 = vperm.xlu0 %7514, %v4891_v22  }
 0x387   : > { %v2778_v20 = vpop.f32.mrf.mxu1 }
 0x388   : > { %v2797_v19 = vadd.f32 %v2778_v20, %v2668_v56  ;;  %v2925_v31 = vadd.f32 %v2903_v60, %v2796_v29  ;;  %v2921_v32 = vpop.f32.mrf.mxu0 }
 0x389   : > { %v2780_v30 = vpop.f32.mrf.mxu1  ;;  %7515 = vset.pattern.permute.xlu1 %v9808_v5 }
 0x38a   : > { %v2798_v57 = vadd.f32 %v2780_v30, %v2669_v48  ;;  %v2926_v28 = vadd.f32 %v2907_v10, %v2797_v19  ;;  %v3159_v33 = vpop.f32.mrf.mxu0  ;;  %5050 = vperm.xlu1 %7515, %v4893_v61   ;;  %7517 = vset.pattern.permute.xlu0 %v9806_v14 }
 0x38b   : > { %v2784_v36 = vpop.f32.mrf.mxu1  ;;  %5062 = vperm.xlu0 %7517, %v4891_v22  }
 0x38c   : > { %v2799_v38 = vadd.f32 %v2784_v36, %v2670_v1  ;;  %v2927_v7 = vadd.f32 %v2909_v25, %v2798_v57  ;;  %v3161_v39 = vpop.f32.mrf.mxu0 }
 0x38d   : > { %v2786_v41 = vpop.f32.mrf.mxu1 }
 0x38e   : > { %v2800_v43 = vadd.f32 %v2786_v41, %v2671_v13  ;;  %v2928_v44 = vadd.f32 %v2913_v24, %v2799_v38  ;;  %v3165_v0 = vpop.f32.mrf.mxu0  ;;  %7516 = vset.pattern.permute.xlu1 %v9806_v14 }
 0x38f   : > { %v2790_v37 = vpop.f32.mrf.mxu1  ;;  %5074 = vperm.xlu1 %7516, %v4894_v59   ;;  %7518 = vset.pattern.permute.xlu0 %v7565_v3 }
 0x390   : > { %v2801_v46 = vadd.f32 %v2790_v37, %v2672_v17  ;;  %v2929_v49 = vadd.f32 %v2915_v47, %v2800_v43  ;;  %v3167_v50 = vpop.f32.mrf.mxu0 }
 0x391   : > { %v2792_v51 = vpop.f32.mrf.mxu1 }
 0x392   : > { %v2802_v34 = vadd.f32 %v2792_v51, %v2673_v4  ;;  %v2930_v52 = vadd.f32 %v2919_v21, %v2801_v46  ;;  %v3171_v42 = vpop.f32.mrf.mxu0 }
 0x393   : > { %v3030_v53 = vpop.f32.mrf.mxu1  ;;  %5070 = vperm.xlu1 %7516, %v4893_v61  }
 0x394   : > { %v2931_v16 = vadd.f32 %v2921_v32, %v2802_v34  ;;  %v3053_v56 = vadd.f32 %v3030_v53, %v2924_v40  ;;  %v3173_v18 = vpop.f32.mrf.mxu0 }
 0x395   : > { %v3032_v58 = vpop.f32.mrf.mxu1 }
 0x396   : > { %v3054_v63 = vadd.f32 %v3032_v58, %v2925_v31  ;;  %v3182_v48 = vadd.f32 %v3159_v33, %v3053_v56  ;;  %v3177_v60 = vpop.f32.mrf.mxu0 }
 0x397   : > { %v3036_v62 = vpop.f32.mrf.mxu1  ;;  %5066 = vperm.xlu1 %7516, %v4892_v45  }
 0x398   : > { %v3055_v1 = vadd.f32 %v3036_v62, %v2926_v28  ;;  %v3183_v10 = vadd.f32 %v3161_v39, %v3054_v63  ;;  %v3179_v11 = vpop.f32.mrf.mxu0 }
 0x399   : > { %v3038_v12 = vpop.f32.mrf.mxu1 }
 0x39a   : > { %v3056_v8 = vadd.f32 %v3038_v12, %v2927_v7  ;;  %v3184_v13 = vadd.f32 %v3165_v0, %v3055_v1  ;;  %v9024_v25 = vpop.f32.mrf.mxu0 }
 0x39b   : > { %v3042_v15 = vpop.f32.mrf.mxu1  ;;  %7519 = vset.pattern.permute.xlu1 %v7565_v3 }
 0x39c   : > { %v3057_v6 = vadd.f32 %v3042_v15, %v2928_v44  ;;  %v3185_v17 = vadd.f32 %v3167_v50, %v3056_v8  ;;  %v9030_v24 = vpop.f32.mrf.mxu0 }
 0x39d   : > { %v3044_v54 = vpop.f32.mrf.mxu1 }
 0x39e   : > { %v3058_v26 = vadd.f32 %v3044_v54, %v2929_v49  ;;  %v3186_v4 = vadd.f32 %v3171_v42, %v3057_v6  ;;  %v9032_v35 = vpop.f32.mrf.mxu0 }
 0x39f   : > { %v3048_v47 = vpop.f32.mrf.mxu1 }
 0x3a0   : > { %v3059_v23 = vadd.f32 %v3048_v47, %v2930_v52  ;;  %v3187_v9 = vadd.f32 %v3173_v18, %v3058_v26  ;;  %v9034_v29 = vpop.f32.mrf.mxu0 }
 0x3a1   : > { %v3050_v40 = vpop.f32.mrf.mxu1 }
 0x3a2   : > { %v3060_v21 = vadd.f32 %v3050_v40, %v2931_v16  ;;  %v3188_v27 = vadd.f32 %v3177_v60, %v3059_v23  ;;  %v9036_v20 = vpop.f32.mrf.mxu0 }
 0x3a3   : > { %v3288_v19 = vpop.f32.mrf.mxu1 }
 0x3a4   : > { %v3189_v31 = vadd.f32 %v3179_v11, %v3060_v21  ;;  %v9039_v32 = vadd.f32 %v3288_v19, %v3182_v48  ;;  %v9041_v55 = vpop.f32.mrf.mxu0 }
 0x3a5   : > { %v3290_v30 = vpop.f32.mrf.mxu1 }
 0x3a6   : > { %v9043_v57 = vadd.f32 %v3290_v30, %v3183_v10  ;;  %v9045_v28 = vpop.f32.mrf.mxu0 }
 0x3a7   : > { %v3294_v33 = vpop.f32.mrf.mxu1 }
 0x3a8   : > { %v9048_v36 = vadd.f32 %v3294_v33, %v3184_v13  ;;  %v9050_v38 = vpop.f32.mrf.mxu0 }
 0x3a9   : > { %v3296_v7 = vpop.f32.mrf.mxu1 }
 0x3aa   : > { %v9053_v39 = vadd.f32 %v3296_v7, %v3185_v17  ;;  %v9055_v41 = vpop.f32.mrf.mxu0 }
 0x3ab   : > { %v3300_v43 = vpop.f32.mrf.mxu1 }
 0x3ac   : > { %v9057_v44 = vadd.f32 %v3300_v43, %v3186_v4  ;;  %v9059_v0 = vpop.f32.mrf.mxu0 }
 0x3ad   : > { %v3302_v37 = vpop.f32.mrf.mxu1 }
 0x3ae   : > { %v9062_v46 = vadd.f32 %v3302_v37, %v3187_v9  ;;  %v9064_v49 = vpop.f32.mrf.mxu0 }
 0x3af   : > { %v3306_v50 = vpop.f32.mrf.mxu1 }
 0x3b0   : > { %v9066_v51 = vadd.f32 %v3306_v50, %v3188_v27  ;;  %v9068_v34 = vpop.f32.mrf.mxu0 }
 0x3b1   : > { %v3308_v52 = vpop.f32.mrf.mxu1 }
 0x3b2   : > { %v9070_v42 = vadd.f32 %v3308_v52, %v3189_v31  ;;  %v9072_v53 = vpop.f32.mrf.mxu0 }
 0x3b3   : > { %v3546_v16 = vpop.f32.mrf.mxu1 }
 0x3b4   : > { %v9074_v56 = vpop.f32.mrf.mxu0 }
 0x3b5   : > { %v3548_v18 = vpop.f32.mrf.mxu1 }
 0x3b6   : > { %v9077_v58 = vpop.f32.mrf.mxu0 }
 0x3b7   : > { %v3552_v59 = vpop.f32.mrf.mxu1 }
 0x3b8   : > { %v9079_v63 = vpop.f32.mrf.mxu0 }
 0x3b9   : > { %v3554_v48 = vpop.f32.mrf.mxu1 }
 0x3ba   : > { %v9081_v60 = vpop.f32.mrf.mxu0 }
 0x3bb   : > { %v9083_v61 = vpop.f32.mrf.mxu1 }
 0x3bc   : > { %v9085_v62 = vpop.f32.mrf.mxu0 }
 0x3bd   : > { %v9087_v45 = vpop.f32.mrf.mxu1 }
 0x3be   : > { %v9089_v1 = vpop.f32.mrf.mxu0 }
 0x3bf   : > { %v9091_v10 = vpop.f32.mrf.mxu1 }
 0x3c0   : > { %v9093_v3 = vpop.f32.mrf.mxu0 }
 0x3c1   : > { %v9095_v11 = vpop.f32.mrf.mxu1 }
 0x3c2   : > { %v9097_v12 = vpop.f32.mrf.mxu0 }
 0x3c3   : > { %v3804_v8 = vpop.f32.mrf.mxu1 }
 0x3c4   : > { %v9099_v13 = vpop.f32.mrf.mxu0 }
 0x3c5   : > { %v3806_v15 = vpop.f32.mrf.mxu1 }
 0x3c6   : > { %v9101_v22 = vpop.f32.mrf.mxu0 }
 0x3c7   : > { %9812 = vst [vmem:[#allocation5_spill] sm:$0xff] %v9101_v22  ;;  %v9103_v6 = vpop.f32.mrf.mxu1 }
 0x3c8   : > { %v9105_v17 = vpop.f32.mrf.mxu0 }
 0x3c9   : > { %9813 = vst [vmem:[#allocation6_spill] sm:$0xff] %v9105_v17  ;;  %v3812_v54 = vpop.f32.mrf.mxu1 }
 0x3ca   : > { %v9107_v26 = vpop.f32.mrf.mxu0 }
 0x3cb   : > { %v9109_v4 = vpop.f32.mrf.mxu1 }
 0x3cc   : > { %v9111_v47 = vpop.f32.mrf.mxu0 }
 0x3cd   : > { %v9113_v23 = vpop.f32.mrf.mxu1 }
 0x3ce   : > { %v9115_v9 = vpop.f32.mrf.mxu0 }
 0x3cf   : > { %9814 = vst [vmem:[#allocation7_spill] sm:$0xff] %v9115_v9  ;;  %v9117_v40 = vpop.f32.mrf.mxu1 }
 0x3d0   : > { %v9119_v21 = vpop.f32.mrf.mxu0 }
 0x3d1   : > { %9815 = vst [vmem:[#allocation8_spill] sm:$0xff] %v9119_v21  ;;  %v9121_v27 = vpop.f32.mrf.mxu1 }
 0x3d2   : > { %v9123_v19 = vpop.f32.mrf.mxu0 }
 0x3d3   : > { %9816 = vst [vmem:[#allocation9_spill] sm:$0xff] %v9123_v19  ;;  %v4062_v31 = vpop.f32.mrf.mxu1 }
 0x3d4   : > { %v9125_v30 = vpop.f32.mrf.mxu0 }
 0x3d5   : > { %9817 = vst [vmem:[#allocation10_spill] sm:$0xff] %v9125_v30  ;;  %v4064_v33 = vpop.f32.mrf.mxu1 }
 0x3d6   : > { %v9127_v7 = vpop.f32.mrf.mxu0 }
 0x3d7   : > { %9818 = vst [vmem:[#allocation11_spill] sm:$0xff] %v9127_v7  ;;  %v9129_v43 = vpop.f32.mrf.mxu1 }
 0x3d8   : > { %v9131_v37 = vpop.f32.mrf.mxu0 }
 0x3d9   : > { %9819 = vst [vmem:[#allocation12_spill] sm:$0xff] %v9131_v37  ;;  %v4070_v50 = vpop.f32.mrf.mxu1 }
 0x3da   : > { %v9133_v52 = vpop.f32.mrf.mxu0 }
 0x3db   : > { %9820 = vst [vmem:[#allocation13_spill] sm:$0xff] %v9133_v52  ;;  %v9135_v14 = vpop.f32.mrf.mxu1 }
 0x3dc   : > { %9821 = vst [vmem:[#allocation14_spill] sm:$0xff] %v9135_v14  ;;  %v9137_v5 = vpop.f32.mrf.mxu0  ;;  %v3440_v14 = vadd.f32 %v9024_v25, %v9039_v32 }
 0x3dd   : > { %9822 = vst [vmem:[#allocation15_spill] sm:$0xff] %v9137_v5  ;;  %v9139_v2 = vpop.f32.mrf.mxu1  ;;  %v3441_v5 = vadd.f32 %v9030_v24, %v9043_v57 }
 0x3de   : > { %9823 = vst [vmem:[#allocation16_spill] sm:$0xff] %v9139_v2  ;;  %v9141_v19 = vpop.f32.mrf.mxu0  ;;  %v3569_v2 = vadd.f32 %v3546_v16, %v3440_v14  ;;  %v3445_v16 = vadd.f32 %v9041_v55, %v9062_v46  ;;  %v3447_v55 = vadd.f32 %v9050_v38, %v9070_v42  ;;  %v3446_v46 = vadd.f32 %v9045_v28, %v9066_v51 }
 0x3df   : > { %9824 = vst [vmem:[#allocation17_spill] sm:$0xff] %v9141_v19  ;;  %v9143_v22 = vpop.f32.mrf.mxu1 }
 0x3e0   : > { %9825 = vst [vmem:[#allocation18_spill] sm:$0xff] %v9143_v22  ;;  %v9145_v30 = vpop.f32.mrf.mxu0  ;;  %v3570_v22 = vadd.f32 %v3548_v18, %v3441_v5  ;;  %v3698_v25 = vadd.f32 %v9055_v41, %v3569_v2  ;;  %v3575_v38 = vadd.f32 %v9091_v10, %v3446_v46 }
 0x3e1   : > { %9826 = vst [vmem:[#allocation19_spill] sm:$0xff] %v9145_v30  ;;  %v9147_v7 = vpop.f32.mrf.mxu1 }
 0x3e2   : > { %9827 = vst [vmem:[#allocation20_spill] sm:$0xff] %v9147_v7  ;;  %v9149_v17 = vpop.f32.mrf.mxu0  ;;  %v3699_v24 = vadd.f32 %v9059_v0, %v3570_v22  ;;  %v3574_v0 = vadd.f32 %v9087_v45, %v3445_v16 }
 0x3e3   : > { %9828 = vst [vmem:[#allocation21_spill] sm:$0xff] %v9149_v17  ;;  %v9151_v37 = vpop.f32.mrf.mxu1  ;;  %v3443_v17 = vadd.f32 %v9034_v29, %v9053_v39  ;;  %v3444_v29 = vadd.f32 %v9036_v20, %v9057_v44  ;;  %v9833_v16 = vld [vmem:[#allocation14_spill] sm:$0xff] }
 0x3e4   : > { %v9153_v52 = vpop.f32.mrf.mxu0  ;;  %v3828_v18 = vadd.f32 %v3806_v15, %v3699_v24 }
 0x3e5   : > { %v4322_v9 = vpop.f32.mrf.mxu1  ;;  %9829 = vst [vmem:[#allocation22_spill] sm:$0xff] %v9153_v52  ;;  %v3442_v52 = vadd.f32 %v9032_v35, %v9048_v36  ;;  %v3572_v57 = vadd.f32 %v3554_v48, %v3443_v17  ;;  %v3827_v35 = vadd.f32 %v3804_v8, %v3698_v25  ;;  %v3573_v41 = vadd.f32 %v9083_v61, %v3444_v29  ;;  %v9831_v25 = vld [vmem:[#allocation16_spill] sm:$0xff] }
 0x3e6   : > { %v9163_v7 = vpop.f32.mrf.mxu0  ;;  %v3957_v20 = vadd.f32 %v9085_v62, %v3828_v18  ;;  %v3703_v61 = vadd.f32 %v9074_v56, %v3574_v0  ;;  %v3576_v8 = vadd.f32 %v9095_v11, %v3447_v55 }
 0x3e7   : > { %v9159_v19 = vpop.f32.mrf.mxu1  ;;  %v3571_v32 = vadd.f32 %v3552_v59, %v3442_v52  ;;  %v3701_v39 = vadd.f32 %v9068_v34, %v3572_v57  ;;  %v3956_v34 = vadd.f32 %v9081_v60, %v3827_v35  ;;  %v3702_v22 = vadd.f32 %v9072_v53, %v3573_v41  ;;  %v9830_v57 = vld [vmem:[#allocation8_spill] sm:$0xff]  ;;  %v9834_v35 = vld [vmem:[#allocation6_spill] sm:$0xff] }
 0x3e8   : > { %v9175_v14 = vpop.f32.mrf.mxu0  ;;  %v4086_v15 = vadd.f32 %v4064_v33, %v3957_v20  ;;  %v3832_v28 = vadd.f32 %v9113_v23, %v3703_v61  ;;  %v3705_v56 = vadd.f32 %v9079_v63, %v3576_v8  ;;  %v3704_v53 = vadd.f32 %v9077_v58, %v3575_v38  ;;  %v9838_v20 = vld [vmem:[#allocation10_spill] sm:$0xff]  ;;  %v9840_v61 = vld [vmem:[#allocation9_spill] sm:$0xff] }
 0x3e9   : > { %v9161_v30 = vpop.f32.mrf.mxu1  ;;  %v3700_v2 = vadd.f32 %v9064_v49, %v3571_v32  ;;  %v3830_v44 = vadd.f32 %v3812_v54, %v3701_v39  ;;  %v4085_v42 = vadd.f32 %v4062_v31, %v3956_v34  ;;  %v3831_v60 = vadd.f32 %v9109_v4, %v3702_v22  ;;  %v9832_v32 = vld [vmem:[#allocation7_spill] sm:$0xff]  ;;  %v9839_v46 = vld [vmem:[#allocation20_spill] sm:$0xff] }
 0x3ea   : > { %v9189_v48 = vpop.f32.mrf.mxu0  ;;  %v4215_v11 = vadd.f32 %v9111_v47, %v4086_v15  ;;  %v3961_v23 = vadd.f32 %v9099_v13, %v3832_v28  ;;  %v3833_v63 = vadd.f32 %v9117_v40, %v3704_v53  ;;  %v9836_v40 = vld [vmem:[#allocation5_spill] sm:$0xff]  ;;  %v9841_v15 = vld [vmem:[#allocation18_spill] sm:$0xff] }
 0x3eb   : > { %v9169_v21 = vpop.f32.mrf.mxu1  ;;  %v3829_v45 = vadd.f32 %v9103_v6, %v3700_v2  ;;  %v3959_v54 = vadd.f32 %v9093_v3, %v3830_v44  ;;  %v4214_v10 = vadd.f32 %v9107_v26, %v4085_v42  ;;  %v3960_v4 = vadd.f32 %v9097_v12, %v3831_v60  ;;  %v9843_v60 = vld [vmem:[#allocation17_spill] sm:$0xff] }
 0x3ec   : > { %v4709_v17 = vpop.f32.mrf.mxu0  ;;  %v4344_v24 = vadd.f32 %v4322_v9, %v4215_v11  ;;  %v4090_v26 = vadd.f32 %v9831_v25, %v3961_v23  ;;  %v9835_v9 = vld [vmem:[#allocation15_spill] sm:$0xff]  ;;  %v3962_v0 = vadd.f32 %v9836_v40, %v3833_v63  ;;  %v9846_v63 = vld [vmem:[#allocation22_spill] sm:$0xff] }
 0x3ed   : > { %v9173_v5 = vpop.f32.mrf.mxu1  ;;  %v3958_v51 = vadd.f32 %v9089_v1, %v3829_v45  ;;  %v4088_v33 = vadd.f32 %v4070_v50, %v3959_v54  ;;  %v3834_v1 = vadd.f32 %v9121_v27, %v3705_v56  ;;  %v4343_v47 = vadd.f32 %v9151_v37, %v4214_v10  ;;  %v9837_v37 = vld [vmem:[#allocation13_spill] sm:$0xff] }
 0x3ee   : > { %v4713_v3 = vpop.f32.mrf.mxu0  ;;  %v4089_v18 = vadd.f32 %v9833_v16, %v3960_v4  ;;  %v4473_v39 = vadd.f32 %v9835_v9, %v4344_v24  ;;  %v4219_v44 = vadd.f32 %v9838_v20, %v4090_v26  ;;  %v4091_v22 = vadd.f32 %v9841_v15, %v3962_v0 }
 0x3ef   : > { %v9181_v36 = vpop.f32.mrf.mxu1  ;;  %v4087_v31 = vadd.f32 %v9129_v43, %v3958_v51  ;;  %v4217_v58 = vadd.f32 %v9830_v57, %v4088_v33  ;;  %v3963_v27 = vadd.f32 %v9834_v35, %v3834_v1  ;;  %v4472_v2 = vadd.f32 %v9837_v37, %v4343_v47  ;;  %v9844_v33 = vld [vmem:[#allocation12_spill] sm:$0xff] }
 0x3f0   : > { %v4715_v29 = vpop.f32.mrf.mxu0  ;;  %v4218_v8 = vadd.f32 %v9840_v61, %v4089_v18  ;;  %v4348_v51 = vadd.f32 %v9173_v5, %v4219_v44 }
 0x3f1   : > { %v9187_v59 = vpop.f32.mrf.mxu1  ;;  %v4216_v43 = vadd.f32 %v9832_v32, %v4087_v31  ;;  %v4346_v12 = vadd.f32 %v9161_v30, %v4217_v58  ;;  %v4092_v34 = vadd.f32 %v9839_v46, %v3963_v27  ;;  %v9842_v30 = vld [vmem:[#allocation19_spill] sm:$0xff] }
 0x3f2   : > { %v4719_v42 = vpop.f32.mrf.mxu0  ;;  %v9845_v31 = vld [vmem:[#allocation11_spill] sm:$0xff]  ;;  %v4477_v47 = vadd.f32 %v9846_v63, %v4348_v51 }
 0x3f3   : > { %v4578_v49 = vpop.f32.mrf.mxu1  ;;  %v4345_v41 = vadd.f32 %v9159_v19, %v4216_v43  ;;  %v4475_v28 = vadd.f32 %v9842_v30, %v4346_v12  ;;  %v4347_v19 = vadd.f32 %v9169_v21, %v4218_v8  ;;  %v4221_v53 = vadd.f32 %v9844_v33, %v4092_v34  ;;  %v9847_v21 = vld [vmem:[#allocation21_spill] sm:$0xff] }
 0x3f4   : > { %v4601_v38 = vadd.f32 %v4578_v49, %v4472_v2  ;;  %v4220_v23 = vadd.f32 %v9845_v31, %v4091_v22  ;;  %v4721_v24 = vpop.f32.mrf.mxu0 }
 0x3f5   : > { %v4580_v62 = vpop.f32.mrf.mxu1  ;;  %v4474_v56 = vadd.f32 %v9843_v60, %v4345_v41  ;;  %v4350_v5 = vadd.f32 %v9187_v59, %v4221_v53  ;;  %v4476_v58 = vadd.f32 %v9847_v21, %v4347_v19 }
 0x3f6   : > { %v4602_v45 = vadd.f32 %v4580_v62, %v4473_v39  ;;  %v4730_v1 = vadd.f32 %v9189_v48, %v4601_v38  ;;  %v4349_v25 = vadd.f32 %v9181_v36, %v4220_v23  ;;  %v4725_v43 = vpop.f32.mrf.mxu0  ;;  %v9284_v38 = vpop.permute.xlu0 %4907 }
 0x3f7   : > { %v4584_v6 = vpop.f32.mrf.mxu1  ;;  %v4479_v59 = vadd.f32 %v9175_v14, %v4350_v5 }
 0x3f8   : > { %v4731_v10 = vadd.f32 %v4709_v17, %v4602_v45  ;;  %v4603_v49 = vadd.f32 %v4584_v6, %v4474_v56  ;;  %v4478_v36 = vadd.f32 %v9163_v7, %v4349_v25  ;;  %v4727_v9 = vpop.f32.mrf.mxu0  ;;  %v9276_v20 = vpop.permute.xlu1 %4912 }
 0x3f9   : > { %v4586_v52 = vpop.f32.mrf.mxu1 }
 0x3fa   : > { %v4604_v62 = vadd.f32 %v4586_v52, %v4475_v28  ;;  %v4732_v48 = vadd.f32 %v4713_v3, %v4603_v49 }
 0x3fb   : > { %v4590_v50 = vpop.f32.mrf.mxu1 }
 0x3fc   : > { %v4733_v26 = vadd.f32 %v4715_v29, %v4604_v62  ;;  %v4605_v6 = vadd.f32 %v4590_v50, %v4476_v58  ;;  %v9278_v44 = vpop.permute.xlu1 %4902 }
 0x3fd   : > { %v4592_v13 = vpop.f32.mrf.mxu1 }
 0x3fe   : > { %v4606_v32 = vadd.f32 %v4592_v13, %v4477_v47  ;;  %v4734_v3 = vadd.f32 %v4719_v42, %v4605_v6 }
 0x3ff   : > { %v4596_v55 = vpop.f32.mrf.mxu1 }
 0x400   : > { %v4735_v29 = vadd.f32 %v4721_v24, %v4606_v32  ;;  %v4607_v50 = vadd.f32 %v4596_v55, %v4478_v36  ;;  %v5081_v55 = vld [vmem:[%s9798_s6] sm:$0xff]  ;;  %v9280_v34 = vpop.permute.xlu1 %4897 }
 0x401   : > { %v4598_v54 = vpop.f32.mrf.mxu1  ;;  %7263 = vmatprep.mubr.msk.f32.mxu1 %vm5083_vm11, %v5081_v55 }
 0x402   : > { %v4608_v13 = vadd.f32 %v4598_v54, %v4479_v59  ;;  %v4736_v0 = vadd.f32 %v4725_v43, %v4607_v50 }
 0x403   : > { %v4836_v11 = vpop.f32.mrf.mxu1 }
 0x404   : > { %v9243_v17 = vadd.f32 %v4836_v11, %v4730_v1  ;;  %v4737_v7 = vadd.f32 %v4727_v9, %v4608_v13  ;;  %v9290_v1 = vpop.permute.xlu0 %5054 }
 0x405   : > { %v4838_v4 = vpop.f32.mrf.mxu1  ;;  %v9288_v23 = vpop.permute.xlu1 %5050 }
 0x406   : > { %v9239_v57 = vadd.f32 %v4838_v4, %v4731_v10 }
 0x407   : > { %v4842_v52 = vpop.f32.mrf.mxu1 }
 0x408   : > { %7055 = vmatprep.mubr.msk.f32.mxu0 %vm4915_vm10, %v9239_v57  ;;  %v9252_v35 = vadd.f32 %v4842_v52, %v4732_v48  ;;  %v9294_v63 = vpop.permute.xlu0 %5046 }
 0x409   : > { %v4844_v16 = vpop.f32.mrf.mxu1  ;;  %4997 = vmatmul.mubr.f32.vlgmr.msra.gmra.mxu0 %v9243_v17 }
 0x40a   : > { %v9249_v18 = vadd.f32 %v4844_v16, %v4733_v26  ;;  %v9292_v24 = vpop.permute.xlu1 %5074 }
 0x40b   : > { %v4848_v27 = vpop.f32.mrf.mxu1 }
 0x40c   : > { %7056 = vmatprep.mubr.msk.f32.mxu0 %vm4915_vm10, %v9249_v18  ;;  %v9259_v14 = vadd.f32 %v4848_v27, %v4734_v3  ;;  %v9298_v43 = vpop.permute.xlu0 %5042 }
 0x40d   : > { %v4850_v39 = vpop.f32.mrf.mxu1  ;;  %5002 = vmatmul.mubr.f32.gmra.mxu0 %v9252_v35 }
 0x40e   : > { %v9257_v12 = vadd.f32 %v4850_v39, %v4735_v29  ;;  %v9296_v32 = vpop.permute.xlu1 %5070 }
 0x40f   : > { %v4854_v40 = vpop.f32.mrf.mxu1 }
 0x410   : > { %7057 = vmatprep.mubr.msk.f32.mxu0 %vm4915_vm10, %v9257_v12  ;;  %v9266_v41 = vadd.f32 %v4854_v40, %v4736_v0  ;;  %v9308_v9 = vpop.permute.xlu0 %5062  ;;  %v9320_v0 = vld [vmem:[%s9798_s6 + $0x10] sm:$0xff] }
 0x411   : > { %v4856_v37 = vpop.f32.mrf.mxu1  ;;  %5007 = vmatmul.mubr.f32.gmra.mxu0 %v9259_v14 }
 0x412   : > { %v9264_v2 = vadd.f32 %v4856_v37, %v4737_v7  ;;  %v9304_v13 = vpop.permute.xlu1 %5066  ;;  %v9315_v7 = vld [vmem:[%s9798_s6 + $0x8] sm:$0xff]  ;;  %v9329_v37 = vld [vmem:[%s9798_s6 + $0x18] sm:$0xff] }
 0x414   : > { %7058 = vmatprep.mubr.msk.f32.mxu0 %vm4915_vm10, %v9264_v2 }
 0x415   : > { %5012 = vmatmul.mubr.f32.gmra.mxu0 %v9266_v41 }
 0x416   : > { %7285 = vmatprep.mubr.msk.f32.mxu0 %vm5083_vm11, %v5081_v55  ;;  %v7084_v55 = vld [vmem:[%s9797_s5 + $0x138] sm:$0xff] }
 0x4c9   : > { %v4998_v46 = vpop.f32.mrf.mxu0 }
 0x4ca   : > { %v4999_v8 = vadd.f32 %v4998_v46, %v9280_v34  ;;  %v9848_v46 = vmov 0.0  }
 0x4cb   : > { %v5000_v45 = vpop.f32.mrf.mxu0  ;;  %5552 = vst.msk [vmem:[#allocation3 + $0x8] sm:$0xff] %vm5550_vm5, %v9848_v46  ;;  %5551 = vst.msk [vmem:[#allocation3] sm:$0xff] %vm5550_vm5, %v9848_v46 }
 0x4cc   : > { %v5021_v30 = vmin.f32 %v4999_v8, 0.0  ;;  %vm5017_vm15 = vcmp.gt.f32.partialorder %v4999_v8, 0.0  ;;  %v7083_v45 = vld [vmem:[%s9797_s5 + $0x130] sm:$0xff] }
 0x4cd   : > { %v5003_v61 = vpop.f32.mrf.mxu0 }
 0x4ce   : > { %v5004_v15 = vadd.f32 %v5003_v61, %v9278_v44  ;;  %v5025_v11 = vmul.f32 1.442695, %v5021_v30  ;;  %v7082_v61 = vld [vmem:[%s9797_s5 + $0x128] sm:$0xff]  ;;  %v7075_v30 = vld [vmem:[%s9797_s5 + $0xf0] sm:$0xff] }
 0x4cf   : > { %v5005_v22 = vpop.f32.mrf.mxu0 }
 0x4d0   : > { %v5022_v42 = vmin.f32 %v5004_v15, 0.0  ;;  %vm5018_vm14 = vcmp.gt.f32.partialorder %v5004_v15, 0.0  ;;  %v7078_v22 = vld [vmem:[%s9797_s5 + $0x108] sm:$0xff] }
 0x4d1   : > { %v5008_v54 = vpop.f32.mrf.mxu0 }
 0x4d2   : > { %v5009_v28 = vadd.f32 %v5008_v54, %v9284_v38  ;;  %v5027_v51 = vmul.f32 1.442695, %v5022_v42  ;;  %v7077_v42 = vld [vmem:[%s9797_s5 + $0x100] sm:$0xff]  ;;  %v7076_v54 = vld [vmem:[%s9797_s5 + $0xf8] sm:$0xff] }
 0x4d3   : > { %v5010_v60 = vpop.f32.mrf.mxu0 }
 0x4d4   : > { %v5023_v56 = vmin.f32 %v5009_v28, 0.0  ;;  %7532 = vpow2.f32 %v5027_v51  ;;  %vm5019_vm12 = vcmp.gt.f32.partialorder %v5009_v28, 0.0  ;;  %v7073_v51 = vld [vmem:[%s9797_s5 + $0xe0] sm:$0xff]  ;;  %v7072_v60 = vld [vmem:[%s9797_s5 + $0xd8] sm:$0xff] }
 0x4d5   : > { %v5013_v19 = vpop.f32.mrf.mxu0 }
 0x4d6   : > { %v5029_v33 = vmul.f32 1.442695, %v5023_v56  ;;  %v5014_v53 = vadd.f32 %v5013_v19, %v9276_v20  ;;  %v7071_v56 = vld [vmem:[%s9797_s5 + $0xd0] sm:$0xff]  ;;  %v7070_v19 = vld [vmem:[%s9797_s5 + $0xc8] sm:$0xff] }
 0x4d7   : > { %v5015_v10 = vpop.f32.mrf.mxu0 }
 0x4d8   : > { %7534 = vpow2.f32 %v5029_v33  ;;  %v5024_v62 = vmin.f32 %v5014_v53, 0.0  ;;  %vm5020_vm13 = vcmp.gt.f32.partialorder %v5014_v53, 0.0  ;;  %v7092_v33 = vld [vmem:[%s9797_s5 + $0x178] sm:$0x3f]  ;;  %v7090_v10 = vld [vmem:[%s9797_s5 + $0x168] sm:$0xff] }
 0x4d9   : > { %7536 = vpow2.f32 %v5025_v11  ;;  %v7069_v11 = vld [vmem:[%s9797_s5 + $0xc0] sm:$0xff] }
 0x4da   : > { %v5031_v31 = vmul.f32 1.442695, %v5024_v62  ;;  %v7089_v62 = vld [vmem:[%s9797_s5 + $0x160] sm:$0xff] }
 0x4dc   : > { %7538 = vpow2.f32 %v5031_v31  ;;  %v7088_v31 = vld [vmem:[%s9797_s5 + $0x158] sm:$0xff] }
 0x4e1   : > { %v7533_v49 = vpop.eup %7532 }
 0x4e2   : > { %v7060_v21 = vadd.f32 -1.0, %v7533_v49  ;;  %v7087_v49 = vld [vmem:[%s9797_s5 + $0x150] sm:$0xff] }
 0x4e4   : > { %v5038_v6 = vsel %vm5018_vm14, %v5004_v15, %v7060_v21  ;;  %v7079_v15 = vld [vmem:[%s9797_s5 + $0x110] sm:$0xff] }
 0x4e5   : > { %v7535_v4 = vpop.eup %7534  ;;  %v5058_v27 = vmul.f32 %v9294_v63, %v5038_v6 }
 0x4e6   : > { %v7061_v47 = vadd.f32 -1.0, %v7535_v4  ;;  %v7537_v5 = vpop.eup %7536  ;;  %v7086_v4 = vld [vmem:[%s9797_s5 + $0x148] sm:$0xff] }
 0x4e7   : > { %v7059_v26 = vadd.f32 -1.0, %v7537_v5  ;;  %v5078_v39 = vadd.f32 %v9304_v13, %v5058_v27 }
 0x4e8   : > { %v5039_v52 = vsel %vm5019_vm12, %v5009_v28, %v7061_v47  ;;  %v7074_v28 = vld [vmem:[%s9797_s5 + $0xe8] sm:$0xff]  ;;  %v7085_v47 = vld [vmem:[%s9797_s5 + $0x140] sm:$0xff] }
 0x4e9   : > { %v7539_v58 = vpop.eup %7538  ;;  %v5059_v59 = vmul.f32 %v9288_v23, %v5039_v52  ;;  %v5037_v36 = vsel %vm5017_vm15, %v4999_v8, %v7059_v26  ;;  %v7081_v8 = vld [vmem:[%s9797_s5 + $0x120] sm:$0xff] }
 0x4ea   : > { %v7062_v25 = vadd.f32 -1.0, %v7539_v58  ;;  %v5057_v3 = vmul.f32 %v9298_v43, %v5037_v36 }
 0x4eb   : > { %v5079_v50 = vadd.f32 %v9296_v32, %v5059_v59 }
 0x4ec   : > { %v5040_v48 = vsel %vm5020_vm13, %v5014_v53, %v7062_v25  ;;  %v5077_v40 = vadd.f32 %v9308_v9, %v5057_v3  ;;  %v7091_v53 = vld [vmem:[%s9797_s5 + $0x170] sm:$0xff] }
 0x4ed   : > { %v5060_v16 = vmul.f32 %v9290_v1, %v5040_v48 }
 0x4ef   : > { %v5080_v29 = vadd.f32 %v9292_v24, %v5060_v16 }
 0x4f1   : > { %7255 = vmatprep.subr.mxu1 %v5080_v29 }
 0x4f2   : > { %7256 = vmatpush3.msra.mxu1 %v5080_v29 }
 0x4f3   : > { %7257 = vmatprep.subr.mxu1 %v5079_v50 }
 0x4f4   : > { %7258 = vmatpush3.msra.mxu1 %v5079_v50 }
 0x4f5   : > { %7259 = vmatprep.subr.mxu1 %v5078_v39 }
 0x4f6   : > { %7260 = vmatpush3.msra.mxu1 %v5078_v39 }
 0x4f7   : > { %7261 = vmatprep.subr.mxu1 %v5077_v40 }
 0x4f8   : > { %7262 = vmatpush3.msra.mxu1 %v5077_v40 }
 0x4f9   : > { %7264 = vmatmul.mubr.msk.f32.vlgmr.msra.gmra.mxu1 %vm5083_vm11, %v9315_v7  ;;  %7266 = vmatprep.subr.mxu1 %v5080_v29 }
 0x4fa   : > { %7267 = vmatpush3.msra.mxu1 %v5080_v29  ;;  %7274 = vmatprep.mubr.msk.f32.mxu1 %vm5083_vm11, %v9320_v0 }
 0x4fb   : > { %7268 = vmatprep.subr.mxu1 %v5079_v50 }
 0x4fc   : > { %7269 = vmatpush3.msra.mxu1 %v5079_v50 }
 0x4fd   : > { %7270 = vmatprep.subr.mxu1 %v5078_v39 }
 0x4fe   : > { %7271 = vmatpush3.msra.mxu1 %v5078_v39 }
 0x4ff   : > { %7272 = vmatprep.subr.mxu1 %v5077_v40 }
 0x500   : > { %7273 = vmatpush3.msra.mxu1 %v5077_v40 }
 0x501   : > { %7275 = vmatmul.mubr.msk.f32.vlgmr.msra.gmra.mxu1 %vm5083_vm11, %v9329_v37  ;;  %5277 = vmatprep.subr.mxu1 %v9848_v46 }
 0x502   : > { %5278 = vmatpush1.msra.mxu1 %v7084_v55  ;;  %7094 = vmatprep.mubr.msk.f32.mxu1 %vm4915_vm10, %v9239_v57  ;;  %v7080_v57 = vld [vmem:[%s9797_s5 + $0x118] sm:$0xff] }
 0x503   : > { %5279 = vmatprep.subr.mxu1 %v9848_v46 }
 0x504   : > { %5280 = vmatpush1.msra.mxu1 %v7083_v45 }
 0x505   : > { %5281 = vmatprep.subr.mxu1 %v9848_v46 }
 0x506   : > { %5282 = vmatpush1.msra.mxu1 %v7082_v61 }
 0x507   : > { %5283 = vmatprep.subr.mxu1 %v9848_v46 }
 0x508   : > { %5284 = vmatpush1.msra.mxu1 %v7081_v8 }
 0x509   : > { %5285 = vmatprep.subr.mxu1 %v9848_v46 }
 0x50a   : > { %5286 = vmatpush1.msra.mxu1 %v7080_v57 }
 0x50b   : > { %5287 = vmatprep.subr.mxu1 %v9848_v46 }
 0x50c   : > { %5288 = vmatpush1.msra.mxu1 %v7079_v15 }
 0x50d   : > { %5289 = vmatprep.subr.mxu1 %v9848_v46 }
 0x50e   : > { %5290 = vmatpush1.msra.mxu1 %v7078_v22 }
 0x50f   : > { %5291 = vmatprep.subr.mxu1 %v9848_v46 }
 0x510   : > { %5292 = vmatpush1.msra.mxu1 %v7077_v42 }
 0x511   : > { %5293 = vmatprep.subr.mxu1 %v9848_v46 }
 0x512   : > { %5294 = vmatpush1.msra.mxu1 %v7076_v54 }
 0x513   : > { %5295 = vmatprep.subr.mxu1 %v9848_v46 }
 0x514   : > { %5296 = vmatpush1.msra.mxu1 %v7075_v30 }
 0x515   : > { %5297 = vmatprep.subr.mxu1 %v9848_v46 }
 0x516   : > { %5298 = vmatpush1.msra.mxu1 %v7074_v28 }
 0x517   : > { %5299 = vmatprep.subr.mxu1 %v9848_v46 }
 0x518   : > { %5300 = vmatpush1.msra.mxu1 %v7073_v51 }
 0x519   : > { %5301 = vmatprep.subr.mxu1 %v9848_v46 }
 0x51a   : > { %5302 = vmatpush1.msra.mxu1 %v7072_v60 }
 0x51b   : > { %5303 = vmatprep.subr.mxu1 %v9848_v46 }
 0x51c   : > { %5304 = vmatpush1.msra.mxu1 %v7071_v56 }
 0x51d   : > { %5305 = vmatprep.subr.mxu1 %v9848_v46 }
 0x51e   : > { %5306 = vmatpush1.msra.mxu1 %v7070_v19 }
 0x51f   : > { %5307 = vmatprep.subr.mxu1 %v9848_v46 }
 0x520   : > { %5308 = vmatpush1.msra.mxu1 %v7069_v11 }
 0x521   : > { %5325 = vmatprep.subr.mxu1 %v9848_v46 }
 0x522   : > { %7093 = vmatpush2.msk.msra.mxu1 %vm4928_vm9, %v7092_v33 }
 0x523   : > { %5327 = vmatprep.subr.mxu1 %v9848_v46 }
 0x524   : > { %5328 = vmatpush2.msra.mxu1 %v7091_v53 }
 0x525   : > { %5329 = vmatprep.subr.mxu1 %v9848_v46 }
 0x526   : > { %5330 = vmatpush2.msra.mxu1 %v7090_v10 }
 0x527   : > { %5331 = vmatprep.subr.mxu1 %v9848_v46 }
 0x528   : > { %5332 = vmatpush2.msra.mxu1 %v7089_v62 }
 0x529   : > { %5333 = vmatprep.subr.mxu1 %v9848_v46 }
 0x52a   : > { %5334 = vmatpush2.msra.mxu1 %v7088_v31  ;;  %v5926_v31 = vld [vmem:[%s9800_s8 + $0x8] sm:$0xff] }
 0x52b   : > { %5335 = vmatprep.subr.mxu1 %v9848_v46 }
 0x52c   : > { %5336 = vmatpush2.msra.mxu1 %v7087_v49  ;;  %v5925_v49 = vld [vmem:[%s9800_s8] sm:$0xff] }
 0x52d   : > { %5337 = vmatprep.subr.mxu1 %v9848_v46 }
 0x52e   : > { %5338 = vmatpush2.msra.mxu1 %v7086_v4  ;;  %v9849_v4 = vmov 1  }
 0x52f   : > { %5339 = vmatprep.subr.mxu1 %v9848_v46 }
 0x530   : > { %5340 = vmatpush2.msra.mxu1 %v7085_v47  ;;  %v9850_v47 = vmov 2  }
 0x531   : > { %5342 = vmatmul.mubr.f32.vlgmr.msra.gmra.mxu1 %v9243_v17  ;;  %7334 = vmatprep.subr.mxu1 %v9848_v46 }
 0x532   : > { %7095 = vmatprep.mubr.msk.f32.mxu1 %vm4915_vm10, %v9249_v18 }
 0x535   : > { %5347 = vmatmul.mubr.f32.gmra.mxu1 %v9252_v35 }
 0x536   : > { %7096 = vmatprep.mubr.msk.f32.mxu1 %vm4915_vm10, %v9257_v12 }
 0x539   : > { %5352 = vmatmul.mubr.f32.gmra.mxu1 %v9259_v14 }
 0x53a   : > { %7097 = vmatprep.mubr.msk.f32.mxu1 %vm4915_vm10, %v9264_v2  ;;  %vm6723_vm10 = vcmask 97280  }
 0x53d   : > { %5357 = vmatmul.mubr.f32.gmra.mxu1 %v9266_v41 }
 0x53e   : > { %7338 = vmatprep.mubr.msk.f32.mxu1 %vm7601_vm7, %v9848_v46 }
 0x5b9   : > { %v9443_v5 = vpop.f32.mrf.mxu1 }
 0x5bb   : > { %v9445_v17 = vpop.f32.mrf.mxu1 }
 0x5c1   : > { %v9447_v21 = vpop.f32.mrf.mxu1 }
 0x5c2   : > { %v5545_v18 = vmax.f32 %v9443_v5, %v9447_v21  ;;  %v7107_v21 = vld [vmem:[%s9799_s7 + $0x18] sm:$0xff] }
 0x5c3   : > { %v9451_v35 = vpop.f32.mrf.mxu1 }
 0x5c4   : > { %v5544_v12 = vmax.f32 %v9445_v17, %v9451_v35 }
 0x5f1   : > { %v5343_v14 = vpop.f32.mrf.mxu1 }
 0x5f2   : > { %v5344_v2 = vadd.f32 %v5343_v14, %v9280_v34  ;;  %v7112_v14 = vld [vmem:[%s9799_s7 + $0x20] sm:$0xff] }
 0x5f3   : > { %v5345_v58 = vpop.f32.mrf.mxu1 }
 0x5f4   : > { %v5366_v6 = vmin.f32 %v5344_v2, 0.0  ;;  %vm5362_vm4 = vcmp.gt.f32.partialorder %v5344_v2, 0.0 }
 0x5f5   : > { %v5348_v25 = vpop.f32.mrf.mxu1 }
 0x5f6   : > { %v5349_v41 = vadd.f32 %v5348_v25, %v9278_v44  ;;  %v5370_v3 = vmul.f32 1.442695, %v5366_v6  ;;  %v7113_v25 = vld [vmem:[%s9799_s7 + $0x28] sm:$0xff] }
 0x5f7   : > { %v5350_v52 = vpop.f32.mrf.mxu1 }
 0x5f8   : > { %v5367_v26 = vmin.f32 %v5349_v41, 0.0  ;;  %vm5363_vm2 = vcmp.gt.f32.partialorder %v5349_v41, 0.0 }
 0x5f9   : > { %v5353_v48 = vpop.f32.mrf.mxu1 }
 0x5fa   : > { %v5354_v16 = vadd.f32 %v5353_v48, %v9284_v38  ;;  %v5372_v59 = vmul.f32 1.442695, %v5367_v26  ;;  %v7117_v26 = vld [vmem:[%s9799_s7 + $0x38] sm:$0xff] }
 0x5fb   : > { %v5355_v36 = vpop.f32.mrf.mxu1 }
 0x5fc   : > { %v5368_v27 = vmin.f32 %v5354_v16, 0.0  ;;  %7540 = vpow2.f32 %v5372_v59  ;;  %vm5364_vm1 = vcmp.gt.f32.partialorder %v5354_v16, 0.0 }
 0x5fd   : > { %v5358_v29 = vpop.f32.mrf.mxu1 }
 0x5fe   : > { %v5374_v50 = vmul.f32 1.442695, %v5368_v27  ;;  %v5359_v39 = vadd.f32 %v5358_v29, %v9276_v20 }
 0x5ff   : > { %v5360_v40 = vpop.f32.mrf.mxu1 }
 0x600   : > { %7542 = vpow2.f32 %v5374_v50  ;;  %v5369_v34 = vmin.f32 %v5359_v39, 0.0  ;;  %vm5365_vm3 = vcmp.gt.f32.partialorder %v5359_v39, 0.0 }
 0x601   : > { %7544 = vpow2.f32 %v5370_v3 }
 0x602   : > { %v5376_v44 = vmul.f32 1.442695, %v5369_v34 }
 0x604   : > { %7546 = vpow2.f32 %v5376_v44 }
 0x609   : > { %v7541_v55 = vpop.eup %7540 }
 0x60a   : > { %v7099_v38 = vadd.f32 -1.0, %v7541_v55 }
 0x60c   : > { %v5383_v20 = vsel %vm5363_vm2, %v5349_v41, %v7099_v38 }
 0x60d   : > { %v7543_v45 = vpop.eup %7542  ;;  %v5387_v60 = vmul.f32 %v5383_v20, %v9294_v63 }
 0x60e   : > { %v7100_v61 = vadd.f32 -1.0, %v7543_v45  ;;  %v7545_v8 = vpop.eup %7544 }
 0x60f   : > { %v7098_v15 = vadd.f32 -1.0, %v7545_v8  ;;  %v5391_v33 = vadd.f32 %v5387_v60, %v9304_v13 }
 0x610   : > { %v5384_v22 = vsel %vm5364_vm1, %v5354_v16, %v7100_v61 }
 0x611   : > { %v7547_v57 = vpop.eup %7546  ;;  %v5388_v30 = vmul.f32 %v5384_v22, %v9288_v23  ;;  %v5382_v51 = vsel %vm5362_vm4, %v5344_v2, %v7098_v15  ;;  %v7116_v2 = vld [vmem:[%s9799_s7 + $0x30] sm:$0xff] }
 0x612   : > { %v7101_v42 = vadd.f32 -1.0, %v7547_v57  ;;  %v5386_v19 = vmul.f32 %v5382_v51, %v9298_v43 }
 0x613   : > { %v5392_v11 = vadd.f32 %v5388_v30, %v9296_v32 }
 0x614   : > { %v5385_v54 = vsel %vm5365_vm3, %v5359_v39, %v7101_v42  ;;  %v5390_v23 = vadd.f32 %v5386_v19, %v9308_v9 }
 0x615   : > { %v5389_v28 = vmul.f32 %v5385_v54, %v9290_v1 }
 0x617   : > { %v5393_v56 = vadd.f32 %v5389_v28, %v9292_v24 }
 0x619   : > { %7277 = vmatprep.subr.mxu0 %v5393_v56 }
 0x61a   : > { %7278 = vmatpush3.msra.mxu0 %v5393_v56 }
 0x61b   : > { %7279 = vmatprep.subr.mxu0 %v5392_v11 }
 0x61c   : > { %7280 = vmatpush3.msra.mxu0 %v5392_v11 }
 0x61d   : > { %7281 = vmatprep.subr.mxu0 %v5391_v33 }
 0x61e   : > { %7282 = vmatpush3.msra.mxu0 %v5391_v33 }
 0x61f   : > { %7283 = vmatprep.subr.mxu0 %v5390_v23 }
 0x620   : > { %7284 = vmatpush3.msra.mxu0 %v5390_v23 }
 0x621   : > { %7286 = vmatmul.mubr.msk.f32.vlgmr.msra.gmra.mxu0 %vm5083_vm11, %v9315_v7  ;;  %7288 = vmatprep.subr.mxu0 %v5393_v56 }
 0x622   : > { %7289 = vmatpush3.msra.mxu0 %v5393_v56  ;;  %7296 = vmatprep.mubr.msk.f32.mxu0 %vm5083_vm11, %v9320_v0 }
 0x623   : > { %7290 = vmatprep.subr.mxu0 %v5392_v11 }
 0x624   : > { %7291 = vmatpush3.msra.mxu0 %v5392_v11 }
 0x625   : > { %7292 = vmatprep.subr.mxu0 %v5391_v33 }
 0x626   : > { %7293 = vmatpush3.msra.mxu0 %v5391_v33 }
 0x627   : > { %7294 = vmatprep.subr.mxu0 %v5390_v23 }
 0x628   : > { %7295 = vmatpush3.msra.mxu0 %v5390_v23 }
 0x629   : > { %7297 = vmatmul.mubr.msk.f32.vlgmr.msra.gmra.mxu0 %vm5083_vm11, %v9329_v37  ;;  %v7106_v37 = vld [vmem:[%s9799_s7 + $0x10] sm:$0xff]  ;;  %vm6741_vm11 = vcmask 0  }
 0x62a   : > { %7303 = vmatprep.mubr.msk.f32.mxu0 %vm525_vm0, %v7106_v37  ;;  %v9573_v37 = vld [vmem:[%s9802_s10 + $0x18] sm:$0xff] }
 0x6e1   : > { %v7287_v1 = vpop.f32.mrf.mxu0 }
 0x6e2   : > { %v5547_v63 = vmax.f32 %v5545_v18, %v7287_v1  ;;  %v5564_v18 = vld [vmem:[%s9799_s7] sm:$0xff] }
 0x6e3   : > { %v5460_v24 = vpop.f32.mrf.mxu0 }
 0x6e4   : > { %v5546_v9 = vmax.f32 %v5544_v12, %v5460_v24  ;;  %v5565_v12 = vld [vmem:[%s9799_s7 + $0x8] sm:$0xff] }
 0x6e9   : > { %v7298_v32 = vpop.f32.mrf.mxu0 }
 0x6ea   : > { %v5549_v43 = vmax.f32 %v5547_v63, %v7298_v32  ;;  %v5971_v32 = vld [vmem:[%s9801_s9] sm:$0xff] }
 0x6eb   : > { %v5535_v13 = vpop.f32.mrf.mxu0 }
 0x6ec   : > { %5557 = vrot.lane.b32.xlu1 %v5549_v43, %s7600_s25  ;;  %v5548_v7 = vmax.f32 %v5546_v9, %v5535_v13  ;;  %v7123_v43 = vld [vmem:[%s9801_s9 + $0x8] sm:$0xff]  ;;  %v9550_v9 = vld [vmem:[%s9802_s10 + $0x58] sm:$0xff] }
 0x6ed   : > { %v9545_v13 = vld [vmem:[%s9802_s10 + $0x28] sm:$0xff] }
 0x6f0   : > { %5555 = vrot.lane.b32.xlu1 %v5548_v7, %s7600_s25  ;;  %v9559_v7 = vld [vmem:[%s9802_s10 + $0x20] sm:$0xff] }
 0x75e   : > { %v5558_v0 = vpop.permute.xlu1 %5557 }
 0x75f   : > { %5563 = vst.msk [vmem:[#allocation3 + $0x8] sm:$0xff] %vm5561_vm6, %v5558_v0  ;;  %v9564_v0 = vld [vmem:[%s9802_s10 + $0x50] sm:$0xff] }
 0x762   : > { %v5556_v53 = vpop.permute.xlu1 %5555 }
 0x763   : > { %5562 = vst.msk [vmem:[#allocation3] sm:$0xff] %vm5561_vm6, %v5556_v53  ;;  %v9578_v53 = vld [vmem:[%s9802_s10 + $0x48] sm:$0xff] }
 0x766   : > { %v5567_v10 = vld [vmem:[#allocation3 + $0x8] sm:$0xff] }
 0x767   : > { %5575 = vrot.lane.b32.xlu0 %v5567_v10, %s7569_s16 }
 0x76a   : > { %v5566_v62 = vld [vmem:[#allocation3] sm:$0xff] }
 0x76b   : > { %5746 = vrot.lane.b32.xlu0 %v5567_v10, %s7570_s17  ;;  %5573 = vrot.lane.b32.xlu1 %v5566_v62, %s7569_s16 }
 0x76f   : > { %5838 = vrot.lane.b32.xlu0 %v5567_v10, %s7571_s18  ;;  %5744 = vrot.lane.b32.xlu1 %v5566_v62, %s7570_s17 }
 0x773   : > { %5836 = vrot.lane.b32.xlu1 %v5566_v62, %s7571_s18  ;;  %5934 = vperm.xlu0 %7518, %v5926_v31  }
 0x777   : > { %5929 = vperm.xlu1 %7519, %v5925_v49   ;;  %7521 = vset.pattern.permute.xlu0 %v9849_v4 }
 0x778   : > { %5952 = vperm.xlu0 %7521, %v5925_v49  }
 0x77b   : > { %7520 = vset.pattern.permute.xlu1 %v9849_v4  ;;  %v9615_v4 = vld [vmem:[%s9802_s10] sm:$0xff] }
 0x77c   : > { %5956 = vperm.xlu1 %7520, %v5926_v31   ;;  %7523 = vset.pattern.permute.xlu0 %v9850_v47 }
 0x780   : > { %7522 = vset.pattern.permute.xlu1 %v9850_v47  ;;  %v9620_v47 = vld [vmem:[%s9802_s10 + $0x30] sm:$0xff] }
 0x781   : > { %5966 = vperm.xlu1 %7522, %v5926_v31   ;;  %v9601_v31 = vld [vmem:[%s9802_s10 + $0x8] sm:$0xff] }
 0x785   : > { %5962 = vperm.xlu1 %7522, %v5925_v49   ;;  %v9606_v49 = vld [vmem:[%s9802_s10 + $0x38] sm:$0xff] }
 0x7d9   : > { %v5576_v5 = vpop.permute.xlu0 %5575 }
 0x7da   : > { %7299 = vmatprep.subr.mxu0 %v5576_v5 }
 0x7db   : > { %7300 = vmatpush3.msra.mxu0 %v5576_v5  ;;  %v9637_v5 = vld [vmem:[%s9802_s10 + $0x88] sm:$0xff] }
 0x7dd   : > { %v5574_v17 = vpop.permute.xlu1 %5573  ;;  %v5747_v35 = vpop.permute.xlu0 %5746 }
 0x7de   : > { %7301 = vmatprep.subr.mxu0 %v5574_v17 }
 0x7df   : > { %7302 = vmatpush3.msra.mxu0 %v5574_v17  ;;  %v9642_v17 = vld [vmem:[%s9802_s10 + $0xb8] sm:$0xff] }
 0x7e0   : > { %7304 = vmatmul.mubr.msk.f32.vlgmr.msra.gmra.mxu0 %vm525_vm0, %v7107_v21  ;;  %7306 = vmatprep.subr.mxu0 %v5567_v10 }
 0x7e1   : > { %7307 = vmatpush3.msra.mxu0 %v5567_v10  ;;  %7310 = vmatprep.mubr.msk.f32.mxu0 %vm525_vm0, %v5564_v18  ;;  %v5745_v58 = vpop.permute.xlu1 %5744  ;;  %v5839_v41 = vpop.permute.xlu0 %5838  ;;  %v9587_v10 = vld [vmem:[%s9802_s10 + $0x10] sm:$0xff] }
 0x7e2   : > { %7308 = vmatprep.subr.mxu0 %v5566_v62 }
 0x7e3   : > { %7309 = vmatpush3.msra.mxu0 %v5566_v62  ;;  %v9592_v62 = vld [vmem:[%s9802_s10 + $0x40] sm:$0xff] }
 0x7e4   : > { %7311 = vmatmul.mubr.msk.f32.vlgmr.msra.gmra.mxu0 %vm525_vm0, %v5565_v12  ;;  %7313 = vmatprep.subr.mxu0 %v5747_v35  ;;  %v9656_v12 = vld [vmem:[%s9802_s10 + $0xb0] sm:$0xff] }
 0x7e5   : > { %7314 = vmatpush3.msra.mxu0 %v5747_v35  ;;  %7317 = vmatprep.mubr.msk.f32.mxu0 %vm525_vm0, %v7112_v14  ;;  %v5837_v52 = vpop.permute.xlu1 %5836  ;;  %v9651_v35 = vld [vmem:[%s9802_s10 + $0x80] sm:$0xff] }
 0x7e6   : > { %7315 = vmatprep.subr.mxu0 %v5745_v58 }
 0x7e7   : > { %7316 = vmatpush3.msra.mxu0 %v5745_v58 }
 0x7e8   : > { %7318 = vmatmul.mubr.msk.f32.vlgmr.msra.gmra.mxu0 %vm525_vm0, %v7113_v25  ;;  %7320 = vmatprep.subr.mxu0 %v5839_v41  ;;  %v9665_v25 = vld [vmem:[%s9802_s10 + $0x78] sm:$0xff] }
 0x7e9   : > { %7321 = vmatpush3.msra.mxu0 %v5839_v41  ;;  %7324 = vmatprep.mubr.msk.f32.mxu0 %vm525_vm0, %v7116_v2  ;;  %v9670_v2 = vld [vmem:[%s9802_s10 + $0xa8] sm:$0xff]  ;;  %v9679_v41 = vld [vmem:[%s9802_s10 + $0x70] sm:$0xff] }
 0x7ea   : > { %7322 = vmatprep.subr.mxu0 %v5837_v52 }
 0x7eb   : > { %7323 = vmatpush3.msra.mxu0 %v5837_v52  ;;  %v9684_v52 = vld [vmem:[%s9802_s10 + $0xa0] sm:$0xff] }
 0x7ec   : > { %7325 = vmatmul.mubr.msk.f32.vlgmr.msra.gmra.mxu0 %vm525_vm0, %v7117_v26  ;;  %7327 = vmatprep.subr.mxu0 %v9848_v46  ;;  %v9693_v26 = vld [vmem:[%s9802_s10 + $0x68] sm:$0xff] }
 0x7ed   : > { %7331 = vmatprep.mubr.msk.f32.mxu0 %vm7601_vm7, %v9848_v46 }
 0x7ee   : > { %v5935_v40 = vpop.permute.xlu0 %5934 }
 0x7f2   : > { %v5930_v45 = vpop.permute.xlu1 %5929 }
 0x7f3   : > { %v5953_v56 = vpop.permute.xlu0 %5952 }
 0x7f7   : > { %v5957_v20 = vpop.permute.xlu1 %5956 }
 0x7fc   : > { %v5967_v28 = vpop.permute.xlu1 %5966 }
 0x800   : > { %v5963_v24 = vpop.permute.xlu1 %5962 }
 0x8a0   : > { %v7305_v48 = vpop.f32.mrf.mxu0 }
 0x8a2   : > { %v5651_v6 = vpop.f32.mrf.mxu0 }
 0x8a4   : > { %v7312_v16 = vpop.f32.mrf.mxu0 }
 0x8a5   : > { %v5738_v27 = vadd.f32 %v7312_v16, %v7305_v48  ;;  %v9698_v48 = vld [vmem:[%s9802_s10 + $0x98] sm:$0xff]  ;;  %v7140_v16 = vld [vmem:[%s9802_s10 + $0x90] sm:$0xff] }
 0x8a6   : > { %v5732_v59 = vpop.f32.mrf.mxu0 }
 0x8a7   : > { %v5733_v3 = vadd.f32 %v5732_v59, %v5651_v6  ;;  %v7133_v6 = vld [vmem:[%s9802_s10 + $0x60] sm:$0xff] }
 0x8a8   : > { %v7319_v36 = vpop.f32.mrf.mxu0 }
 0x8a9   : > { %v5832_v50 = vadd.f32 %v7319_v36, %v5738_v27 }
 0x8aa   : > { %v5822_v29 = vpop.f32.mrf.mxu0 }
 0x8ab   : > { %v5831_v34 = vadd.f32 %v5822_v29, %v5733_v3 }
 0x8ac   : > { %v7326_v39 = vpop.f32.mrf.mxu0 }
 0x8ad   : > { %v5924_v44 = vadd.f32 %v7326_v39, %v5832_v50 }
 0x8ae   : > { %v5914_v55 = vpop.f32.mrf.mxu0 }
 0x8af   : > { %v5938_v61 = vadd.f32 %v5935_v40, %v5924_v44  ;;  %v5923_v8 = vadd.f32 %v5914_v55, %v5831_v34 }
 0x8b1   : > { %v5942_v38 = vmin.f32 %v5938_v61, 0.0  ;;  %v5937_v57 = vadd.f32 %v5930_v45, %v5923_v8  ;;  %vm5940_vm8 = vcmp.gt.f32.partialorder %v5938_v61, 0.0 }
 0x8b3   : > { %v5945_v15 = vmul.f32 1.442695, %v5942_v38  ;;  %v5941_v22 = vmin.f32 %v5937_v57, 0.0  ;;  %vm5939_vm9 = vcmp.gt.f32.partialorder %v5937_v57, 0.0 }
 0x8b5   : > { %7548 = vpow2.f32 %v5945_v15  ;;  %v5943_v42 = vmul.f32 1.442695, %v5941_v22 }
 0x8b7   : > { %7550 = vpow2.f32 %v5943_v42 }
 0x8c2   : > { %v7549_v54 = vpop.eup %7548 }
 0x8c3   : > { %v7121_v30 = vadd.f32 -1.0, %v7549_v54 }
 0x8c4   : > { %v7551_v51 = vpop.eup %7550 }
 0x8c5   : > { %v5950_v60 = vsel %vm5940_vm8, %v5938_v61, %v7121_v30  ;;  %v7120_v19 = vadd.f32 -1.0, %v7551_v51 }
 0x8c6   : > { %v5960_v11 = vmul.f32 %v5957_v20, %v5950_v60  ;;  %v6721_v20 = vld [vmem:[%s9803_s11] sm:$0xff] }
 0x8c7   : > { %v5949_v33 = vsel %vm5939_vm9, %v5937_v57, %v7120_v19 }
 0x8c8   : > { %v5970_v23 = vadd.f32 %v5967_v28, %v5960_v11  ;;  %v5959_v1 = vmul.f32 %v5953_v56, %v5949_v33 }
 0x8ca   : > { %v5969_v63 = vadd.f32 %v5963_v24, %v5959_v1  ;;  %7328 = vmatpush3.msra.mxu0 %v5970_v23  ;;  %7335 = vmatpush3.msra.mxu1 %v5970_v23  ;;  %v6733_v24 = vld [vmem:[#allocation4] sm:$0x1] }
 0x8cb   : > { %7329 = vmatprep.subr.mxu0 %v9848_v46  ;;  %7336 = vmatprep.subr.mxu1 %v9848_v46 }
 0x8cc   : > { %7330 = vmatpush3.msra.mxu0 %v5969_v63  ;;  %7337 = vmatpush3.msra.mxu1 %v5969_v63 }
 0x8cd   : > { %7332 = vmatmul.mubr.msk.f32.vlgmr.msra.gmra.mxu0 %vm525_vm0, %v5971_v32  ;;  %7339 = vmatmul.mubr.msk.f32.vlgmr.msra.gmra.mxu1 %vm525_vm0, %v7123_v43  ;;  %vm6126_vm0 = vcmask 392192  }
 0x8ce   : > { %7341 = vmatprep.subr.mxu0 %v9848_v46  ;;  %7356 = vmatprep.subr.mxu1 %v9848_v46 }
 0x8cf   : > { %7342 = vmatpush3.msra.mxu0 %v9545_v13  ;;  %7357 = vmatpush3.msra.mxu1 %v9550_v9 }
 0x8d0   : > { %7343 = vmatprep.subr.mxu0 %v9848_v46  ;;  %7358 = vmatprep.subr.mxu1 %v9848_v46 }
 0x8d1   : > { %7344 = vmatpush3.msra.mxu0 %v9559_v7  ;;  %7359 = vmatpush3.msra.mxu1 %v9564_v0 }
 0x8d2   : > { %7345 = vmatprep.subr.mxu0 %v9848_v46  ;;  %7360 = vmatprep.subr.mxu1 %v9848_v46 }
 0x8d3   : > { %7346 = vmatpush3.msra.mxu0 %v9573_v37  ;;  %7361 = vmatpush3.msra.mxu1 %v9578_v53 }
 0x8d4   : > { %7347 = vmatprep.subr.mxu0 %v9848_v46  ;;  %7362 = vmatprep.subr.mxu1 %v9848_v46 }
 0x8d5   : > { %7348 = vmatpush3.msra.mxu0 %v9587_v10  ;;  %7363 = vmatpush3.msra.mxu1 %v9592_v62 }
 0x8d6   : > { %7349 = vmatprep.subr.mxu0 %v9848_v46  ;;  %7364 = vmatprep.subr.mxu1 %v9848_v46 }
 0x8d7   : > { %7350 = vmatpush3.msra.mxu0 %v9601_v31  ;;  %7365 = vmatpush3.msra.mxu1 %v9606_v49 }
 0x8d8   : > { %7351 = vmatprep.subr.mxu0 %v9848_v46  ;;  %7366 = vmatprep.subr.mxu1 %v9848_v46 }
 0x8d9   : > { %7352 = vmatpush3.msra.mxu0 %v9615_v4  ;;  %7367 = vmatpush3.msra.mxu1 %v9620_v47 }
 0x8da   : > { %7353 = vmatprep.mubr.msk.f32.mxu0 %vm7601_vm7, %v9848_v46  ;;  %7368 = vmatprep.mubr.msk.f32.mxu1 %vm7601_vm7, %v9848_v46 }
 0x8db   : > { %7371 = vmatprep.subr.mxu0 %v9848_v46  ;;  %7386 = vmatprep.subr.mxu1 %v9848_v46 }
 0x98d   : > { %v6041_v21 = vpop.f32.mrf.mxu0  ;;  %v9644_v18 = vpop.f32.mrf.mxu1 }
 0x98e   : > { %7354 = vmatmul.mubr.msk.f32.vlgmr.msra.gmra.mxu0 %vm6126_vm0, %v6041_v21  ;;  %7369 = vmatmul.mubr.msk.f32.vlgmr.msra.gmra.mxu1 %vm6126_vm0, %v6041_v21 }
 0x98f   : > { %7372 = vmatpush3.msra.mxu0 %v9637_v5  ;;  %7387 = vmatpush3.msra.mxu1 %v9642_v17  ;;  %v7333_v14 = vpop.f32.mrf.mxu0  ;;  %v7340_v58 = vpop.f32.mrf.mxu1 }
 0x990   : > { %7373 = vmatprep.subr.mxu0 %v9848_v46  ;;  %7388 = vmatprep.subr.mxu1 %v9848_v46 }
 0x991   : > { %7374 = vmatpush3.msra.mxu0 %v9651_v35  ;;  %7389 = vmatpush3.msra.mxu1 %v9656_v12 }
 0x992   : > { %7375 = vmatprep.subr.mxu0 %v9848_v46  ;;  %7390 = vmatprep.subr.mxu1 %v9848_v46 }
 0x993   : > { %7376 = vmatpush3.msra.mxu0 %v9665_v25  ;;  %7391 = vmatpush3.msra.mxu1 %v9670_v2 }
 0x994   : > { %7377 = vmatprep.subr.mxu0 %v9848_v46  ;;  %7392 = vmatprep.subr.mxu1 %v9848_v46 }
 0x995   : > { %7378 = vmatpush3.msra.mxu0 %v9679_v41  ;;  %7393 = vmatpush3.msra.mxu1 %v9684_v52 }
 0x996   : > { %7379 = vmatprep.subr.mxu0 %v9848_v46  ;;  %7394 = vmatprep.subr.mxu1 %v9848_v46 }
 0x997   : > { %7380 = vmatpush3.msra.mxu0 %v9693_v26  ;;  %7395 = vmatpush3.msra.mxu1 %v9698_v48 }
 0x998   : > { %7381 = vmatprep.subr.mxu0 %v9848_v46  ;;  %7396 = vmatprep.subr.mxu1 %v9848_v46 }
 0x999   : > { %7382 = vmatpush3.msra.mxu0 %v7133_v6  ;;  %7383 = vmatprep.mubr.msk.f32.mxu0 %vm7601_vm7, %v9848_v46 }
 0x99a   : > { %7397 = vmatpush3.msra.mxu1 %v7140_v16  ;;  %7398 = vmatprep.mubr.msk.f32.mxu1 %vm7601_vm7, %v9848_v46 }
 0x99b   : > { %7384 = vmatmul.mubr.msk.f32.vlgmr.msra.gmra.mxu0 %vm6126_vm0, %v6041_v21  ;;  %7399 = vmatmul.mubr.msk.f32.vlgmr.msra.gmra.mxu1 %vm6126_vm0, %v6041_v21 }
 0x99c   : > { %7401 = vmatprep.subr.mxu0 %v9848_v46  ;;  %7416 = vmatprep.subr.mxu1 %v9848_v46 }
 0x99d   : > { %7402 = vmatpush3.msra.mxu0 %v9545_v13  ;;  %7417 = vmatpush3.msra.mxu1 %v9550_v9 }
 0x99e   : > { %7403 = vmatprep.subr.mxu0 %v9848_v46  ;;  %7418 = vmatprep.subr.mxu1 %v9848_v46 }
 0x99f   : > { %7404 = vmatpush3.msra.mxu0 %v9559_v7  ;;  %7419 = vmatpush3.msra.mxu1 %v9564_v0 }
 0x9a0   : > { %7405 = vmatprep.subr.mxu0 %v9848_v46  ;;  %7420 = vmatprep.subr.mxu1 %v9848_v46 }
 0x9a1   : > { %7406 = vmatpush3.msra.mxu0 %v9573_v37  ;;  %7421 = vmatpush3.msra.mxu1 %v9578_v53 }
 0x9a2   : > { %7407 = vmatprep.subr.mxu0 %v9848_v46  ;;  %7422 = vmatprep.subr.mxu1 %v9848_v46 }
 0x9a3   : > { %7408 = vmatpush3.msra.mxu0 %v9587_v10  ;;  %7423 = vmatpush3.msra.mxu1 %v9592_v62 }
 0x9a4   : > { %7409 = vmatprep.subr.mxu0 %v9848_v46  ;;  %7424 = vmatprep.subr.mxu1 %v9848_v46 }
 0x9a5   : > { %7410 = vmatpush3.msra.mxu0 %v9601_v31  ;;  %7425 = vmatpush3.msra.mxu1 %v9606_v49 }
 0x9a6   : > { %7411 = vmatprep.subr.mxu0 %v9848_v46  ;;  %7426 = vmatprep.subr.mxu1 %v9848_v46 }
 0x9a7   : > { %7412 = vmatpush3.msra.mxu0 %v9615_v4  ;;  %7413 = vmatprep.mubr.msk.f32.mxu0 %vm7601_vm7, %v9848_v46 }
 0x9a8   : > { %7427 = vmatpush3.msra.mxu1 %v9620_v47  ;;  %7414 = vmatmul.mubr.msk.f32.vlgmr.msra.gmra.mxu0 %vm6126_vm0, %v9644_v18 }
 0x9a9   : > { %7428 = vmatprep.mubr.msk.f32.mxu1 %vm7601_vm7, %v9848_v46  ;;  %7431 = vmatprep.subr.mxu0 %v9848_v46 }
 0x9aa   : > { %7446 = vmatprep.subr.mxu1 %v9848_v46  ;;  %7429 = vmatmul.mubr.msk.f32.vlgmr.msra.gmra.mxu1 %vm6126_vm0, %v9644_v18 }
 0x9ab   : > { %7432 = vmatpush3.msra.mxu0 %v9637_v5  ;;  %7447 = vmatpush3.msra.mxu1 %v9642_v17 }
 0x9ac   : > { %7433 = vmatprep.subr.mxu0 %v9848_v46  ;;  %7448 = vmatprep.subr.mxu1 %v9848_v46 }
 0x9ad   : > { %7434 = vmatpush3.msra.mxu0 %v9651_v35  ;;  %7449 = vmatpush3.msra.mxu1 %v9656_v12 }
 0x9ae   : > { %7435 = vmatprep.subr.mxu0 %v9848_v46  ;;  %7450 = vmatprep.subr.mxu1 %v9848_v46 }
 0x9af   : > { %7436 = vmatpush3.msra.mxu0 %v9665_v25  ;;  %7451 = vmatpush3.msra.mxu1 %v9670_v2 }
 0x9b0   : > { %7437 = vmatprep.subr.mxu0 %v9848_v46  ;;  %7452 = vmatprep.subr.mxu1 %v9848_v46 }
 0x9b1   : > { %7438 = vmatpush3.msra.mxu0 %v9679_v41  ;;  %7453 = vmatpush3.msra.mxu1 %v9684_v52 }
 0x9b2   : > { %7439 = vmatprep.subr.mxu0 %v9848_v46  ;;  %7454 = vmatprep.subr.mxu1 %v9848_v46 }
 0x9b3   : > { %7440 = vmatpush3.msra.mxu0 %v9693_v26  ;;  %7455 = vmatpush3.msra.mxu1 %v9698_v48 }
 0x9b4   : > { %7441 = vmatprep.subr.mxu0 %v9848_v46  ;;  %7456 = vmatprep.subr.mxu1 %v9848_v46 }
 0x9b5   : > { %7442 = vmatpush3.msra.mxu0 %v7133_v6  ;;  %7443 = vmatprep.mubr.msk.f32.mxu0 %vm7601_vm7, %v9848_v46 }
 0x9b6   : > { %7457 = vmatpush3.msra.mxu1 %v7140_v16  ;;  %7458 = vmatprep.mubr.msk.f32.mxu1 %vm7601_vm7, %v9848_v46 }
 0x9b7   : > { %7444 = vmatmul.mubr.msk.f32.vlgmr.msra.gmra.mxu0 %vm6126_vm0, %v9644_v18  ;;  %7459 = vmatmul.mubr.msk.f32.vlgmr.msra.gmra.mxu1 %vm6126_vm0, %v9644_v18 }
 0xa4e   : > { %v6196_v59 = vpop.f32.mrf.mxu0  ;;  %v6273_v36 = vpop.f32.mrf.mxu1 }
 0xa4f   : > { %v6714_v44 = vmax.f32 %v6196_v59, %v6273_v36 }
 0xa50   : > { %v7355_v27 = vpop.f32.mrf.mxu0  ;;  %v7370_v29 = vpop.f32.mrf.mxu1 }
 0xa5b   : > { %v6350_v3 = vpop.f32.mrf.mxu0  ;;  %v6427_v50 = vpop.f32.mrf.mxu1 }
 0xa5c   : > { %v6715_v61 = vmax.f32 %v6714_v44, %v6350_v3 }
 0xa5d   : > { %v7385_v39 = vpop.f32.mrf.mxu0  ;;  %v7400_v40 = vpop.f32.mrf.mxu1 }
 0xa5e   : > { %v6716_v8 = vmax.f32 %v6715_v61, %v6427_v50 }
 0xa68   : > { %v6500_v34 = vpop.f32.mrf.mxu0 }
 0xa69   : > { %v6717_v38 = vmax.f32 %v6716_v8, %v6500_v34 }
 0xa6a   : > { %v6570_v55 = vpop.f32.mrf.mxu1  ;;  %v7415_v45 = vpop.f32.mrf.mxu0 }
 0xa6b   : > { %v6718_v57 = vmax.f32 %v6717_v38, %v6570_v55 }
 0xa6c   : > { %v7430_v46 = vpop.f32.mrf.mxu1 }
 0xa77   : > { %v6640_v15 = vpop.f32.mrf.mxu0  ;;  %v6710_v22 = vpop.f32.mrf.mxu1 }
 0xa78   : > { %v6719_v42 = vmax.f32 %v6718_v57, %v6640_v15 }
 0xa79   : > { %v7445_v54 = vpop.f32.mrf.mxu0  ;;  %v7460_v30 = vpop.f32.mrf.mxu1 }
 0xa7a   : > { %v6720_v28 = vmax.f32 %v6719_v42, %v6710_v22 }
 0xa7c   : > { %v6722_v51 = vmul.f32 %v6721_v20, %v6720_v28 }
 0xa7e   : > { %v6724_v60 = vsel %vm6723_vm10, %v6722_v51, 0.0 }
 0xa7f   : > { %6725 = vadd.xlane.f32.xlu0 %v6724_v60 }
 0xb08   : > { %v6726_v56 = vpop.xlane.xlu0 %6725 }
 0xb09   : > { %v6727_v19 = vrot.slane %v6726_v56, 4 }
 0xb0b   : > { %v6728_v11 = vadd.f32 %v6727_v19, %v6726_v56 }
 0xb0d   : > { %v6729_v33 = vrot.slane %v6728_v11, 2 }
 0xb0f   : > { %v6730_v23 = vadd.f32 %v6729_v33, %v6728_v11 }
 0xb11   : > { %v6731_v1 = vrot.slane %v6730_v23, 1 }
 0xb13   : > { %v6732_v63 = vadd.f32 %v6731_v1, %v6730_v23 }
 0xb15   : > { %v6734_v32 = vadd.f32 %v6733_v24, %v6732_v63 }
 0xb17   : > { %v6735_v43 = vsub.f32 0.0, %v6734_v32 }
 0xb19   : > { %v6736_v13 = vmul.f32 1.442695, %v6735_v43 }
 0xb1b   : > { %7552 = vpow2.f32 %v6736_v13 }
 0xb28   : > { %v7553_v9 = vpop.eup %7552 }
 0xb29   : > { %v6738_v7 = vadd.f32 1.0, %v7553_v9 }
 0xb2b   : > { %7554 = vrcp.f32 %v6738_v7 }
 0xb38   : > { %v7555_v0 = vpop.eup %7554 }
 0xb39   : > { %6742 = vst.msk [vmem:[%s438_s22] sm:$0x1] %vm6741_vm11, %v7555_v0 }
 0xb3a PF: > { %s25_s27 = sadd.s32 1, %s7562_s27  }
 0xb3b   : > { %p22_p4 = scmp.ge.s32.totalorder %s25_s27, 4  }
 0xb3d   :  { %24 = sbr.rel (!%p22_p4) target bundleno = 3 (0x3), region = 142 }

</bundles_post_ra>
